<compile_context>
chip_gen: v7x
topology: tpu7x:2x2x1
jax: 0.10.0
libtpu: 0.0.40
codegen_flags: <defaults>
</compile_context>

<pallas_src>
import math

import jax
import jax.numpy as jnp
from jax import lax
from jax.experimental import pallas as pl
from jax.experimental.pallas import tpu as pltpu


# ----------------------------------------------------------------------------
# Row tiling: biggest tile <= 512 that keeps exact tiles (after padding) and,
# at realistic batch sizes, >= 2 "parallel" grid steps for megacore sharding.
# ----------------------------------------------------------------------------
def _row_tile(rows):
    if rows >= 2048:
        return 512
    if rows >= 512:
        return 256
    if rows >= 128:
        return 128
    return -(-rows // 16) * 16     # tiny: one block covering all (padded) rows


def _pad_rows(x, tile):
    pad = -x.shape[0] % tile
    if pad:
        x = jnp.pad(x, ((0, pad), (0, 0)))
    return x


# ----------------------------------------------------------------------------
# Pallas kernel 1: row-tiled fused GEMM + bias + ReLU (conv1..conv3 as GEMMs)
# ----------------------------------------------------------------------------
def _gemm_bias_relu_kernel(x_ref, w_ref, b_ref, o_ref):
    # x_ref: (tm, K) bf16 im2col rows; w_ref: (K, OC) bf16; b_ref: (1, OC) f32.
    acc = jnp.dot(x_ref[...], w_ref[...], preferred_element_type=jnp.float32)
    o_ref[...] = jnp.maximum(acc + b_ref[...], 0.0).astype(o_ref.dtype)


def gemm_bias_relu(x, w, b):
    """relu(x @ w + b) with the batch*spatial rows tiled over a parallel grid.

    x: (rows, K) bf16, w: (K, OC) bf16, b: (1, OC) f32 -> (rows, OC) bf16.
    """
    rows, k = x.shape
    oc = w.shape[1]
    tm = _row_tile(rows)
    xp = _pad_rows(x, tm)
    out = pl.pallas_call(
        _gemm_bias_relu_kernel,
        out_shape=jax.ShapeDtypeStruct((xp.shape[0], oc), jnp.bfloat16),
        grid=(xp.shape[0] // tm,),
        in_specs=[
            pl.BlockSpec((tm, k), lambda i: (i, 0)),   # row tile of the im2col matrix
            pl.BlockSpec((k, oc), lambda i: (0, 0)),   # weight, VMEM-resident (bf16)
            pl.BlockSpec((1, oc), lambda i: (0, 0)),   # bias row (f32)
        ],
        out_specs=pl.BlockSpec((tm, oc), lambda i: (i, 0)),
        compiler_params=pltpu.CompilerParams(
            dimension_semantics=("parallel",),          # row tiles shard across TCs
            vmem_limit_bytes=32 << 20,                  # safe under v7x's 64 MiB VMEM
        ),
    )(xp, w, b)
    return out[:rows]


# ----------------------------------------------------------------------------
# Pallas kernel 2: fused fc4 (GEMM+bias+ReLU) + critic head (VPU lane reduction)
# ----------------------------------------------------------------------------
def _fc_head_kernel(x_ref, w4_ref, b4_ref, wc_ref, bc_ref, feat_ref, val_ref):
    h = jnp.dot(x_ref[...], w4_ref[...], preferred_element_type=jnp.float32)
    h = jnp.maximum(h + b4_ref[...], 0.0)
    feat_ref[...] = h.astype(feat_ref.dtype)
    # critic_linear as a broadcast-multiply + lane reduction (VPU/XLU) instead of an
    # N=1 MXU matmul that would use a single MXU column.
    v = jnp.sum(h * wc_ref[...], axis=-1, keepdims=True) + bc_ref[...]
    val_ref[...] = v.astype(val_ref.dtype)


def fc_head(x, w4, b4, wc, bc):
    """(features, value) = (relu(x @ w4 + b4), features @ wc.T + bc), row-tiled."""
    n, k = x.shape
    h = w4.shape[1]
    tm = _row_tile(n)                 # never a single tm=N mega-block: bounded VMEM
    xp = _pad_rows(x, tm)
    rows = xp.shape[0]
    feat, val = pl.pallas_call(
        _fc_head_kernel,
        out_shape=(jax.ShapeDtypeStruct((rows, h), jnp.float32),
                   jax.ShapeDtypeStruct((rows, 1), jnp.float32)),
        grid=(rows // tm,),
        in_specs=[
            pl.BlockSpec((tm, k), lambda i: (i, 0)),
            pl.BlockSpec((k, h), lambda i: (0, 0)),    # fc4 weight, pre-transposed, bf16
            pl.BlockSpec((1, h), lambda i: (0, 0)),    # fc4 bias (f32)
            pl.BlockSpec((1, h), lambda i: (0, 0)),    # critic weight row (f32)
            pl.BlockSpec((1, 1), lambda i: (0, 0)),    # critic bias (f32)
        ],
        out_specs=(pl.BlockSpec((tm, h), lambda i: (i, 0)),
                   pl.BlockSpec((tm, 1), lambda i: (i, 0))),
        compiler_params=pltpu.CompilerParams(
            dimension_semantics=("parallel",),
            vmem_limit_bytes=32 << 20,
        ),
    )(xp, w4, b4, wc, bc)
    return feat[:n], val[:n]


# ----------------------------------------------------------------------------
# im2col on the raw (bf16) tensor; transpose + /255 are folded into the weights
# ----------------------------------------------------------------------------
def _im2col_nhwc(x, k, s):
    """(N, H, W, C) -> (N*OH*OW, k*k*C); column order (dj, di, c) matches the weights."""
    n, hh, ww, c = x.shape
    oh = (hh - k) // s + 1
    ow = (ww - k) // s + 1
    taps = []
    for dj in range(k):
        for di in range(k):
            taps.append(lax.slice(
                x, (0, dj, di, 0),
                (n, dj + s * (oh - 1) + 1, di + s * (ow - 1) + 1, c),
                (1, s, s, 1)))                       # (N, OH, OW, C)
    cols = jnp.stack(taps, axis=3)                   # (N, OH, OW, k*k, C)
    return cols.reshape(n * oh * ow, k * k * c), oh, ow


def _conv_layer(x, w, b, k, s):
    n = x.shape[0]
    cols, oh, ow = _im2col_nhwc(x, k, s)             # (N*OH*OW, K) bf16
    z = gemm_bias_relu(cols, w, b)                   # (N*OH*OW, OC) bf16
    return z.reshape(n, oh, ow, w.shape[1])


# ----------------------------------------------------------------------------
# Parameters: torch-equivalent orthogonal init, repacked once into kernel layouts
# ----------------------------------------------------------------------------
def init_params(key, num_inputs, hidden_size=512):
    ortho = jax.nn.initializers.orthogonal
    k1, k2, k3, k4, k5 = jax.random.split(key, 5)
    g = math.sqrt(2.0)  # relu gain
    w1 = ortho(scale=g)(k1, (32, num_inputs * 8 * 8), jnp.float32).reshape(32, num_inputs, 8, 8)
    w2 = ortho(scale=g)(k2, (64, 32 * 4 * 4), jnp.float32).reshape(64, 32, 4, 4)
    w3 = ortho(scale=g)(k3, (64, 64 * 3 * 3), jnp.float32).reshape(64, 64, 3, 3)
    w4 = ortho(scale=g)(k4, (hidden_size, 3136), jnp.float32)   # torch Linear (out, in)
    wc = ortho(scale=1.0)(k5, (1, hidden_size), jnp.float32)

    def conv_w_to_gemm(w):
        # torch OIHW (OC, IC, KH, KW) -> (KW*KH*IC, OC) with the taps spatially
        # transposed so the GEMM consumes the *raw* input layout directly
        # (this bakes torch's `inputs.transpose(1, 3)` into the weights).
        oc, ic, kh, kw = w.shape
        return jnp.transpose(w, (3, 2, 1, 0)).reshape(kh * kw * ic, oc)

    bf16 = jnp.bfloat16
    w1g = (conv_w_to_gemm(w1) / 255.0).astype(bf16)   # fold `inputs / 255.0` into conv1
    w2g = conv_w_to_gemm(w2).astype(bf16)
    w3g = conv_w_to_gemm(w3).astype(bf16)
    # fc4: permute columns from torch's (oc, h, w) flatten to our transposed-NHWC
    # (w', h', oc) flatten order, and store pre-transposed (3136, hidden) in bf16.
    w4g = jnp.transpose(w4.reshape(hidden_size, 64, 7, 7), (0, 3, 2, 1))
    w4g = w4g.reshape(hidden_size, 3136).T.astype(bf16)

    params = dict(
        w1g=w1g, b1=jnp.zeros((1, 32), jnp.float32),
        w2g=w2g, b2=jnp.zeros((1, 64), jnp.float32),
        w3g=w3g, b3=jnp.zeros((1, 64), jnp.float32),
        w4g=w4g, b4=jnp.zeros((1, hidden_size), jnp.float32),
        wc=wc,   bc=jnp.zeros((1, 1), jnp.float32),   # critic weight kept as an f32 row
    )
    torch_params = dict(   # original layouts, only used by the pure-JAX reference checks
        w1=w1, b1=jnp.zeros((32,), jnp.float32),
        w2=w2, b2=jnp.zeros((64,), jnp.float32),
        w3=w3, b3=jnp.zeros((64,), jnp.float32),
        w4=w4, b4=jnp.zeros((hidden_size,), jnp.float32),
        wc=wc, bc=jnp.zeros((1,), jnp.float32),
    )
    return params, torch_params


# ----------------------------------------------------------------------------
# Forward pass: returns (critic_value, features, rnn_hxs) like the torch module
# ----------------------------------------------------------------------------
@jax.jit
def forward(params, inputs, rnn_hxs, masks):
    # Raw layout, cast only to bf16 (transpose(1,3) and /255 folded into the weights).
    x = inputs.astype(jnp.bfloat16)
    n = x.shape[0]
    z1 = _conv_layer(x,  params["w1g"], params["b1"], 8, 4)   # (N, 20, 20, 32) bf16
    z2 = _conv_layer(z1, params["w2g"], params["b2"], 4, 2)   # (N,  9,  9, 64) bf16
    z3 = _conv_layer(z2, params["w3g"], params["b3"], 3, 1)   # (N,  7,  7, 64) bf16
    flat = z3.reshape(n, 7 * 7 * 64)          # channel-last flatten; w4g pre-permuted
    feat, value = fc_head(flat, params["w4g"], params["b4"], params["wc"], params["bc"])
    return value, feat, rnn_hxs


# ----------------------------------------------------------------------------
# Pure-jnp references for the numerical self-test
# ----------------------------------------------------------------------------
def _forward_ref_f32(tp, inputs, rnn_hxs):
    """Exact torch math in f32 (HIGHEST precision)."""
    hp = lax.Precision.HIGHEST

    def conv_ref(x, w, b, stride):
        out = lax.conv_general_dilated(
            x, w, window_strides=(stride, stride), padding="VALID",
            dimension_numbers=("NCHW", "OIHW", "NCHW"), precision=hp)
        return jax.nn.relu(out + b[None, :, None, None])

    x = jnp.transpose(inputs, (0, 3, 2, 1)).astype(jnp.float32) / 255.0
    x = conv_ref(x, tp["w1"], tp["b1"], 4)
    x = conv_ref(x, tp["w2"], tp["b2"], 2)
    x = conv_ref(x, tp["w3"], tp["b3"], 1)
    x = x.reshape(x.shape[0], -1)
    x = jax.nn.relu(jnp.dot(x, tp["w4"].T, precision=hp) + tp["b4"])
    v = jnp.dot(x, tp["wc"].T, precision=hp) + tp["bc"]
    return v, x, rnn_hxs


def _forward_ref_bf16(tp, inputs, rnn_hxs):
    """Torch math with bf16 rounding applied at exactly the points the kernel path
    rounds (weights, input, inter-layer activations); f32 accumulation.  Remaining
    differences vs. the Pallas path are only f32 summation order (~1e-6)."""
    hp = lax.Precision.HIGHEST
    q = lambda a: a.astype(jnp.bfloat16).astype(jnp.float32)

    def conv_ref(x, w, b, stride):
        out = lax.conv_general_dilated(
            x, w, window_strides=(stride, stride), padding="VALID",
            dimension_numbers=("NCHW", "OIHW", "NCHW"), precision=hp)
        return q(jax.nn.relu(out + b[None, :, None, None]))

    x = q(jnp.transpose(inputs, (0, 3, 2, 1)).astype(jnp.float32))
    x = conv_ref(x, q(tp["w1"] / 255.0), tp["b1"], 4)   # /255 folded into bf16 weight
    x = conv_ref(x, q(tp["w2"]), tp["b2"], 2)
    x = conv_ref(x, q(tp["w3"]), tp["b3"], 1)
    x = x.reshape(x.shape[0], -1)
    h = jax.nn.relu(jnp.dot(x, q(tp["w4"]).T, precision=hp) + tp["b4"])
    v = jnp.dot(h, tp["wc"].T, precision=hp) + tp["bc"]
    return v, h, rnn_hxs


if __name__ == "__main__":
    key = jax.random.PRNGKey(0)
    pkey, xkey = jax.random.split(key)

    num_inputs, batch, hidden = 4, 2, 512
    params, torch_params = init_params(pkey, num_inputs, hidden)

    # 84x84 frames are required by the module (fc4 expects 64*7*7 = 3136 features);
    # integer pixel values like real Atari uint8 frames (exactly representable in bf16).
    inputs = jax.random.randint(xkey, (batch, 84, 84, num_inputs), 0, 256,
                                dtype=jnp.int32).astype(jnp.float32)
    rnn_hxs = jnp.zeros((batch, 1), jnp.float32)   # recurrent_hidden_state_size == 1
    masks = jnp.ones((batch, 1), jnp.float32)

    value, feat, hxs = forward(params, inputs, rnn_hxs, masks)
    jax.block_until_ready((value, feat, hxs))

    assert value.shape == (batch, 1)
    assert feat.shape == (batch, hidden)
    assert hxs.shape == (batch, 1)

    # Structural check: bf16-consistent reference (same rounding points) matches tightly.
    v_q, f_q, _ = _forward_ref_bf16(torch_params, inputs, rnn_hxs)
    assert jnp.allclose(value, v_q, atol=1e-3, rtol=1e-3)
    assert jnp.allclose(feat, f_q, atol=1e-3, rtol=1e-3)

    # Semantic check vs. pure-f32 torch math (tolerance loosened for bf16 operands).
    v_ref, f_ref, _ = _forward_ref_f32(torch_params, inputs, rnn_hxs)
    assert jnp.allclose(value, v_ref, atol=5e-2, rtol=5e-2)
    assert jnp.allclose(feat, f_ref, atol=5e-2, rtol=5e-2)

    print("KERNEL_OK")
</pallas_src>

<mosaic_0001>
module attributes {stable_mosaic.version = 11 : i64} {
  func.func @_gemm_bias_relu_kernel(%arg0: i32, %arg1: memref<256x256xbf16, #tpu.memory_space<vmem>>, %arg2: memref<256x32xbf16, #tpu.memory_space<vmem>>, %arg3: memref<1x32xf32, #tpu.memory_space<vmem>>, %arg4: memref<256x32xbf16, #tpu.memory_space<vmem>>) attributes {dimension_semantics = [#tpu.dimension_semantics<parallel>], iteration_bounds = array<i64: 4>, scalar_prefetch = 0 : i64, scratch_operands = 0 : i64, tpu.core_type = #tpu.core_type<tc>, window_params = [{transform_indices = @transform_0, window_bounds = array<i64: 256, 256>}, {pipeline_mode = #tpu.pipeline_mode<synchronous>, transform_indices = @transform_1, window_bounds = array<i64: 256, 32>}, {pipeline_mode = #tpu.pipeline_mode<synchronous>, transform_indices = @transform_2, window_bounds = array<i64: 1, 32>}, {transform_indices = @transform_3, window_bounds = array<i64: 256, 32>}]} {
    %c0 = arith.constant 0 : index
    %c0_0 = arith.constant 0 : index
    %0 = vector.load %arg1[%c0, %c0_0] : memref<256x256xbf16, #tpu.memory_space<vmem>>, vector<256x256xbf16>
    %c0_1 = arith.constant 0 : index
    %c0_2 = arith.constant 0 : index
    %1 = vector.load %arg2[%c0_1, %c0_2] : memref<256x32xbf16, #tpu.memory_space<vmem>>, vector<256x32xbf16>
    %cst = arith.constant dense<0.000000e+00> : vector<256x32xf32>
    %2 = tpu.matmul %0, %1, %cst {dimension_numbers = #tpu.dot_dimension_numbers<[1], [0], [0], [1], [0, 0, 1, 1], [], []>} : vector<256x256xbf16>, vector<256x32xbf16>, vector<256x32xf32> -> vector<256x32xf32>
    %c0_3 = arith.constant 0 : index
    %c0_4 = arith.constant 0 : index
    %3 = vector.load %arg3[%c0_3, %c0_4] : memref<1x32xf32, #tpu.memory_space<vmem>>, vector<1x32xf32>
    %4 = vector.broadcast %3 : vector<1x32xf32> to vector<256x32xf32>
    %5 = arith.addf %2, %4 : vector<256x32xf32>
    %cst_5 = arith.constant 0.000000e+00 : f32
    %6 = vector.broadcast %cst_5 : f32 to vector<256x32xf32>
    %7 = arith.maximumf %5, %6 : vector<256x32xf32>
    %8 = arith.truncf %7 : vector<256x32xf32> to vector<256x32xbf16>
    %c0_6 = arith.constant 0 : index
    %c0_7 = arith.constant 0 : index
    %9 = vector.load %arg4[%c0_6, %c0_7] : memref<256x32xbf16, #tpu.memory_space<vmem>>, vector<256x32xbf16>
    tpu.vector_store %arg4[%c0_6, %c0_7], %8 {strides = array<i32>} : memref<256x32xbf16, #tpu.memory_space<vmem>>, vector<256x32xbf16>,
    return
  }
  func.func @transform_0(%arg0: i32) -> (i32, i32) {
    %c0_i32 = arith.constant 0 : i32
    %c0_i32_0 = arith.constant 0 : i32
    return %arg0, %c0_i32 : i32, i32
  }
  func.func @transform_1(%arg0: i32) -> (i32, i32) {
    %c0_i32 = arith.constant 0 : i32
    %c0_i32_0 = arith.constant 0 : i32
    %c0_i32_1 = arith.constant 0 : i32
    return %c0_i32, %c0_i32_0 : i32, i32
  }
  func.func @transform_2(%arg0: i32) -> (i32, i32) {
    %c0_i32 = arith.constant 0 : i32
    %c0_i32_0 = arith.constant 0 : i32
    %c0_i32_1 = arith.constant 0 : i32
    return %c0_i32, %c0_i32_0 : i32, i32
  }
  func.func @transform_3(%arg0: i32) -> (i32, i32) {
    %c0_i32 = arith.constant 0 : i32
    %c0_i32_0 = arith.constant 0 : i32
    return %arg0, %c0_i32 : i32, i32
  }
}

module attributes {stable_mosaic.version = 11 : i64} {
  func.func @_gemm_bias_relu_kernel(%arg0: i32, %arg1: memref<128x512xbf16, #tpu.memory_space<vmem>>, %arg2: memref<512x64xbf16, #tpu.memory_space<vmem>>, %arg3: memref<1x64xf32, #tpu.memory_space<vmem>>, %arg4: memref<128x64xbf16, #tpu.memory_space<vmem>>) attributes {dimension_semantics = [#tpu.dimension_semantics<parallel>], iteration_bounds = array<i64: 2>, scalar_prefetch = 0 : i64, scratch_operands = 0 : i64, tpu.core_type = #tpu.core_type<tc>, window_params = [{transform_indices = @transform_0, window_bounds = array<i64: 128, 512>}, {pipeline_mode = #tpu.pipeline_mode<synchronous>, transform_indices = @transform_1, window_bounds = array<i64: 512, 64>}, {pipeline_mode = #tpu.pipeline_mode<synchronous>, transform_indices = @transform_2, window_bounds = array<i64: 1, 64>}, {transform_indices = @transform_3, window_bounds = array<i64: 128, 64>}]} {
    %c0 = arith.constant 0 : index
    %c0_0 = arith.constant 0 : index
    %0 = vector.load %arg1[%c0, %c0_0] : memref<128x512xbf16, #tpu.memory_space<vmem>>, vector<128x512xbf16>
    %c0_1 = arith.constant 0 : index
    %c0_2 = arith.constant 0 : index
    %1 = vector.load %arg2[%c0_1, %c0_2] : memref<512x64xbf16, #tpu.memory_space<vmem>>, vector<512x64xbf16>
    %cst = arith.constant dense<0.000000e+00> : vector<128x64xf32>
    %2 = tpu.matmul %0, %1, %cst {dimension_numbers = #tpu.dot_dimension_numbers<[1], [0], [0], [1], [0, 0, 1, 1], [], []>} : vector<128x512xbf16>, vector<512x64xbf16>, vector<128x64xf32> -> vector<128x64xf32>
    %c0_3 = arith.constant 0 : index
    %c0_4 = arith.constant 0 : index
    %3 = vector.load %arg3[%c0_3, %c0_4] : memref<1x64xf32, #tpu.memory_space<vmem>>, vector<1x64xf32>
    %4 = vector.broadcast %3 : vector<1x64xf32> to vector<128x64xf32>
    %5 = arith.addf %2, %4 : vector<128x64xf32>
    %cst_5 = arith.constant 0.000000e+00 : f32
    %6 = vector.broadcast %cst_5 : f32 to vector<128x64xf32>
    %7 = arith.maximumf %5, %6 : vector<128x64xf32>
    %8 = arith.truncf %7 : vector<128x64xf32> to vector<128x64xbf16>
    %c0_6 = arith.constant 0 : index
    %c0_7 = arith.constant 0 : index
    %9 = vector.load %arg4[%c0_6, %c0_7] : memref<128x64xbf16, #tpu.memory_space<vmem>>, vector<128x64xbf16>
    tpu.vector_store %arg4[%c0_6, %c0_7], %8 {strides = array<i32>} : memref<128x64xbf16, #tpu.memory_space<vmem>>, vector<128x64xbf16>,
    return
  }
  func.func @transform_0(%arg0: i32) -> (i32, i32) {
    %c0_i32 = arith.constant 0 : i32
    %c0_i32_0 = arith.constant 0 : i32
    return %arg0, %c0_i32 : i32, i32
  }
  func.func @transform_1(%arg0: i32) -> (i32, i32) {
    %c0_i32 = arith.constant 0 : i32
    %c0_i32_0 = arith.constant 0 : i32
    %c0_i32_1 = arith.constant 0 : i32
    return %c0_i32, %c0_i32_0 : i32, i32
  }
  func.func @transform_2(%arg0: i32) -> (i32, i32) {
    %c0_i32 = arith.constant 0 : i32
    %c0_i32_0 = arith.constant 0 : i32
    %c0_i32_1 = arith.constant 0 : i32
    return %c0_i32, %c0_i32_0 : i32, i32
  }
  func.func @transform_3(%arg0: i32) -> (i32, i32) {
    %c0_i32 = arith.constant 0 : i32
    %c0_i32_0 = arith.constant 0 : i32
    return %arg0, %c0_i32 : i32, i32
  }
}

module attributes {stable_mosaic.version = 11 : i64} {
  func.func @_gemm_bias_relu_kernel(%arg0: i32, %arg1: memref<112x576xbf16, #tpu.memory_space<vmem>>, %arg2: memref<576x64xbf16, #tpu.memory_space<vmem>>, %arg3: memref<1x64xf32, #tpu.memory_space<vmem>>, %arg4: memref<112x64xbf16, #tpu.memory_space<vmem>>) attributes {dimension_semantics = [#tpu.dimension_semantics<parallel>], iteration_bounds = array<i64: 1>, scalar_prefetch = 0 : i64, scratch_operands = 0 : i64, tpu.core_type = #tpu.core_type<tc>, window_params = [{transform_indices = @transform_0, window_bounds = array<i64: 112, 576>}, {pipeline_mode = #tpu.pipeline_mode<synchronous>, transform_indices = @transform_1, window_bounds = array<i64: 576, 64>}, {pipeline_mode = #tpu.pipeline_mode<synchronous>, transform_indices = @transform_2, window_bounds = array<i64: 1, 64>}, {transform_indices = @transform_3, window_bounds = array<i64: 112, 64>}]} {
    %c0 = arith.constant 0 : index
    %c0_0 = arith.constant 0 : index
    %0 = vector.load %arg1[%c0, %c0_0] : memref<112x576xbf16, #tpu.memory_space<vmem>>, vector<112x576xbf16>
    %c0_1 = arith.constant 0 : index
    %c0_2 = arith.constant 0 : index
    %1 = vector.load %arg2[%c0_1, %c0_2] : memref<576x64xbf16, #tpu.memory_space<vmem>>, vector<576x64xbf16>
    %cst = arith.constant dense<0.000000e+00> : vector<112x64xf32>
    %2 = tpu.matmul %0, %1, %cst {dimension_numbers = #tpu.dot_dimension_numbers<[1], [0], [0], [1], [0, 0, 1, 1], [], []>} : vector<112x576xbf16>, vector<576x64xbf16>, vector<112x64xf32> -> vector<112x64xf32>
    %c0_3 = arith.constant 0 : index
    %c0_4 = arith.constant 0 : index
    %3 = vector.load %arg3[%c0_3, %c0_4] : memref<1x64xf32, #tpu.memory_space<vmem>>, vector<1x64xf32>
    %4 = vector.broadcast %3 : vector<1x64xf32> to vector<112x64xf32>
    %5 = arith.addf %2, %4 : vector<112x64xf32>
    %cst_5 = arith.constant 0.000000e+00 : f32
    %6 = vector.broadcast %cst_5 : f32 to vector<112x64xf32>
    %7 = arith.maximumf %5, %6 : vector<112x64xf32>
    %8 = arith.truncf %7 : vector<112x64xf32> to vector<112x64xbf16>
    %c0_6 = arith.constant 0 : index
    %c0_7 = arith.constant 0 : index
    %9 = vector.load %arg4[%c0_6, %c0_7] : memref<112x64xbf16, #tpu.memory_space<vmem>>, vector<112x64xbf16>
    tpu.vector_store %arg4[%c0_6, %c0_7], %8 {strides = array<i32>} : memref<112x64xbf16, #tpu.memory_space<vmem>>, vector<112x64xbf16>,
    return
  }
  func.func @transform_0(%arg0: i32) -> (i32, i32) {
    %c0_i32 = arith.constant 0 : i32
    %c0_i32_0 = arith.constant 0 : i32
    return %arg0, %c0_i32 : i32, i32
  }
  func.func @transform_1(%arg0: i32) -> (i32, i32) {
    %c0_i32 = arith.constant 0 : i32
    %c0_i32_0 = arith.constant 0 : i32
    %c0_i32_1 = arith.constant 0 : i32
    return %c0_i32, %c0_i32_0 : i32, i32
  }
  func.func @transform_2(%arg0: i32) -> (i32, i32) {
    %c0_i32 = arith.constant 0 : i32
    %c0_i32_0 = arith.constant 0 : i32
    %c0_i32_1 = arith.constant 0 : i32
    return %c0_i32, %c0_i32_0 : i32, i32
  }
  func.func @transform_3(%arg0: i32) -> (i32, i32) {
    %c0_i32 = arith.constant 0 : i32
    %c0_i32_0 = arith.constant 0 : i32
    return %arg0, %c0_i32 : i32, i32
  }
}

module attributes {stable_mosaic.version = 11 : i64} {
  func.func @_fc_head_kernel(%arg0: i32, %arg1: memref<16x3136xbf16, #tpu.memory_space<vmem>>, %arg2: memref<3136x512xbf16, #tpu.memory_space<vmem>>, %arg3: memref<1x512xf32, #tpu.memory_space<vmem>>, %arg4: memref<1x512xf32, #tpu.memory_space<vmem>>, %arg5: memref<1x1xf32, #tpu.memory_space<vmem>>, %arg6: memref<16x512xf32, #tpu.memory_space<vmem>>, %arg7: memref<16x1xf32, #tpu.memory_space<vmem>>) attributes {dimension_semantics = [#tpu.dimension_semantics<parallel>], iteration_bounds = array<i64: 1>, scalar_prefetch = 0 : i64, scratch_operands = 0 : i64, tpu.core_type = #tpu.core_type<tc>, window_params = [{transform_indices = @transform_0, window_bounds = array<i64: 16, 3136>}, {pipeline_mode = #tpu.pipeline_mode<synchronous>, transform_indices = @transform_1, window_bounds = array<i64: 3136, 512>}, {pipeline_mode = #tpu.pipeline_mode<synchronous>, transform_indices = @transform_2, window_bounds = array<i64: 1, 512>}, {pipeline_mode = #tpu.pipeline_mode<synchronous>, transform_indices = @transform_3, window_bounds = array<i64: 1, 512>}, {pipeline_mode = #tpu.pipeline_mode<synchronous>, transform_indices = @transform_4, window_bounds = array<i64: 1, 1>}, {transform_indices = @transform_5, window_bounds = array<i64: 16, 512>}, {transform_indices = @transform_6, window_bounds = array<i64: 16, 1>}]} {
    %c0 = arith.constant 0 : index
    %c0_0 = arith.constant 0 : index
    %0 = vector.load %arg1[%c0, %c0_0] : memref<16x3136xbf16, #tpu.memory_space<vmem>>, vector<16x3136xbf16>
    %c0_1 = arith.constant 0 : index
    %c0_2 = arith.constant 0 : index
    %1 = vector.load %arg2[%c0_1, %c0_2] : memref<3136x512xbf16, #tpu.memory_space<vmem>>, vector<3136x512xbf16>
    %cst = arith.constant dense<0.000000e+00> : vector<16x512xf32>
    %2 = tpu.matmul %0, %1, %cst {dimension_numbers = #tpu.dot_dimension_numbers<[1], [0], [0], [1], [0, 0, 1, 1], [], []>} : vector<16x3136xbf16>, vector<3136x512xbf16>, vector<16x512xf32> -> vector<16x512xf32>
    %c0_3 = arith.constant 0 : index
    %c0_4 = arith.constant 0 : index
    %3 = vector.load %arg3[%c0_3, %c0_4] : memref<1x512xf32, #tpu.memory_space<vmem>>, vector<1x512xf32>
    %4 = vector.broadcast %3 : vector<1x512xf32> to vector<16x512xf32>
    %5 = arith.addf %2, %4 : vector<16x512xf32>
    %cst_5 = arith.constant 0.000000e+00 : f32
    %6 = vector.broadcast %cst_5 : f32 to vector<16x512xf32>
    %7 = arith.maximumf %5, %6 : vector<16x512xf32>
    %c0_6 = arith.constant 0 : index
    %c0_7 = arith.constant 0 : index
    %8 = vector.load %arg6[%c0_6, %c0_7] : memref<16x512xf32, #tpu.memory_space<vmem>>, vector<16x512xf32>
    tpu.vector_store %arg6[%c0_6, %c0_7], %7 {strides = array<i32>} : memref<16x512xf32, #tpu.memory_space<vmem>>, vector<16x512xf32>,
    %c0_8 = arith.constant 0 : index
    %c0_9 = arith.constant 0 : index
    %9 = vector.load %arg4[%c0_8, %c0_9] : memref<1x512xf32, #tpu.memory_space<vmem>>, vector<1x512xf32>
    %10 = vector.broadcast %9 : vector<1x512xf32> to vector<16x512xf32>
    %11 = arith.mulf %7, %10 : vector<16x512xf32>
    %cst_10 = arith.constant dense<0.000000e+00> : vector<16xf32>
    %12 = vector.multi_reduction <add>, %11, %cst_10 [1] : vector<16x512xf32> to vector<16xf32>
    %13 = vector.shape_cast %12 : vector<16xf32> to vector<16x1xf32>
    %c0_11 = arith.constant 0 : index
    %c0_12 = arith.constant 0 : index
    %14 = vector.load %arg5[%c0_11, %c0_12] : memref<1x1xf32, #tpu.memory_space<vmem>>, vector<1x1xf32>
    %15 = vector.broadcast %14 : vector<1x1xf32> to vector<16x1xf32>
    %16 = arith.addf %13, %15 : vector<16x1xf32>
    %c0_13 = arith.constant 0 : index
    %c0_14 = arith.constant 0 : index
    %17 = vector.load %arg7[%c0_13, %c0_14] : memref<16x1xf32, #tpu.memory_space<vmem>>, vector<16x1xf32>
    tpu.vector_store %arg7[%c0_13, %c0_14], %16 {strides = array<i32>} : memref<16x1xf32, #tpu.memory_space<vmem>>, vector<16x1xf32>,
    return
  }
  func.func @transform_0(%arg0: i32) -> (i32, i32) {
    %c0_i32 = arith.constant 0 : i32
    %c0_i32_0 = arith.constant 0 : i32
    return %arg0, %c0_i32 : i32, i32
  }
  func.func @transform_1(%arg0: i32) -> (i32, i32) {
    %c0_i32 = arith.constant 0 : i32
    %c0_i32_0 = arith.constant 0 : i32
    %c0_i32_1 = arith.constant 0 : i32
    return %c0_i32, %c0_i32_0 : i32, i32
  }
  func.func @transform_2(%arg0: i32) -> (i32, i32) {
    %c0_i32 = arith.constant 0 : i32
    %c0_i32_0 = arith.constant 0 : i32
    %c0_i32_1 = arith.constant 0 : i32
    return %c0_i32, %c0_i32_0 : i32, i32
  }
  func.func @transform_3(%arg0: i32) -> (i32, i32) {
    %c0_i32 = arith.constant 0 : i32
    %c0_i32_0 = arith.constant 0 : i32
    %c0_i32_1 = arith.constant 0 : i32
    return %c0_i32, %c0_i32_0 : i32, i32
  }
  func.func @transform_4(%arg0: i32) -> (i32, i32) {
    %c0_i32 = arith.constant 0 : i32
    %c0_i32_0 = arith.constant 0 : i32
    %c0_i32_1 = arith.constant 0 : i32
    return %c0_i32, %c0_i32_0 : i32, i32
  }
  func.func @transform_5(%arg0: i32) -> (i32, i32) {
    %c0_i32 = arith.constant 0 : i32
    %c0_i32_0 = arith.constant 0 : i32
    return %arg0, %c0_i32 : i32, i32
  }
  func.func @transform_6(%arg0: i32) -> (i32, i32) {
    %c0_i32 = arith.constant 0 : i32
    %c0_i32_0 = arith.constant 0 : i32
    return %arg0, %c0_i32 : i32, i32
  }
}

</mosaic_0001>

<bundles_post_ra>
// kernel: forward.4
= control target key start
LH: loop header
LB: loop body
LE: loop exit
PB: predicated region body
PF: predicated region fallthrough
CT: control target
= control target key end

     0   :  { %s1269_s12 = smov 0   ;;  %s1475_s0 = inlined_call_operand.vmem [shape: bf16[1024,256], index: 0, kind: input, shape index: {}]   ;;  %s1476_s1 = inlined_call_operand.vmem [shape: bf16[256,32], index: 1, kind: input, shape index: {}]   ;;  %s1477_s2 = inlined_call_operand.vmem [shape: f32[1,32], index: 2, kind: input, shape index: {}]   ;;  %s1478_s3 = inlined_call_operand.vmem [shape: bf16[1024,32], index: 3, kind: output, shape index: {}]  }
   0x1 LB: > { %s915_s13 = sadd.s32 4294967295, %s1247_s12   ;;  %p919_p0 = scmp.ge.s32.totalorder %s1247_s12, 1  ;;  %s1247_s12 = sphi %s1269_s12, %s13_s12  }
   0x2   : > { %p139_p1 = scmp.lt.s32.totalorder %s1247_s12, 5 }
   0x4   : > { %p140_p2 = pnand %p919_p0, %p139_p1 }
   0x5   : > { %v1177_v0 = vld [vmem:[%s1476_s1 + $0x40] sm:$0xff] (!%p140_p2)   ;;  %s920_s16 = sshll.u32 (!%p140_p2), %s915_s13, 5  ;;  %v1179_v2 = vld [vmem:[%s1476_s1 + $0x48] sm:$0xff] (!%p140_p2)   ;;  %v1181_v4 = vld [vmem:[%s1476_s1 + $0x50] sm:$0xff] (!%p140_p2)   ;;  %vm826_vm0 = vcmask (!%p140_p2), 257024  }
   0x6   : > { %143 = sbr.rel (%p140_p2) target bundleno = 318 (0x13e), region = 32  ;;  %v1178_v1 = vld [vmem:[%s1476_s1] sm:$0xff] (!%p140_p2)   ;;  %1041 = vmatprep.subr.bf16.mxu0 (!%p140_p2), %v1177_v0  ;;  %1153 = vmatprep.subr.bf16.mxu1 (!%p140_p2), %v1177_v0  ;;  %v1180_v3 = vld [vmem:[%s1476_s1 + $0x8] sm:$0xff] (!%p140_p2)   ;;  %p165_p3 = scmp.lt.s32.totalorder (!%p140_p2), %s920_s16, 127  ;;  %v1182_v5 = vld [vmem:[%s1476_s1 + $0x10] sm:$0xff] (!%p140_p2)  }
   0x7   : > { %1042 = vmatpush3.bf16.msra.mxu0 (!%p140_p2), %v1178_v1  ;;  %1161 = vmatpush3.bf16.msra.mxu1 (!%p140_p2), %v1178_v1  ;;  %v1183_v6 = vld [vmem:[%s1476_s1 + $0x58] sm:$0xff] (!%p140_p2)   ;;  %v1185_v8 = vld [vmem:[%s1476_s1 + $0x60] sm:$0xff] (!%p140_p2)   ;;  %v1187_v10 = vld [vmem:[%s1476_s1 + $0x68] sm:$0xff] (!%p140_p2)  }
   0x8   : > { %1043 = vmatprep.subr.bf16.mxu0 (!%p140_p2), %v1179_v2  ;;  %1154 = vmatprep.subr.bf16.mxu1 (!%p140_p2), %v1179_v2  ;;  %v1184_v7 = vld [vmem:[%s1476_s1 + $0x18] sm:$0xff] (!%p140_p2)   ;;  %v1186_v9 = vld [vmem:[%s1476_s1 + $0x20] sm:$0xff] (!%p140_p2)   ;;  %v1188_v13 = vld [vmem:[%s1476_s1 + $0x28] sm:$0xff] (!%p140_p2)  }
   0x9   : > { %v1189_v14 = vld [vmem:[%s1476_s1 + $0x70] sm:$0xff] (!%p140_p2)   ;;  %v1191_v16 = vld [vmem:[%s1476_s1 + $0x78] sm:$0xff] (!%p140_p2)   ;;  %v1368_v50 = vld [vmem:[%s1477_s2] ss:$0 sm:$0xff] (!%p140_p2) }
   0xa   : > { %v1190_v15 = vld [vmem:[%s1476_s1 + $0x30] sm:$0xff] (!%p140_p2)   ;;  %v1192_v17 = vld [vmem:[%s1476_s1 + $0x38] sm:$0xff] (!%p140_p2)  }
   0xb   : > { %1044 = vmatpush3.bf16.msra.mxu0 (!%p140_p2), %v1180_v3  ;;  %1162 = vmatpush3.bf16.msra.mxu1 (!%p140_p2), %v1180_v3 }
   0xc   : > { %1045 = vmatprep.subr.bf16.mxu0 (!%p140_p2), %v1181_v4  ;;  %1155 = vmatprep.subr.bf16.mxu1 (!%p140_p2), %v1181_v4 }
   0xd   : > { %s1480_s16 = smov (!%p165_p3, %s920_s16), 127 }
   0xe   : > { %s1008_s4 = sshll.u32 %s1480_s16, 3  ;;  %s924_s28 = sshll.u32 %s1480_s16, 2 }
   0xf   : > { %1046 = vmatpush3.bf16.msra.mxu0 %v1182_v5  ;;  %1163 = vmatpush3.bf16.msra.mxu1 %v1182_v5  ;;  %s1310_s9 = scalar_lea.vmem %s1475_s0, %s1008_s4  ;;  %s1378_s4 = scalar_lea.vmem %s1478_s3, %s924_s28 }
  0x10   : > { %1047 = vmatprep.subr.bf16.mxu0 %v1183_v6  ;;  %1156 = vmatprep.subr.bf16.mxu1 %v1183_v6  ;;  %v1195_v11 = vld [vmem:[%s1310_s9 + $0x4] ss:$8 sps:$4 sm:$0xff]   ;;  %v1193_v18 = vld [vmem:[%s1310_s9] ss:$8 sps:$4 sm:$0xff]   ;;  %v1199_v20 = vld [vmem:[%s1310_s9 + $0x14] ss:$8 sps:$4 sm:$0xff]  }
  0x11   : > { %v1198_v12 = vld [vmem:[%s1310_s9 + $0x84] ss:$8 sps:$4 sm:$0xff]   ;;  %537 = vmatprep.mubr.bf16.mxu0 %v1195_v11  ;;  %v1196_v19 = vld [vmem:[%s1310_s9 + $0x80] ss:$8 sps:$4 sm:$0xff]   ;;  %v1201_v21 = vld [vmem:[%s1310_s9 + $0x94] ss:$8 sps:$4 sm:$0xff]  }
  0x12   : > { %601 = vmatprep.mubr.bf16.mxu1 %v1198_v12  ;;  %v1203_v22 = vld [vmem:[%s1310_s9 + $0x10] ss:$8 sps:$4 sm:$0xff]   ;;  %v1205_v24 = vld [vmem:[%s1310_s9 + $0x24] ss:$8 sps:$4 sm:$0xff]   ;;  %v1209_v26 = vld [vmem:[%s1310_s9 + $0x20] ss:$8 sps:$4 sm:$0xff]  }
  0x13   : > { %1048 = vmatpush3.bf16.msra.mxu0 %v1184_v7  ;;  %1164 = vmatpush3.bf16.msra.mxu1 %v1184_v7  ;;  %v1204_v23 = vld [vmem:[%s1310_s9 + $0x90] ss:$8 sps:$4 sm:$0xff]   ;;  %v1207_v25 = vld [vmem:[%s1310_s9 + $0xa4] ss:$8 sps:$4 sm:$0xff]   ;;  %v1210_v27 = vld [vmem:[%s1310_s9 + $0xa0] ss:$8 sps:$4 sm:$0xff]  }
  0x14   : > { %1049 = vmatprep.subr.bf16.mxu0 %v1185_v8  ;;  %1157 = vmatprep.subr.bf16.mxu1 %v1185_v8  ;;  %v1211_v28 = vld [vmem:[%s1310_s9 + $0x34] ss:$8 sps:$4 sm:$0xff]   ;;  %v1215_v30 = vld [vmem:[%s1310_s9 + $0x30] ss:$8 sps:$4 sm:$0xff]   ;;  %v1217_v32 = vld [vmem:[%s1310_s9 + $0x44] ss:$8 sps:$4 sm:$0xff]  }
  0x15   : > { %v1213_v29 = vld [vmem:[%s1310_s9 + $0xb4] ss:$8 sps:$4 sm:$0xff]   ;;  %v1216_v31 = vld [vmem:[%s1310_s9 + $0xb0] ss:$8 sps:$4 sm:$0xff]   ;;  %v1219_v33 = vld [vmem:[%s1310_s9 + $0xc4] ss:$8 sps:$4 sm:$0xff]  }
  0x16   : > { %v1221_v34 = vld [vmem:[%s1310_s9 + $0x40] ss:$8 sps:$4 sm:$0xff]   ;;  %v1223_v36 = vld [vmem:[%s1310_s9 + $0x54] ss:$8 sps:$4 sm:$0xff]   ;;  %v1227_v38 = vld [vmem:[%s1310_s9 + $0x50] ss:$8 sps:$4 sm:$0xff]  }
  0x17   : > { %1050 = vmatpush3.bf16.msra.mxu0 %v1186_v9  ;;  %1165 = vmatpush3.bf16.msra.mxu1 %v1186_v9  ;;  %v1222_v35 = vld [vmem:[%s1310_s9 + $0xc0] ss:$8 sps:$4 sm:$0xff]   ;;  %v1225_v37 = vld [vmem:[%s1310_s9 + $0xd4] ss:$8 sps:$4 sm:$0xff]   ;;  %v1228_v39 = vld [vmem:[%s1310_s9 + $0xd0] ss:$8 sps:$4 sm:$0xff]  }
  0x18   : > { %1051 = vmatprep.subr.bf16.mxu0 %v1187_v10  ;;  %1158 = vmatprep.subr.bf16.mxu1 %v1187_v10  ;;  %v1229_v40 = vld [vmem:[%s1310_s9 + $0x64] ss:$8 sps:$4 sm:$0xff]   ;;  %v1233_v42 = vld [vmem:[%s1310_s9 + $0x60] ss:$8 sps:$4 sm:$0xff]   ;;  %v1235_v44 = vld [vmem:[%s1310_s9 + $0x74] ss:$8 sps:$4 sm:$0xff]  }
  0x19   : > { %v1231_v41 = vld [vmem:[%s1310_s9 + $0xe4] ss:$8 sps:$4 sm:$0xff]   ;;  %v1234_v43 = vld [vmem:[%s1310_s9 + $0xe0] ss:$8 sps:$4 sm:$0xff]   ;;  %v1237_v45 = vld [vmem:[%s1310_s9 + $0xf4] ss:$8 sps:$4 sm:$0xff]  }
  0x1a   : > { %v1239_v46 = vld [vmem:[%s1310_s9 + $0x70] ss:$8 sps:$4 sm:$0xff]  }
  0x1b   : > { %1052 = vmatpush3.bf16.msra.mxu0 %v1188_v13  ;;  %1166 = vmatpush3.bf16.msra.mxu1 %v1188_v13  ;;  %v1240_v47 = vld [vmem:[%s1310_s9 + $0xf0] ss:$8 sps:$4 sm:$0xff]  }
  0x1c   : > { %1053 = vmatprep.subr.bf16.mxu0 %v1189_v14  ;;  %1159 = vmatprep.subr.bf16.mxu1 %v1189_v14 }
  0x1f   : > { %1054 = vmatpush3.bf16.msra.mxu0 %v1190_v15  ;;  %1167 = vmatpush3.bf16.msra.mxu1 %v1190_v15 }
  0x20   : > { %1055 = vmatprep.subr.bf16.mxu0 %v1191_v16  ;;  %1160 = vmatprep.subr.bf16.mxu1 %v1191_v16 }
  0x23   : > { %1056 = vmatpush3.bf16.msra.mxu0 %v1192_v17  ;;  %1168 = vmatpush3.bf16.msra.mxu1 %v1192_v17 }
  0x26   : > { %538 = vmatmul.mubr.bf16.vlgmr.msra.gmra.mrb[0].mxu0 %v1193_v18  ;;  %602 = vmatmul.mubr.bf16.vlgmr.msra.gmra.mrb[0].mxu1 %v1196_v19 }
  0x27   : > { %545 = vmatprep.mubr.bf16.mxu0 %v1199_v20  ;;  %609 = vmatprep.mubr.bf16.mxu1 %v1201_v21 }
  0x2e   : > { %546 = vmatmul.mubr.bf16.gmra.mrb[4].mxu0 %v1203_v22  ;;  %610 = vmatmul.mubr.bf16.gmra.mrb[4].mxu1 %v1204_v23 }
  0x2f   : > { %553 = vmatprep.mubr.bf16.mxu0 %v1205_v24  ;;  %617 = vmatprep.mubr.bf16.mxu1 %v1207_v25 }
  0x36   : > { %554 = vmatmul.mubr.bf16.gmra.mrb[8].mxu0 %v1209_v26  ;;  %618 = vmatmul.mubr.bf16.gmra.mrb[8].mxu1 %v1210_v27 }
  0x37   : > { %561 = vmatprep.mubr.bf16.mxu0 %v1211_v28  ;;  %625 = vmatprep.mubr.bf16.mxu1 %v1213_v29 }
  0x3e   : > { %562 = vmatmul.mubr.bf16.gmra.mrb[12].mxu0 %v1215_v30  ;;  %626 = vmatmul.mubr.bf16.gmra.mrb[12].mxu1 %v1216_v31 }
  0x3f   : > { %569 = vmatprep.mubr.bf16.mxu0 %v1217_v32  ;;  %633 = vmatprep.mubr.bf16.mxu1 %v1219_v33 }
  0x46   : > { %570 = vmatmul.mubr.bf16.gmra.mrb[16].mxu0 %v1221_v34  ;;  %634 = vmatmul.mubr.bf16.gmra.mrb[16].mxu1 %v1222_v35 }
  0x47   : > { %577 = vmatprep.mubr.bf16.mxu0 %v1223_v36  ;;  %641 = vmatprep.mubr.bf16.mxu1 %v1225_v37 }
  0x4e   : > { %578 = vmatmul.mubr.bf16.gmra.mrb[20].mxu0 %v1227_v38  ;;  %642 = vmatmul.mubr.bf16.gmra.mrb[20].mxu1 %v1228_v39 }
  0x4f   : > { %585 = vmatprep.mubr.bf16.mxu0 %v1229_v40  ;;  %649 = vmatprep.mubr.bf16.mxu1 %v1231_v41 }
  0x56   : > { %586 = vmatmul.mubr.bf16.gmra.mrb[24].mxu0 %v1233_v42  ;;  %650 = vmatmul.mubr.bf16.gmra.mrb[24].mxu1 %v1234_v43 }
  0x57   : > { %593 = vmatprep.mubr.bf16.mxu0 %v1235_v44  ;;  %657 = vmatprep.mubr.bf16.mxu1 %v1237_v45 }
  0x5e   : > { %594 = vmatmul.mubr.bf16.gmra.mrb[28].mxu0 %v1239_v46  ;;  %658 = vmatmul.mubr.bf16.gmra.mrb[28].mxu1 %v1240_v47 }
  0xf9   : > { %v1057_v48 = vpop.f32.mrb[0].mxu0  ;;  %v1105_v49 = vpop.f32.mrb[0].mxu1 }
  0xfa   : > { %v1058_v51 = vpop.f32.mrb[1].mxu0  ;;  %v1106_v52 = vpop.f32.mrb[1].mxu1 }
  0xfb   : > { %v1059_v53 = vadd.f32 %v1058_v51, %v1057_v48  ;;  %v1107_v54 = vadd.f32 %v1106_v52, %v1105_v49  ;;  %v1060_v55 = vpop.f32.mrb[2].mxu0  ;;  %v1108_v56 = vpop.f32.mrb[2].mxu1 }
  0xfc   : > { %v1061_v57 = vpop.f32.mrb[3].mxu0  ;;  %v1109_v58 = vpop.f32.mrb[3].mxu1 }
  0xfd   : > { %v540_v59 = vadd.f32 %v1059_v53, %v1368_v50  ;;  %v604_v60 = vadd.f32 %v1107_v54, %v1368_v50  ;;  %v1062_v61 = vadd.f32 %v1061_v57, %v1060_v55  ;;  %v1110_v62 = vadd.f32 %v1109_v58, %v1108_v56 }
  0xff   : > { %v666_v63 = vmax.f32 %v540_v59, 0.0  ;;  %v682_v0 = vmax.f32 %v604_v60, 0.0  ;;  %v543_v1 = vadd.f32 %v1062_v61, %v1368_v50  ;;  %v607_v2 = vadd.f32 %v1110_v62, %v1368_v50 }
 0x101   : > { %v1009_v3 = vpack.c.bf16 %v666_v63, %v666_v63  ;;  %v1025_v4 = vpack.c.bf16 %v682_v0, %v682_v0  ;;  %v667_v5 = vmax.f32 %v543_v1, 0.0  ;;  %v683_v6 = vmax.f32 %v607_v2, 0.0  ;;  %v1063_v7 = vpop.f32.mrb[4].mxu0  ;;  %v1111_v8 = vpop.f32.mrb[4].mxu1 }
 0x102   : > { %v1064_v9 = vpop.f32.mrb[5].mxu0  ;;  %v1112_v10 = vpop.f32.mrb[5].mxu1 }
 0x103   : > { %827 = vst.msk [vmem:[%s1378_s4] sm:$0xf] %vm826_vm0, %v1009_v3  ;;  %843 = vst.msk [vmem:[%s1378_s4 + $0x40] sm:$0xf] %vm826_vm0, %v1025_v4  ;;  %v1010_v11 = vpack.c.bf16 %v667_v5, %v667_v5  ;;  %v1026_v12 = vpack.c.bf16 %v683_v6, %v683_v6  ;;  %v1065_v13 = vadd.f32 %v1064_v9, %v1063_v7  ;;  %v1066_v15 = vpop.f32.mrb[6].mxu0  ;;  %v1114_v16 = vpop.f32.mrb[6].mxu1 }
 0x104   : > { %v1113_v14 = vadd.f32 %v1112_v10, %v1111_v8  ;;  %v1067_v17 = vpop.f32.mrb[7].mxu0  ;;  %v1115_v18 = vpop.f32.mrb[7].mxu1 }
 0x105   : > { %828 = vst.msk [vmem:[%s1378_s4 + $0x4] sm:$0xf] %vm826_vm0, %v1010_v11  ;;  %844 = vst.msk [vmem:[%s1378_s4 + $0x44] sm:$0xf] %vm826_vm0, %v1026_v12  ;;  %v548_v19 = vadd.f32 %v1065_v13, %v1368_v50  ;;  %v1068_v21 = vadd.f32 %v1067_v17, %v1066_v15  ;;  %v1116_v22 = vadd.f32 %v1115_v18, %v1114_v16 }
 0x106   : > { %v612_v20 = vadd.f32 %v1113_v14, %v1368_v50 }
 0x107   : > { %v668_v23 = vmax.f32 %v548_v19, 0.0  ;;  %v551_v25 = vadd.f32 %v1068_v21, %v1368_v50  ;;  %v615_v26 = vadd.f32 %v1116_v22, %v1368_v50 }
 0x108   : > { %v684_v24 = vmax.f32 %v612_v20, 0.0 }
 0x109   : > { %v1011_v27 = vpack.c.bf16 %v668_v23, %v668_v23  ;;  %v669_v29 = vmax.f32 %v551_v25, 0.0  ;;  %v685_v30 = vmax.f32 %v615_v26, 0.0  ;;  %v1069_v31 = vpop.f32.mrb[8].mxu0  ;;  %v1117_v32 = vpop.f32.mrb[8].mxu1 }
 0x10a   : > { %v1027_v28 = vpack.c.bf16 %v684_v24, %v684_v24  ;;  %v1070_v33 = vpop.f32.mrb[9].mxu0  ;;  %v1118_v34 = vpop.f32.mrb[9].mxu1 }
 0x10b   : > { %829 = vst.msk [vmem:[%s1378_s4 + $0x8] sm:$0xf] %vm826_vm0, %v1011_v27  ;;  %v1012_v35 = vpack.c.bf16 %v669_v29, %v669_v29  ;;  %v1028_v36 = vpack.c.bf16 %v685_v30, %v685_v30  ;;  %v1071_v37 = vadd.f32 %v1070_v33, %v1069_v31  ;;  %v1119_v38 = vadd.f32 %v1118_v34, %v1117_v32  ;;  %v1072_v39 = vpop.f32.mrb[10].mxu0  ;;  %v1120_v40 = vpop.f32.mrb[10].mxu1 }
 0x10c   : > { %845 = vst.msk [vmem:[%s1378_s4 + $0x48] sm:$0xf] %vm826_vm0, %v1027_v28  ;;  %v1073_v41 = vpop.f32.mrb[11].mxu0  ;;  %v1121_v42 = vpop.f32.mrb[11].mxu1 }
 0x10d   : > { %830 = vst.msk [vmem:[%s1378_s4 + $0xc] sm:$0xf] %vm826_vm0, %v1012_v35  ;;  %846 = vst.msk [vmem:[%s1378_s4 + $0x4c] sm:$0xf] %vm826_vm0, %v1028_v36  ;;  %v556_v43 = vadd.f32 %v1071_v37, %v1368_v50  ;;  %v620_v44 = vadd.f32 %v1119_v38, %v1368_v50  ;;  %v1074_v45 = vadd.f32 %v1073_v41, %v1072_v39 }
 0x10e   : > { %v1122_v46 = vadd.f32 %v1121_v42, %v1120_v40 }
 0x10f   : > { %v670_v47 = vmax.f32 %v556_v43, 0.0  ;;  %v686_v48 = vmax.f32 %v620_v44, 0.0  ;;  %v559_v49 = vadd.f32 %v1074_v45, %v1368_v50 }
 0x110   : > { %v623_v51 = vadd.f32 %v1122_v46, %v1368_v50 }
 0x111   : > { %v1013_v52 = vpack.c.bf16 %v670_v47, %v670_v47  ;;  %v1029_v53 = vpack.c.bf16 %v686_v48, %v686_v48  ;;  %v671_v54 = vmax.f32 %v559_v49, 0.0  ;;  %v1075_v56 = vpop.f32.mrb[12].mxu0  ;;  %v1123_v57 = vpop.f32.mrb[12].mxu1 }
 0x112   : > { %v687_v55 = vmax.f32 %v623_v51, 0.0  ;;  %v1076_v58 = vpop.f32.mrb[13].mxu0  ;;  %v1124_v59 = vpop.f32.mrb[13].mxu1 }
 0x113   : > { %831 = vst.msk [vmem:[%s1378_s4 + $0x10] sm:$0xf] %vm826_vm0, %v1013_v52  ;;  %847 = vst.msk [vmem:[%s1378_s4 + $0x50] sm:$0xf] %vm826_vm0, %v1029_v53  ;;  %v1014_v60 = vpack.c.bf16 %v671_v54, %v671_v54  ;;  %v1077_v62 = vadd.f32 %v1076_v58, %v1075_v56  ;;  %v1125_v63 = vadd.f32 %v1124_v59, %v1123_v57  ;;  %v1078_v0 = vpop.f32.mrb[14].mxu0  ;;  %v1126_v1 = vpop.f32.mrb[14].mxu1 }
 0x114   : > { %v1030_v61 = vpack.c.bf16 %v687_v55, %v687_v55  ;;  %v1079_v2 = vpop.f32.mrb[15].mxu0  ;;  %v1127_v3 = vpop.f32.mrb[15].mxu1 }
 0x115   : > { %832 = vst.msk [vmem:[%s1378_s4 + $0x14] sm:$0xf] %vm826_vm0, %v1014_v60  ;;  %v564_v4 = vadd.f32 %v1077_v62, %v1368_v50  ;;  %v628_v5 = vadd.f32 %v1125_v63, %v1368_v50  ;;  %v1080_v6 = vadd.f32 %v1079_v2, %v1078_v0  ;;  %v1128_v7 = vadd.f32 %v1127_v3, %v1126_v1 }
 0x116   : > { %848 = vst.msk [vmem:[%s1378_s4 + $0x54] sm:$0xf] %vm826_vm0, %v1030_v61 }
 0x117   : > { %v672_v8 = vmax.f32 %v564_v4, 0.0  ;;  %v688_v9 = vmax.f32 %v628_v5, 0.0  ;;  %v567_v10 = vadd.f32 %v1080_v6, %v1368_v50  ;;  %v631_v11 = vadd.f32 %v1128_v7, %v1368_v50 }
 0x119   : > { %v1015_v12 = vpack.c.bf16 %v672_v8, %v672_v8  ;;  %v1031_v13 = vpack.c.bf16 %v688_v9, %v688_v9  ;;  %v673_v14 = vmax.f32 %v567_v10, 0.0  ;;  %v689_v15 = vmax.f32 %v631_v11, 0.0  ;;  %v1081_v16 = vpop.f32.mrb[16].mxu0  ;;  %v1129_v17 = vpop.f32.mrb[16].mxu1 }
 0x11a   : > { %v1082_v18 = vpop.f32.mrb[17].mxu0  ;;  %v1130_v19 = vpop.f32.mrb[17].mxu1 }
 0x11b   : > { %833 = vst.msk [vmem:[%s1378_s4 + $0x18] sm:$0xf] %vm826_vm0, %v1015_v12  ;;  %849 = vst.msk [vmem:[%s1378_s4 + $0x58] sm:$0xf] %vm826_vm0, %v1031_v13  ;;  %v1016_v20 = vpack.c.bf16 %v673_v14, %v673_v14  ;;  %v1032_v21 = vpack.c.bf16 %v689_v15, %v689_v15  ;;  %v1083_v22 = vadd.f32 %v1082_v18, %v1081_v16  ;;  %v1084_v24 = vpop.f32.mrb[18].mxu0  ;;  %v1132_v25 = vpop.f32.mrb[18].mxu1 }
 0x11c   : > { %v1131_v23 = vadd.f32 %v1130_v19, %v1129_v17  ;;  %v1085_v26 = vpop.f32.mrb[19].mxu0  ;;  %v1133_v27 = vpop.f32.mrb[19].mxu1 }
 0x11d   : > { %834 = vst.msk [vmem:[%s1378_s4 + $0x1c] sm:$0xf] %vm826_vm0, %v1016_v20  ;;  %850 = vst.msk [vmem:[%s1378_s4 + $0x5c] sm:$0xf] %vm826_vm0, %v1032_v21  ;;  %v572_v28 = vadd.f32 %v1083_v22, %v1368_v50  ;;  %v1086_v30 = vadd.f32 %v1085_v26, %v1084_v24  ;;  %v1134_v31 = vadd.f32 %v1133_v27, %v1132_v25 }
 0x11e   : > { %v636_v29 = vadd.f32 %v1131_v23, %v1368_v50 }
 0x11f   : > { %v674_v32 = vmax.f32 %v572_v28, 0.0  ;;  %v575_v34 = vadd.f32 %v1086_v30, %v1368_v50  ;;  %v639_v35 = vadd.f32 %v1134_v31, %v1368_v50 }
 0x120   : > { %v690_v33 = vmax.f32 %v636_v29, 0.0 }
 0x121   : > { %v1017_v36 = vpack.c.bf16 %v674_v32, %v674_v32  ;;  %v675_v38 = vmax.f32 %v575_v34, 0.0  ;;  %v691_v39 = vmax.f32 %v639_v35, 0.0  ;;  %v1087_v40 = vpop.f32.mrb[20].mxu0  ;;  %v1135_v41 = vpop.f32.mrb[20].mxu1 }
 0x122   : > { %v1033_v37 = vpack.c.bf16 %v690_v33, %v690_v33  ;;  %v1088_v42 = vpop.f32.mrb[21].mxu0  ;;  %v1136_v43 = vpop.f32.mrb[21].mxu1 }
 0x123   : > { %835 = vst.msk [vmem:[%s1378_s4 + $0x20] sm:$0xf] %vm826_vm0, %v1017_v36  ;;  %v1018_v44 = vpack.c.bf16 %v675_v38, %v675_v38  ;;  %v1034_v45 = vpack.c.bf16 %v691_v39, %v691_v39  ;;  %v1089_v46 = vadd.f32 %v1088_v42, %v1087_v40  ;;  %v1137_v47 = vadd.f32 %v1136_v43, %v1135_v41  ;;  %v1090_v48 = vpop.f32.mrb[22].mxu0  ;;  %v1138_v49 = vpop.f32.mrb[22].mxu1 }
 0x124   : > { %851 = vst.msk [vmem:[%s1378_s4 + $0x60] sm:$0xf] %vm826_vm0, %v1033_v37  ;;  %v1091_v51 = vpop.f32.mrb[23].mxu0  ;;  %v1139_v52 = vpop.f32.mrb[23].mxu1 }
 0x125   : > { %836 = vst.msk [vmem:[%s1378_s4 + $0x24] sm:$0xf] %vm826_vm0, %v1018_v44  ;;  %852 = vst.msk [vmem:[%s1378_s4 + $0x64] sm:$0xf] %vm826_vm0, %v1034_v45  ;;  %v580_v53 = vadd.f32 %v1089_v46, %v1368_v50  ;;  %v644_v54 = vadd.f32 %v1137_v47, %v1368_v50  ;;  %v1092_v55 = vadd.f32 %v1091_v51, %v1090_v48 }
 0x126   : > { %v1140_v56 = vadd.f32 %v1139_v52, %v1138_v49 }
 0x127   : > { %v676_v57 = vmax.f32 %v580_v53, 0.0  ;;  %v692_v58 = vmax.f32 %v644_v54, 0.0  ;;  %v583_v59 = vadd.f32 %v1092_v55, %v1368_v50 }
 0x128   : > { %v647_v60 = vadd.f32 %v1140_v56, %v1368_v50 }
 0x129   : > { %v1019_v61 = vpack.c.bf16 %v676_v57, %v676_v57  ;;  %v1035_v62 = vpack.c.bf16 %v692_v58, %v692_v58  ;;  %v677_v63 = vmax.f32 %v583_v59, 0.0  ;;  %v1093_v1 = vpop.f32.mrb[24].mxu0  ;;  %v1141_v2 = vpop.f32.mrb[24].mxu1 }
 0x12a   : > { %v693_v0 = vmax.f32 %v647_v60, 0.0  ;;  %v1094_v3 = vpop.f32.mrb[25].mxu0  ;;  %v1142_v4 = vpop.f32.mrb[25].mxu1 }
 0x12b   : > { %837 = vst.msk [vmem:[%s1378_s4 + $0x28] sm:$0xf] %vm826_vm0, %v1019_v61  ;;  %853 = vst.msk [vmem:[%s1378_s4 + $0x68] sm:$0xf] %vm826_vm0, %v1035_v62  ;;  %v1020_v5 = vpack.c.bf16 %v677_v63, %v677_v63  ;;  %v1095_v7 = vadd.f32 %v1094_v3, %v1093_v1  ;;  %v1143_v8 = vadd.f32 %v1142_v4, %v1141_v2  ;;  %v1096_v9 = vpop.f32.mrb[26].mxu0  ;;  %v1144_v10 = vpop.f32.mrb[26].mxu1 }
 0x12c   : > { %v1036_v6 = vpack.c.bf16 %v693_v0, %v693_v0  ;;  %v1097_v11 = vpop.f32.mrb[27].mxu0  ;;  %v1145_v12 = vpop.f32.mrb[27].mxu1 }
 0x12d   : > { %838 = vst.msk [vmem:[%s1378_s4 + $0x2c] sm:$0xf] %vm826_vm0, %v1020_v5  ;;  %v588_v13 = vadd.f32 %v1095_v7, %v1368_v50  ;;  %v652_v14 = vadd.f32 %v1143_v8, %v1368_v50  ;;  %v1098_v15 = vadd.f32 %v1097_v11, %v1096_v9  ;;  %v1146_v16 = vadd.f32 %v1145_v12, %v1144_v10 }
 0x12e   : > { %854 = vst.msk [vmem:[%s1378_s4 + $0x6c] sm:$0xf] %vm826_vm0, %v1036_v6 }
 0x12f   : > { %v678_v17 = vmax.f32 %v588_v13, 0.0  ;;  %v694_v18 = vmax.f32 %v652_v14, 0.0  ;;  %v591_v19 = vadd.f32 %v1098_v15, %v1368_v50  ;;  %v655_v20 = vadd.f32 %v1146_v16, %v1368_v50 }
 0x131   : > { %v1021_v21 = vpack.c.bf16 %v678_v17, %v678_v17  ;;  %v1037_v22 = vpack.c.bf16 %v694_v18, %v694_v18  ;;  %v679_v23 = vmax.f32 %v591_v19, 0.0  ;;  %v695_v24 = vmax.f32 %v655_v20, 0.0  ;;  %v1099_v25 = vpop.f32.mrb[28].mxu0  ;;  %v1147_v26 = vpop.f32.mrb[28].mxu1 }
 0x132   : > { %v1100_v27 = vpop.f32.mrb[29].mxu0  ;;  %v1148_v28 = vpop.f32.mrb[29].mxu1 }
 0x133   : > { %839 = vst.msk [vmem:[%s1378_s4 + $0x30] sm:$0xf] %vm826_vm0, %v1021_v21  ;;  %855 = vst.msk [vmem:[%s1378_s4 + $0x70] sm:$0xf] %vm826_vm0, %v1037_v22  ;;  %v1022_v29 = vpack.c.bf16 %v679_v23, %v679_v23  ;;  %v1038_v30 = vpack.c.bf16 %v695_v24, %v695_v24  ;;  %v1101_v31 = vadd.f32 %v1100_v27, %v1099_v25  ;;  %v1102_v33 = vpop.f32.mrb[30].mxu0  ;;  %v1150_v34 = vpop.f32.mrb[30].mxu1 }
 0x134   : > { %v1149_v32 = vadd.f32 %v1148_v28, %v1147_v26  ;;  %v1103_v35 = vpop.f32.mrb[31].mxu0  ;;  %v1151_v36 = vpop.f32.mrb[31].mxu1 }
 0x135   : > { %840 = vst.msk [vmem:[%s1378_s4 + $0x34] sm:$0xf] %vm826_vm0, %v1022_v29  ;;  %856 = vst.msk [vmem:[%s1378_s4 + $0x74] sm:$0xf] %vm826_vm0, %v1038_v30  ;;  %v596_v37 = vadd.f32 %v1101_v31, %v1368_v50  ;;  %v1104_v39 = vadd.f32 %v1103_v35, %v1102_v33  ;;  %v1152_v40 = vadd.f32 %v1151_v36, %v1150_v34 }
 0x136   : > { %v660_v38 = vadd.f32 %v1149_v32, %v1368_v50 }
 0x137   : > { %v680_v41 = vmax.f32 %v596_v37, 0.0  ;;  %v599_v43 = vadd.f32 %v1104_v39, %v1368_v50  ;;  %v663_v44 = vadd.f32 %v1152_v40, %v1368_v50 }
 0x138   : > { %v696_v42 = vmax.f32 %v660_v38, 0.0 }
 0x139   : > { %v1023_v45 = vpack.c.bf16 %v680_v41, %v680_v41  ;;  %v681_v47 = vmax.f32 %v599_v43, 0.0  ;;  %v697_v48 = vmax.f32 %v663_v44, 0.0 }
 0x13a   : > { %v1039_v46 = vpack.c.bf16 %v696_v42, %v696_v42 }
 0x13b   : > { %841 = vst.msk [vmem:[%s1378_s4 + $0x38] sm:$0xf] %vm826_vm0, %v1023_v45  ;;  %v1024_v49 = vpack.c.bf16 %v681_v47, %v681_v47  ;;  %v1040_v51 = vpack.c.bf16 %v697_v48, %v697_v48 }
 0x13c   : > { %857 = vst.msk [vmem:[%s1378_s4 + $0x78] sm:$0xf] %vm826_vm0, %v1039_v46 }
 0x13d   : > { %842 = vst.msk [vmem:[%s1378_s4 + $0x3c] sm:$0xf] %vm826_vm0, %v1024_v49  ;;  %858 = vst.msk [vmem:[%s1378_s4 + $0x7c] sm:$0xf] %vm826_vm0, %v1040_v51 }
 0x13e PF: > { %s13_s12 = sadd.s32 1, %s1247_s12  }
 0x13f   : > { %p10_p4 = scmp.ge.s32.totalorder %s13_s12, 6  }
 0x141   :  { %12 = sbr.rel (!%p10_p4) target bundleno = 1 (0x1), region = 62 }

// kernel: forward.5
= control target key start
LH: loop header
LB: loop body
LE: loop exit
PB: predicated region body
PF: predicated region fallthrough
CT: control target
= control target key end

     0   :  { %s1334_s12 = smov 0   ;;  %s1542_s0 = inlined_call_operand.vmem [shape: bf16[256,512], index: 0, kind: input, shape index: {}]   ;;  %s1543_s1 = inlined_call_operand.vmem [shape: bf16[512,64], index: 1, kind: input, shape index: {}]   ;;  %s1544_s2 = inlined_call_operand.vmem [shape: f32[1,64], index: 2, kind: input, shape index: {}]   ;;  %s1545_s3 = inlined_call_operand.vmem [shape: bf16[256,64], index: 3, kind: output, shape index: {}]  }
   0x1 LB: > { %s980_s13 = sadd.s32 4294967295, %s1312_s12   ;;  %p984_p0 = scmp.ge.s32.totalorder %s1312_s12, 1  ;;  %s1312_s12 = sphi %s1334_s12, %s13_s12  }
   0x2   : > { %p139_p1 = scmp.lt.s32.totalorder %s1312_s12, 3 }
   0x4   : > { %p140_p2 = pnand %p984_p0, %p139_p1 }
   0x5   : > { %v1226_v0 = vld [vmem:[%s1543_s1 + $0x40] sm:$0xff] (!%p140_p2)   ;;  %v1230_v4 = vld [vmem:[%s1543_s1 + $0x48] sm:$0xff] (!%p140_p2)   ;;  %v1234_v8 = vld [vmem:[%s1543_s1 + $0x50] sm:$0xff] (!%p140_p2)   ;;  %s985_s21 = sshll.u32 (!%p140_p2), %s980_s13, 4  ;;  %vm907_vm0 = vcmask (!%p140_p2), 519168  }
   0x6   : > { %143 = sbr.rel (%p140_p2) target bundleno = 321 (0x141), region = 32  ;;  %v1227_v1 = vld [vmem:[%s1543_s1 + $0xc0] sm:$0xff] (!%p140_p2)   ;;  %1090 = vmatprep.subr.bf16.mxu0 (!%p140_p2), %v1226_v0  ;;  %v1231_v5 = vld [vmem:[%s1543_s1 + $0xc8] sm:$0xff] (!%p140_p2)   ;;  %v1235_v9 = vld [vmem:[%s1543_s1 + $0xd0] sm:$0xff] (!%p140_p2)   ;;  %p165_p3 = scmp.lt.s32.totalorder (!%p140_p2), %s985_s21, 31 }
   0x7   : > { %v1228_v2 = vld [vmem:[%s1543_s1] sm:$0xff] (!%p140_p2)   ;;  %1154 = vmatprep.subr.bf16.mxu1 (!%p140_p2), %v1227_v1  ;;  %v1232_v6 = vld [vmem:[%s1543_s1 + $0x8] sm:$0xff] (!%p140_p2)   ;;  %v1236_v10 = vld [vmem:[%s1543_s1 + $0x10] sm:$0xff] (!%p140_p2)  }
   0x8   : > { %v1229_v3 = vld [vmem:[%s1543_s1 + $0x80] sm:$0xff] (!%p140_p2)   ;;  %1091 = vmatpush3.bf16.msra.mxu0 (!%p140_p2), %v1228_v2  ;;  %v1233_v7 = vld [vmem:[%s1543_s1 + $0x88] sm:$0xff] (!%p140_p2)   ;;  %v1237_v11 = vld [vmem:[%s1543_s1 + $0x90] sm:$0xff] (!%p140_p2)  }
   0x9   : > { %1155 = vmatpush3.bf16.msra.mxu1 (!%p140_p2), %v1229_v3  ;;  %1092 = vmatprep.subr.bf16.mxu0 (!%p140_p2), %v1230_v4  ;;  %v1238_v12 = vld [vmem:[%s1543_s1 + $0x58] sm:$0xff] (!%p140_p2)   ;;  %v1242_v16 = vld [vmem:[%s1543_s1 + $0x60] sm:$0xff] (!%p140_p2)   ;;  %v1246_v20 = vld [vmem:[%s1543_s1 + $0x68] sm:$0xff] (!%p140_p2)  }
   0xa   : > { %1156 = vmatprep.subr.bf16.mxu1 (!%p140_p2), %v1231_v5  ;;  %v1239_v13 = vld [vmem:[%s1543_s1 + $0xd8] sm:$0xff] (!%p140_p2)   ;;  %v1243_v17 = vld [vmem:[%s1543_s1 + $0xe0] sm:$0xff] (!%p140_p2)   ;;  %v1247_v21 = vld [vmem:[%s1543_s1 + $0xe8] sm:$0xff] (!%p140_p2)  }
   0xb   : > { %v1240_v14 = vld [vmem:[%s1543_s1 + $0x18] sm:$0xff] (!%p140_p2)   ;;  %v1244_v18 = vld [vmem:[%s1543_s1 + $0x20] sm:$0xff] (!%p140_p2)   ;;  %v1248_v22 = vld [vmem:[%s1543_s1 + $0x28] sm:$0xff] (!%p140_p2)  }
   0xc   : > { %1093 = vmatpush3.bf16.msra.mxu0 (!%p140_p2), %v1232_v6  ;;  %v1241_v15 = vld [vmem:[%s1543_s1 + $0x98] sm:$0xff] (!%p140_p2)   ;;  %v1245_v19 = vld [vmem:[%s1543_s1 + $0xa0] sm:$0xff] (!%p140_p2)   ;;  %v1249_v23 = vld [vmem:[%s1543_s1 + $0xa8] sm:$0xff] (!%p140_p2)  }
   0xd   : > { %1157 = vmatpush3.bf16.msra.mxu1 %v1233_v7  ;;  %1094 = vmatprep.subr.bf16.mxu0 %v1234_v8  ;;  %s1547_s21 = smov (!%p165_p3, %s985_s21), 31  ;;  %v1250_v24 = vld [vmem:[%s1543_s1 + $0x70] sm:$0xff]   ;;  %v1254_v28 = vld [vmem:[%s1543_s1 + $0x78] sm:$0xff]   ;;  %v1483_v2 = vld [vmem:[%s1544_s2] ss:$0 sm:$0xff] }
   0xe   : > { %1158 = vmatprep.subr.bf16.mxu1 %v1235_v9  ;;  %v1251_v25 = vld [vmem:[%s1543_s1 + $0xf0] sm:$0xff]   ;;  %s1073_s18 = sshll.u32 %s1547_s21, 4  ;;  %v1255_v29 = vld [vmem:[%s1543_s1 + $0xf8] sm:$0xff]   ;;  %s989_s7 = sshll.u32 %s1547_s21, 2 }
   0xf   : > { %v1252_v26 = vld [vmem:[%s1543_s1 + $0x30] sm:$0xff]   ;;  %s1440_s28 = scalar_lea.vmem %s1542_s0, %s1073_s18  ;;  %v1256_v30 = vld [vmem:[%s1543_s1 + $0x38] sm:$0xff]   ;;  %s1491_s10 = scalar_lea.vmem %s1545_s3, %s989_s7 }
  0x10   : > { %1095 = vmatpush3.bf16.msra.mxu0 %v1236_v10  ;;  %v1253_v27 = vld [vmem:[%s1543_s1 + $0xb0] sm:$0xff]   ;;  %v1257_v31 = vld [vmem:[%s1543_s1 + $0xb8] sm:$0xff]  }
  0x11   : > { %1159 = vmatpush3.bf16.msra.mxu1 %v1237_v11  ;;  %1096 = vmatprep.subr.bf16.mxu0 %v1238_v12  ;;  %v1258_v32 = vld [vmem:[%s1440_s28] ss:$16 sps:$4 sm:$0xff]   ;;  %v1260_v33 = vld [vmem:[%s1440_s28 + $0x4] ss:$16 sps:$4 sm:$0xff]   ;;  %v1261_v34 = vld [vmem:[%s1440_s28 + $0x8] ss:$16 sps:$4 sm:$0xff]  }
  0x12   : > { %1160 = vmatprep.subr.bf16.mxu1 %v1239_v13  ;;  %v1263_v35 = vld [vmem:[%s1440_s28 + $0xc] ss:$16 sps:$4 sm:$0xff]   ;;  %665 = vmatprep.mubr.bf16.mxu0 %v1260_v33  ;;  %v1264_v36 = vld [vmem:[%s1440_s28 + $0x24] ss:$16 sps:$4 sm:$0xff]   ;;  %v1268_v38 = vld [vmem:[%s1440_s28 + $0x20] ss:$16 sps:$4 sm:$0xff]  }
  0x13   : > { %762 = vmatprep.mubr.bf16.mxu1 %v1263_v35  ;;  %v1266_v37 = vld [vmem:[%s1440_s28 + $0x2c] ss:$16 sps:$4 sm:$0xff]   ;;  %v1269_v39 = vld [vmem:[%s1440_s28 + $0x28] ss:$16 sps:$4 sm:$0xff]   ;;  %v1270_v40 = vld [vmem:[%s1440_s28 + $0x44] ss:$16 sps:$4 sm:$0xff]  }
  0x14   : > { %1097 = vmatpush3.bf16.msra.mxu0 %v1240_v14  ;;  %v1272_v41 = vld [vmem:[%s1440_s28 + $0x4c] ss:$16 sps:$4 sm:$0xff]   ;;  %v1274_v42 = vld [vmem:[%s1440_s28 + $0x40] ss:$16 sps:$4 sm:$0xff]   ;;  %v1275_v43 = vld [vmem:[%s1440_s28 + $0x48] ss:$16 sps:$4 sm:$0xff]  }
  0x15   : > { %1161 = vmatpush3.bf16.msra.mxu1 %v1241_v15  ;;  %1098 = vmatprep.subr.bf16.mxu0 %v1242_v16  ;;  %v1276_v44 = vld [vmem:[%s1440_s28 + $0x64] ss:$16 sps:$4 sm:$0xff]   ;;  %v1278_v45 = vld [vmem:[%s1440_s28 + $0x6c] ss:$16 sps:$4 sm:$0xff]   ;;  %v1280_v46 = vld [vmem:[%s1440_s28 + $0x60] ss:$16 sps:$4 sm:$0xff]  }
  0x16   : > { %1162 = vmatprep.subr.bf16.mxu1 %v1243_v17  ;;  %v1281_v47 = vld [vmem:[%s1440_s28 + $0x68] ss:$16 sps:$4 sm:$0xff]   ;;  %v1282_v48 = vld [vmem:[%s1440_s28 + $0x84] ss:$16 sps:$4 sm:$0xff]   ;;  %v1284_v49 = vld [vmem:[%s1440_s28 + $0x8c] ss:$16 sps:$4 sm:$0xff]  }
  0x17   : > { %v1286_v50 = vld [vmem:[%s1440_s28 + $0x80] ss:$16 sps:$4 sm:$0xff]   ;;  %v1287_v51 = vld [vmem:[%s1440_s28 + $0x88] ss:$16 sps:$4 sm:$0xff]   ;;  %v1288_v52 = vld [vmem:[%s1440_s28 + $0xa4] ss:$16 sps:$4 sm:$0xff]  }
  0x18   : > { %1099 = vmatpush3.bf16.msra.mxu0 %v1244_v18  ;;  %v1290_v53 = vld [vmem:[%s1440_s28 + $0xac] ss:$16 sps:$4 sm:$0xff]   ;;  %v1292_v54 = vld [vmem:[%s1440_s28 + $0xa0] ss:$16 sps:$4 sm:$0xff]   ;;  %v1293_v55 = vld [vmem:[%s1440_s28 + $0xa8] ss:$16 sps:$4 sm:$0xff]  }
  0x19   : > { %1163 = vmatpush3.bf16.msra.mxu1 %v1245_v19  ;;  %1100 = vmatprep.subr.bf16.mxu0 %v1246_v20  ;;  %v1294_v56 = vld [vmem:[%s1440_s28 + $0xc4] ss:$16 sps:$4 sm:$0xff]   ;;  %v1296_v57 = vld [vmem:[%s1440_s28 + $0xcc] ss:$16 sps:$4 sm:$0xff]   ;;  %v1298_v58 = vld [vmem:[%s1440_s28 + $0xc0] ss:$16 sps:$4 sm:$0xff]  }
  0x1a   : > { %1164 = vmatprep.subr.bf16.mxu1 %v1247_v21  ;;  %v1299_v59 = vld [vmem:[%s1440_s28 + $0xc8] ss:$16 sps:$4 sm:$0xff]   ;;  %v1300_v60 = vld [vmem:[%s1440_s28 + $0xe4] ss:$16 sps:$4 sm:$0xff]   ;;  %v1302_v61 = vld [vmem:[%s1440_s28 + $0xec] ss:$16 sps:$4 sm:$0xff]  }
  0x1b   : > { %v1304_v62 = vld [vmem:[%s1440_s28 + $0xe0] ss:$16 sps:$4 sm:$0xff]   ;;  %v1305_v63 = vld [vmem:[%s1440_s28 + $0xe8] ss:$16 sps:$4 sm:$0xff]  }
  0x1c   : > { %1101 = vmatpush3.bf16.msra.mxu0 %v1248_v22 }
  0x1d   : > { %1165 = vmatpush3.bf16.msra.mxu1 %v1249_v23  ;;  %1102 = vmatprep.subr.bf16.mxu0 %v1250_v24 }
  0x1e   : > { %1166 = vmatprep.subr.bf16.mxu1 %v1251_v25 }
  0x20   : > { %1103 = vmatpush3.bf16.msra.mxu0 %v1252_v26 }
  0x21   : > { %1167 = vmatpush3.bf16.msra.mxu1 %v1253_v27  ;;  %1104 = vmatprep.subr.bf16.mxu0 %v1254_v28 }
  0x22   : > { %1168 = vmatprep.subr.bf16.mxu1 %v1255_v29 }
  0x24   : > { %1105 = vmatpush3.bf16.msra.mxu0 %v1256_v30 }
  0x25   : > { %1169 = vmatpush3.bf16.msra.mxu1 %v1257_v31 }
  0x27   : > { %666 = vmatmul.mubr.bf16.vlgmr.msra.gmra.mrb[0].mxu0 %v1258_v32 }
  0x28   : > { %763 = vmatmul.mubr.bf16.vlgmr.msra.gmra.mrb[0].mxu1 %v1261_v34  ;;  %673 = vmatprep.mubr.bf16.mxu0 %v1264_v36 }
  0x29   : > { %770 = vmatprep.mubr.bf16.mxu1 %v1266_v37 }
  0x2f   : > { %674 = vmatmul.mubr.bf16.gmra.mrb[4].mxu0 %v1268_v38 }
  0x30   : > { %771 = vmatmul.mubr.bf16.gmra.mrb[4].mxu1 %v1269_v39  ;;  %681 = vmatprep.mubr.bf16.mxu0 %v1270_v40 }
  0x31   : > { %778 = vmatprep.mubr.bf16.mxu1 %v1272_v41 }
  0x37   : > { %682 = vmatmul.mubr.bf16.gmra.mrb[8].mxu0 %v1274_v42 }
  0x38   : > { %779 = vmatmul.mubr.bf16.gmra.mrb[8].mxu1 %v1275_v43  ;;  %689 = vmatprep.mubr.bf16.mxu0 %v1276_v44 }
  0x39   : > { %786 = vmatprep.mubr.bf16.mxu1 %v1278_v45 }
  0x3f   : > { %690 = vmatmul.mubr.bf16.gmra.mrb[12].mxu0 %v1280_v46 }
  0x40   : > { %787 = vmatmul.mubr.bf16.gmra.mrb[12].mxu1 %v1281_v47  ;;  %697 = vmatprep.mubr.bf16.mxu0 %v1282_v48 }
  0x41   : > { %794 = vmatprep.mubr.bf16.mxu1 %v1284_v49 }
  0x47   : > { %698 = vmatmul.mubr.bf16.gmra.mrb[16].mxu0 %v1286_v50 }
  0x48   : > { %795 = vmatmul.mubr.bf16.gmra.mrb[16].mxu1 %v1287_v51  ;;  %705 = vmatprep.mubr.bf16.mxu0 %v1288_v52 }
  0x49   : > { %802 = vmatprep.mubr.bf16.mxu1 %v1290_v53 }
  0x4f   : > { %706 = vmatmul.mubr.bf16.gmra.mrb[20].mxu0 %v1292_v54 }
  0x50   : > { %803 = vmatmul.mubr.bf16.gmra.mrb[20].mxu1 %v1293_v55  ;;  %713 = vmatprep.mubr.bf16.mxu0 %v1294_v56 }
  0x51   : > { %810 = vmatprep.mubr.bf16.mxu1 %v1296_v57 }
  0x57   : > { %714 = vmatmul.mubr.bf16.gmra.mrb[24].mxu0 %v1298_v58 }
  0x58   : > { %811 = vmatmul.mubr.bf16.gmra.mrb[24].mxu1 %v1299_v59  ;;  %721 = vmatprep.mubr.bf16.mxu0 %v1300_v60 }
  0x59   : > { %818 = vmatprep.mubr.bf16.mxu1 %v1302_v61 }
  0x5f   : > { %722 = vmatmul.mubr.bf16.gmra.mrb[28].mxu0 %v1304_v62 }
  0x60   : > { %819 = vmatmul.mubr.bf16.gmra.mrb[28].mxu1 %v1305_v63 }
  0xfa   : > { %v1106_v0 = vpop.f32.mrb[0].mxu0 }
  0xfb   : > { %v1170_v1 = vpop.f32.mrb[0].mxu1  ;;  %v1107_v3 = vpop.f32.mrb[1].mxu0 }
  0xfc   : > { %v1108_v4 = vadd.f32 %v1107_v3, %v1106_v0  ;;  %v1171_v5 = vpop.f32.mrb[1].mxu1  ;;  %v1109_v6 = vpop.f32.mrb[2].mxu0 }
  0xfd   : > { %v1172_v7 = vadd.f32 %v1171_v5, %v1170_v1  ;;  %v1173_v8 = vpop.f32.mrb[2].mxu1  ;;  %v1110_v9 = vpop.f32.mrb[3].mxu0 }
  0xfe   : > { %v668_v10 = vadd.f32 %v1108_v4, %v1483_v2  ;;  %v1111_v11 = vadd.f32 %v1110_v9, %v1109_v6  ;;  %v1174_v12 = vpop.f32.mrb[3].mxu1 }
  0xff   : > { %v1175_v13 = vadd.f32 %v1174_v12, %v1173_v8 }
 0x100   : > { %v765_v14 = vadd.f32 %v1172_v7, %v668_v10  ;;  %v671_v15 = vadd.f32 %v1111_v11, %v1483_v2 }
 0x102   : > { %v827_v16 = vmax.f32 %v765_v14, 0.0  ;;  %v768_v17 = vadd.f32 %v1175_v13, %v671_v15  ;;  %v1112_v18 = vpop.f32.mrb[4].mxu0 }
 0x103   : > { %v1176_v19 = vpop.f32.mrb[4].mxu1  ;;  %v1113_v20 = vpop.f32.mrb[5].mxu0 }
 0x104   : > { %v1074_v21 = vpack.c.bf16 %v827_v16, %v827_v16  ;;  %v828_v22 = vmax.f32 %v768_v17, 0.0  ;;  %v1114_v23 = vadd.f32 %v1113_v20, %v1112_v18  ;;  %v1177_v24 = vpop.f32.mrb[5].mxu1  ;;  %v1115_v25 = vpop.f32.mrb[6].mxu0 }
 0x105   : > { %v1178_v26 = vadd.f32 %v1177_v24, %v1176_v19  ;;  %v1179_v27 = vpop.f32.mrb[6].mxu1  ;;  %v1116_v28 = vpop.f32.mrb[7].mxu0 }
 0x106   : > { %908 = vst.msk [vmem:[%s1491_s10] sm:$0xf] %vm907_vm0, %v1074_v21  ;;  %v1075_v29 = vpack.c.bf16 %v828_v22, %v828_v22  ;;  %v676_v30 = vadd.f32 %v1114_v23, %v1483_v2  ;;  %v1117_v31 = vadd.f32 %v1116_v28, %v1115_v25  ;;  %v1180_v32 = vpop.f32.mrb[7].mxu1 }
 0x107   : > { %v1181_v33 = vadd.f32 %v1180_v32, %v1179_v27 }
 0x108   : > { %909 = vst.msk [vmem:[%s1491_s10 + $0x4] sm:$0xf] %vm907_vm0, %v1075_v29  ;;  %v773_v34 = vadd.f32 %v1178_v26, %v676_v30  ;;  %v679_v35 = vadd.f32 %v1117_v31, %v1483_v2 }
 0x10a   : > { %v829_v36 = vmax.f32 %v773_v34, 0.0  ;;  %v776_v37 = vadd.f32 %v1181_v33, %v679_v35  ;;  %v1118_v38 = vpop.f32.mrb[8].mxu0 }
 0x10b   : > { %v1182_v39 = vpop.f32.mrb[8].mxu1  ;;  %v1119_v40 = vpop.f32.mrb[9].mxu0 }
 0x10c   : > { %v1076_v41 = vpack.c.bf16 %v829_v36, %v829_v36  ;;  %v830_v42 = vmax.f32 %v776_v37, 0.0  ;;  %v1120_v43 = vadd.f32 %v1119_v40, %v1118_v38  ;;  %v1183_v44 = vpop.f32.mrb[9].mxu1  ;;  %v1121_v45 = vpop.f32.mrb[10].mxu0 }
 0x10d   : > { %v1184_v46 = vadd.f32 %v1183_v44, %v1182_v39  ;;  %v1185_v47 = vpop.f32.mrb[10].mxu1  ;;  %v1122_v48 = vpop.f32.mrb[11].mxu0 }
 0x10e   : > { %910 = vst.msk [vmem:[%s1491_s10 + $0x8] sm:$0xf] %vm907_vm0, %v1076_v41  ;;  %v1077_v49 = vpack.c.bf16 %v830_v42, %v830_v42  ;;  %v684_v50 = vadd.f32 %v1120_v43, %v1483_v2  ;;  %v1123_v51 = vadd.f32 %v1122_v48, %v1121_v45  ;;  %v1186_v52 = vpop.f32.mrb[11].mxu1 }
 0x10f   : > { %v1187_v53 = vadd.f32 %v1186_v52, %v1185_v47 }
 0x110   : > { %911 = vst.msk [vmem:[%s1491_s10 + $0xc] sm:$0xf] %vm907_vm0, %v1077_v49  ;;  %v781_v54 = vadd.f32 %v1184_v46, %v684_v50  ;;  %v687_v55 = vadd.f32 %v1123_v51, %v1483_v2 }
 0x112   : > { %v831_v56 = vmax.f32 %v781_v54, 0.0  ;;  %v784_v57 = vadd.f32 %v1187_v53, %v687_v55  ;;  %v1124_v58 = vpop.f32.mrb[12].mxu0 }
 0x113   : > { %v1188_v59 = vpop.f32.mrb[12].mxu1  ;;  %v1125_v60 = vpop.f32.mrb[13].mxu0 }
 0x114   : > { %v1078_v61 = vpack.c.bf16 %v831_v56, %v831_v56  ;;  %v832_v62 = vmax.f32 %v784_v57, 0.0  ;;  %v1126_v63 = vadd.f32 %v1125_v60, %v1124_v58  ;;  %v1189_v0 = vpop.f32.mrb[13].mxu1  ;;  %v1127_v1 = vpop.f32.mrb[14].mxu0 }
 0x115   : > { %v1190_v3 = vadd.f32 %v1189_v0, %v1188_v59  ;;  %v1191_v4 = vpop.f32.mrb[14].mxu1  ;;  %v1128_v5 = vpop.f32.mrb[15].mxu0 }
 0x116   : > { %912 = vst.msk [vmem:[%s1491_s10 + $0x10] sm:$0xf] %vm907_vm0, %v1078_v61  ;;  %v1079_v6 = vpack.c.bf16 %v832_v62, %v832_v62  ;;  %v692_v7 = vadd.f32 %v1126_v63, %v1483_v2  ;;  %v1129_v8 = vadd.f32 %v1128_v5, %v1127_v1  ;;  %v1192_v9 = vpop.f32.mrb[15].mxu1 }
 0x117   : > { %v1193_v10 = vadd.f32 %v1192_v9, %v1191_v4 }
 0x118   : > { %913 = vst.msk [vmem:[%s1491_s10 + $0x14] sm:$0xf] %vm907_vm0, %v1079_v6  ;;  %v789_v11 = vadd.f32 %v1190_v3, %v692_v7  ;;  %v695_v12 = vadd.f32 %v1129_v8, %v1483_v2 }
 0x11a   : > { %v833_v13 = vmax.f32 %v789_v11, 0.0  ;;  %v792_v14 = vadd.f32 %v1193_v10, %v695_v12  ;;  %v1130_v15 = vpop.f32.mrb[16].mxu0 }
 0x11b   : > { %v1194_v16 = vpop.f32.mrb[16].mxu1  ;;  %v1131_v17 = vpop.f32.mrb[17].mxu0 }
 0x11c   : > { %v1080_v18 = vpack.c.bf16 %v833_v13, %v833_v13  ;;  %v834_v19 = vmax.f32 %v792_v14, 0.0  ;;  %v1132_v20 = vadd.f32 %v1131_v17, %v1130_v15  ;;  %v1195_v21 = vpop.f32.mrb[17].mxu1  ;;  %v1133_v22 = vpop.f32.mrb[18].mxu0 }
 0x11d   : > { %v1196_v23 = vadd.f32 %v1195_v21, %v1194_v16  ;;  %v1197_v24 = vpop.f32.mrb[18].mxu1  ;;  %v1134_v25 = vpop.f32.mrb[19].mxu0 }
 0x11e   : > { %914 = vst.msk [vmem:[%s1491_s10 + $0x18] sm:$0xf] %vm907_vm0, %v1080_v18  ;;  %v1081_v26 = vpack.c.bf16 %v834_v19, %v834_v19  ;;  %v700_v27 = vadd.f32 %v1132_v20, %v1483_v2  ;;  %v1135_v28 = vadd.f32 %v1134_v25, %v1133_v22  ;;  %v1198_v29 = vpop.f32.mrb[19].mxu1 }
 0x11f   : > { %v1199_v30 = vadd.f32 %v1198_v29, %v1197_v24 }
 0x120   : > { %915 = vst.msk [vmem:[%s1491_s10 + $0x1c] sm:$0xf] %vm907_vm0, %v1081_v26  ;;  %v797_v31 = vadd.f32 %v1196_v23, %v700_v27  ;;  %v703_v32 = vadd.f32 %v1135_v28, %v1483_v2 }
 0x122   : > { %v835_v33 = vmax.f32 %v797_v31, 0.0  ;;  %v800_v34 = vadd.f32 %v1199_v30, %v703_v32  ;;  %v1136_v35 = vpop.f32.mrb[20].mxu0 }
 0x123   : > { %v1200_v36 = vpop.f32.mrb[20].mxu1  ;;  %v1137_v37 = vpop.f32.mrb[21].mxu0 }
 0x124   : > { %v1082_v38 = vpack.c.bf16 %v835_v33, %v835_v33  ;;  %v836_v39 = vmax.f32 %v800_v34, 0.0  ;;  %v1138_v40 = vadd.f32 %v1137_v37, %v1136_v35  ;;  %v1201_v41 = vpop.f32.mrb[21].mxu1  ;;  %v1139_v42 = vpop.f32.mrb[22].mxu0 }
 0x125   : > { %v1202_v43 = vadd.f32 %v1201_v41, %v1200_v36  ;;  %v1203_v44 = vpop.f32.mrb[22].mxu1  ;;  %v1140_v45 = vpop.f32.mrb[23].mxu0 }
 0x126   : > { %916 = vst.msk [vmem:[%s1491_s10 + $0x20] sm:$0xf] %vm907_vm0, %v1082_v38  ;;  %v1083_v46 = vpack.c.bf16 %v836_v39, %v836_v39  ;;  %v708_v47 = vadd.f32 %v1138_v40, %v1483_v2  ;;  %v1141_v48 = vadd.f32 %v1140_v45, %v1139_v42  ;;  %v1204_v49 = vpop.f32.mrb[23].mxu1 }
 0x127   : > { %v1205_v50 = vadd.f32 %v1204_v49, %v1203_v44 }
 0x128   : > { %917 = vst.msk [vmem:[%s1491_s10 + $0x24] sm:$0xf] %vm907_vm0, %v1083_v46  ;;  %v805_v51 = vadd.f32 %v1202_v43, %v708_v47  ;;  %v711_v52 = vadd.f32 %v1141_v48, %v1483_v2 }
 0x12a   : > { %v837_v53 = vmax.f32 %v805_v51, 0.0  ;;  %v808_v54 = vadd.f32 %v1205_v50, %v711_v52  ;;  %v1142_v55 = vpop.f32.mrb[24].mxu0 }
 0x12b   : > { %v1206_v56 = vpop.f32.mrb[24].mxu1  ;;  %v1143_v57 = vpop.f32.mrb[25].mxu0 }
 0x12c   : > { %v1084_v58 = vpack.c.bf16 %v837_v53, %v837_v53  ;;  %v838_v59 = vmax.f32 %v808_v54, 0.0  ;;  %v1144_v60 = vadd.f32 %v1143_v57, %v1142_v55  ;;  %v1207_v61 = vpop.f32.mrb[25].mxu1  ;;  %v1145_v62 = vpop.f32.mrb[26].mxu0 }
 0x12d   : > { %v1208_v63 = vadd.f32 %v1207_v61, %v1206_v56  ;;  %v1209_v0 = vpop.f32.mrb[26].mxu1  ;;  %v1146_v1 = vpop.f32.mrb[27].mxu0 }
 0x12e   : > { %918 = vst.msk [vmem:[%s1491_s10 + $0x28] sm:$0xf] %vm907_vm0, %v1084_v58  ;;  %v1085_v3 = vpack.c.bf16 %v838_v59, %v838_v59  ;;  %v716_v4 = vadd.f32 %v1144_v60, %v1483_v2  ;;  %v1147_v5 = vadd.f32 %v1146_v1, %v1145_v62  ;;  %v1210_v6 = vpop.f32.mrb[27].mxu1 }
 0x12f   : > { %v1211_v7 = vadd.f32 %v1210_v6, %v1209_v0 }
 0x130   : > { %919 = vst.msk [vmem:[%s1491_s10 + $0x2c] sm:$0xf] %vm907_vm0, %v1085_v3  ;;  %v813_v8 = vadd.f32 %v1208_v63, %v716_v4  ;;  %v719_v9 = vadd.f32 %v1147_v5, %v1483_v2 }
 0x132   : > { %v839_v10 = vmax.f32 %v813_v8, 0.0  ;;  %v816_v11 = vadd.f32 %v1211_v7, %v719_v9  ;;  %v1148_v12 = vpop.f32.mrb[28].mxu0 }
 0x133   : > { %v1212_v13 = vpop.f32.mrb[28].mxu1  ;;  %v1149_v14 = vpop.f32.mrb[29].mxu0 }
 0x134   : > { %v1086_v15 = vpack.c.bf16 %v839_v10, %v839_v10  ;;  %v840_v16 = vmax.f32 %v816_v11, 0.0  ;;  %v1150_v17 = vadd.f32 %v1149_v14, %v1148_v12  ;;  %v1213_v18 = vpop.f32.mrb[29].mxu1  ;;  %v1151_v19 = vpop.f32.mrb[30].mxu0 }
 0x135   : > { %v1214_v20 = vadd.f32 %v1213_v18, %v1212_v13  ;;  %v1215_v21 = vpop.f32.mrb[30].mxu1  ;;  %v1152_v22 = vpop.f32.mrb[31].mxu0 }
 0x136   : > { %920 = vst.msk [vmem:[%s1491_s10 + $0x30] sm:$0xf] %vm907_vm0, %v1086_v15  ;;  %v1087_v23 = vpack.c.bf16 %v840_v16, %v840_v16  ;;  %v724_v24 = vadd.f32 %v1150_v17, %v1483_v2  ;;  %v1153_v25 = vadd.f32 %v1152_v22, %v1151_v19  ;;  %v1216_v26 = vpop.f32.mrb[31].mxu1 }
 0x137   : > { %v1217_v27 = vadd.f32 %v1216_v26, %v1215_v21 }
 0x138   : > { %921 = vst.msk [vmem:[%s1491_s10 + $0x34] sm:$0xf] %vm907_vm0, %v1087_v23  ;;  %v821_v28 = vadd.f32 %v1214_v20, %v724_v24  ;;  %v727_v29 = vadd.f32 %v1153_v25, %v1483_v2 }
 0x13a   : > { %v841_v30 = vmax.f32 %v821_v28, 0.0  ;;  %v824_v31 = vadd.f32 %v1217_v27, %v727_v29 }
 0x13c   : > { %v1088_v32 = vpack.c.bf16 %v841_v30, %v841_v30  ;;  %v842_v33 = vmax.f32 %v824_v31, 0.0 }
 0x13e   : > { %922 = vst.msk [vmem:[%s1491_s10 + $0x38] sm:$0xf] %vm907_vm0, %v1088_v32  ;;  %v1089_v34 = vpack.c.bf16 %v842_v33, %v842_v33 }
 0x140   : > { %923 = vst.msk [vmem:[%s1491_s10 + $0x3c] sm:$0xf] %vm907_vm0, %v1089_v34 }
 0x141 PF: > { %s13_s12 = sadd.s32 1, %s1312_s12  }
 0x142   : > { %p10_p4 = scmp.ge.s32.totalorder %s13_s12, 4  }
 0x144   :  { %12 = sbr.rel (!%p10_p4) target bundleno = 1 (0x1), region = 62 }

// kernel: forward.6
= control target key start
LH: loop header
LB: loop body
LE: loop exit
PB: predicated region body
PF: predicated region fallthrough
CT: control target
= control target key end

     0   :  { %v1270_v34 = vmov 0.0   ;;  %vm1271_vm0 = vmmov 0   ;;  %vm527_vm1 = vcmask 523264   ;;  %vm886_vm2 = vcmask 519168   ;;  %s1633_s1 = inlined_call_operand.vmem [shape: bf16[576,64], index: 1, kind: input, shape index: {}]   ;;  %s1634_s0 = inlined_call_operand.vmem [shape: bf16[112,576], index: 0, kind: input, shape index: {}]   ;;  %s1635_s2 = inlined_call_operand.vmem [shape: f32[1,64], index: 2, kind: input, shape index: {}]   ;;  %s1636_s3 = inlined_call_operand.vmem [shape: bf16[112,64], index: 3, kind: output, shape index: {}]  }
   0x1   :  { %v1185_v0 = vld [vmem:[%s1633_s1 + $0x40] sm:$0xff]   ;;  %v1189_v4 = vld [vmem:[%s1633_s1 + $0x48] sm:$0xff]   ;;  %v1193_v8 = vld [vmem:[%s1633_s1 + $0x50] sm:$0xff]  }
   0x2   :  { %v1186_v1 = vld [vmem:[%s1633_s1 + $0xc0] sm:$0xff]   ;;  %1012 = vmatprep.subr.bf16.mxu0 %v1185_v0  ;;  %v1190_v5 = vld [vmem:[%s1633_s1 + $0xc8] sm:$0xff]   ;;  %v1194_v9 = vld [vmem:[%s1633_s1 + $0xd0] sm:$0xff]  }
   0x3   :  { %v1187_v2 = vld [vmem:[%s1633_s1] sm:$0xff]   ;;  %1070 = vmatprep.subr.bf16.mxu1 %v1186_v1  ;;  %v1191_v6 = vld [vmem:[%s1633_s1 + $0x8] sm:$0xff]   ;;  %v1195_v10 = vld [vmem:[%s1633_s1 + $0x10] sm:$0xff]  }
   0x4   :  { %v1188_v3 = vld [vmem:[%s1633_s1 + $0x80] sm:$0xff]   ;;  %1013 = vmatpush3.bf16.msra.mxu0 %v1187_v2  ;;  %v1192_v7 = vld [vmem:[%s1633_s1 + $0x88] sm:$0xff]   ;;  %v1196_v11 = vld [vmem:[%s1633_s1 + $0x90] sm:$0xff]  }
   0x5   :  { %1071 = vmatpush3.bf16.msra.mxu1 %v1188_v3  ;;  %1014 = vmatprep.subr.bf16.mxu0 %v1189_v4  ;;  %v1197_v12 = vld [vmem:[%s1633_s1 + $0x58] sm:$0xff]   ;;  %v1201_v16 = vld [vmem:[%s1633_s1 + $0x60] sm:$0xff]   ;;  %v1205_v20 = vld [vmem:[%s1633_s1 + $0x68] sm:$0xff]  }
   0x6   :  { %1072 = vmatprep.subr.bf16.mxu1 %v1190_v5  ;;  %v1198_v13 = vld [vmem:[%s1633_s1 + $0xd8] sm:$0xff]   ;;  %v1202_v17 = vld [vmem:[%s1633_s1 + $0xe0] sm:$0xff]   ;;  %v1206_v21 = vld [vmem:[%s1633_s1 + $0xe8] sm:$0xff]  }
   0x7   :  { %v1199_v14 = vld [vmem:[%s1633_s1 + $0x18] sm:$0xff]   ;;  %v1203_v18 = vld [vmem:[%s1633_s1 + $0x20] sm:$0xff]   ;;  %v1207_v22 = vld [vmem:[%s1633_s1 + $0x28] sm:$0xff]  }
   0x8   :  { %1015 = vmatpush3.bf16.msra.mxu0 %v1191_v6  ;;  %v1200_v15 = vld [vmem:[%s1633_s1 + $0x98] sm:$0xff]   ;;  %v1204_v19 = vld [vmem:[%s1633_s1 + $0xa0] sm:$0xff]   ;;  %v1208_v23 = vld [vmem:[%s1633_s1 + $0xa8] sm:$0xff]  }
   0x9   :  { %1073 = vmatpush3.bf16.msra.mxu1 %v1192_v7  ;;  %1016 = vmatprep.subr.bf16.mxu0 %v1193_v8  ;;  %v1209_v24 = vld [vmem:[%s1633_s1 + $0x70] sm:$0xff]   ;;  %v1213_v28 = vld [vmem:[%s1633_s1 + $0x78] sm:$0xff]   ;;  %v1222_v36 = vld [vmem:[%s1634_s0 + $0xc] ss:$20 sps:$4 sm:$0xff]  }
   0xa   :  { %1074 = vmatprep.subr.bf16.mxu1 %v1194_v9  ;;  %v1210_v25 = vld [vmem:[%s1633_s1 + $0xf0] sm:$0xff]   ;;  %v1214_v29 = vld [vmem:[%s1633_s1 + $0xf8] sm:$0xff]   ;;  %v1223_v37 = vld [vmem:[%s1633_s1 + $0x100] sm:$0xff]   ;;  %670 = vmatprep.mubr.bf16.mxu1 %v1222_v36 }
   0xb   :  { %v1211_v26 = vld [vmem:[%s1633_s1 + $0x30] sm:$0xff]   ;;  %v1215_v30 = vld [vmem:[%s1633_s1 + $0x38] sm:$0xff]   ;;  %v1224_v38 = vld [vmem:[%s1634_s0 + $0x2c] ss:$20 sps:$4 sm:$0xff]  }
   0xc   :  { %1017 = vmatpush3.bf16.msra.mxu0 %v1195_v10  ;;  %v1212_v27 = vld [vmem:[%s1633_s1 + $0xb0] sm:$0xff]   ;;  %v1216_v31 = vld [vmem:[%s1633_s1 + $0xb8] sm:$0xff]   ;;  %v1234_v43 = vld [vmem:[%s1633_s1 + $0x108] sm:$0xff]  }
   0xd   :  { %1075 = vmatpush3.bf16.msra.mxu1 %v1196_v11  ;;  %1018 = vmatprep.subr.bf16.mxu0 %v1197_v12  ;;  %v1217_v32 = vld [vmem:[%s1634_s0] ss:$20 sps:$4 sm:$0xff]   ;;  %v1219_v33 = vld [vmem:[%s1634_s0 + $0x4] ss:$20 sps:$4 sm:$0xff]   ;;  %v1220_v35 = vld [vmem:[%s1634_s0 + $0x8] ss:$20 sps:$4 sm:$0xff]  }
   0xe   :  { %1076 = vmatprep.subr.bf16.mxu1 %v1198_v13  ;;  %581 = vmatprep.mubr.bf16.mxu0 %v1219_v33  ;;  %v1226_v39 = vld [vmem:[%s1634_s0 + $0x34] ss:$20 sps:$4 sm:$0xff]   ;;  %v1229_v41 = vld [vmem:[%s1634_s0 + $0x30] ss:$20 sps:$4 sm:$0xff]   ;;  %v1236_v47 = vld [vmem:[%s1634_s0 + $0x58] ss:$20 sps:$4 sm:$0xff]  }
   0xf   :  { %v1228_v40 = vld [vmem:[%s1634_s0 + $0x28] ss:$20 sps:$4 sm:$0xff]   ;;  %v1243_v45 = vld [vmem:[%s1633_s1 + $0x110] sm:$0xff]   ;;  %v1239_v49 = vld [vmem:[%s1634_s0 + $0x84] ss:$20 sps:$4 sm:$0xff]  }
  0x10   :  { %1019 = vmatpush3.bf16.msra.mxu0 %v1199_v14  ;;  %v1230_v42 = vld [vmem:[%s1634_s0 + $0x54] ss:$20 sps:$4 sm:$0xff]   ;;  %v1232_v44 = vld [vmem:[%s1634_s0 + $0x5c] ss:$20 sps:$4 sm:$0xff]   ;;  %v1241_v51 = vld [vmem:[%s1634_s0 + $0x78] ss:$20 sps:$4 sm:$0xff]  }
  0x11   :  { %1077 = vmatpush3.bf16.msra.mxu1 %v1200_v15  ;;  %1020 = vmatprep.subr.bf16.mxu0 %v1201_v16  ;;  %v1235_v46 = vld [vmem:[%s1634_s0 + $0x50] ss:$20 sps:$4 sm:$0xff]   ;;  %v1256_v50 = vld [vmem:[%s1633_s1 + $0x118] sm:$0xff]   ;;  %v1242_v52 = vld [vmem:[%s1634_s0 + $0x80] ss:$20 sps:$4 sm:$0xff]  }
  0x12   :  { %1078 = vmatprep.subr.bf16.mxu1 %v1202_v17  ;;  %v1237_v48 = vld [vmem:[%s1634_s0 + $0x7c] ss:$20 sps:$4 sm:$0xff]   ;;  %v1244_v53 = vld [vmem:[%s1634_s0 + $0xa4] ss:$20 sps:$4 sm:$0xff]   ;;  %v1246_v54 = vld [vmem:[%s1634_s0 + $0xac] ss:$20 sps:$4 sm:$0xff]  }
  0x13   :  { %v1248_v55 = vld [vmem:[%s1634_s0 + $0xa0] ss:$20 sps:$4 sm:$0xff]   ;;  %v1249_v56 = vld [vmem:[%s1634_s0 + $0xa8] ss:$20 sps:$4 sm:$0xff]   ;;  %v1255_v60 = vld [vmem:[%s1634_s0 + $0xd0] ss:$20 sps:$4 sm:$0xff]  }
  0x14   :  { %1021 = vmatpush3.bf16.msra.mxu0 %v1203_v18  ;;  %v1250_v57 = vld [vmem:[%s1634_s0 + $0xcc] ss:$20 sps:$4 sm:$0xff]   ;;  %v1252_v58 = vld [vmem:[%s1634_s0 + $0xd4] ss:$20 sps:$4 sm:$0xff]   ;;  %v1259_v62 = vld [vmem:[%s1634_s0 + $0xfc] ss:$20 sps:$4 sm:$0xff]  }
  0x15   :  { %1079 = vmatpush3.bf16.msra.mxu1 %v1204_v19  ;;  %1022 = vmatprep.subr.bf16.mxu0 %v1205_v20  ;;  %v1254_v59 = vld [vmem:[%s1634_s0 + $0xc8] ss:$20 sps:$4 sm:$0xff]   ;;  %v1261_v63 = vld [vmem:[%s1634_s0 + $0xf0] ss:$20 sps:$4 sm:$0xff]   ;;  %v1262_v0 = vld [vmem:[%s1634_s0 + $0xf8] ss:$20 sps:$4 sm:$0xff]  }
  0x16   :  { %1080 = vmatprep.subr.bf16.mxu1 %v1206_v21  ;;  %v1257_v61 = vld [vmem:[%s1634_s0 + $0xf4] ss:$20 sps:$4 sm:$0xff]   ;;  %v1263_v1 = vld [vmem:[%s1634_s0 + $0x10] ss:$20 sps:$4 sm:$0xff]   ;;  %v1265_v3 = vld [vmem:[%s1634_s0 + $0x38] ss:$20 sps:$4 sm:$0xff]  }
  0x17   :  { %v1264_v2 = vld [vmem:[%s1634_s0 + $0xb0] ss:$20 sps:$4 sm:$0xff]   ;;  %v1266_v4 = vld [vmem:[%s1634_s0 + $0xd8] ss:$20 sps:$4 sm:$0xff]   ;;  %v1267_v5 = vld [vmem:[%s1634_s0 + $0x60] ss:$20 sps:$4 sm:$0xff]  }
  0x18   :  { %1023 = vmatpush3.bf16.msra.mxu0 %v1207_v22  ;;  %v1268_v6 = vld [vmem:[%s1634_s0 + $0x100] ss:$20 sps:$4 sm:$0xff]   ;;  %v1269_v7 = vld [vmem:[%s1634_s0 + $0x88] ss:$20 sps:$4 sm:$0xff]  }
  0x19   :  { %1081 = vmatpush3.bf16.msra.mxu1 %v1208_v23  ;;  %1024 = vmatprep.subr.bf16.mxu0 %v1209_v24  ;;  %v1537_v9 = vld [vmem:[%s1635_s2] ss:$0 sm:$0xff] }
  0x1a   :  { %1082 = vmatprep.subr.bf16.mxu1 %v1210_v25 }
  0x1c   :  { %1025 = vmatpush3.bf16.msra.mxu0 %v1211_v26 }
  0x1d   :  { %1083 = vmatpush3.bf16.msra.mxu1 %v1212_v27  ;;  %1026 = vmatprep.subr.bf16.mxu0 %v1213_v28 }
  0x1e   :  { %1084 = vmatprep.subr.bf16.mxu1 %v1214_v29 }
  0x20   :  { %1027 = vmatpush3.bf16.msra.mxu0 %v1215_v30 }
  0x21   :  { %1085 = vmatpush3.bf16.msra.mxu1 %v1216_v31  ;;  %1139 = vmatprep.subr.bf16.mxu0 %v1270_v34 }
  0x22   :  { %1175 = vmatprep.subr.bf16.mxu1 %v1270_v34 }
  0x23   :  { %582 = vmatmul.mubr.bf16.vlgmr.msra.gmra.mrb[0].mxu0 %v1217_v32 }
  0x24   :  { %671 = vmatmul.mubr.bf16.vlgmr.msra.gmra.mrb[0].mxu1 %v1220_v35  ;;  %1140 = vmatpush3.bf16.msra.mxu0 %v1223_v37 }
  0x25   :  { %589 = vmatprep.mubr.bf16.mxu0 %v1224_v38  ;;  %1179 = vmatpush3.bf16.msra.mxu1 %v1223_v37 }
  0x26   :  { %678 = vmatprep.mubr.bf16.mxu1 %v1226_v39  ;;  %1141 = vmatprep.subr.bf16.mxu0 %v1270_v34 }
  0x27   :  { %1176 = vmatprep.subr.bf16.mxu1 %v1270_v34 }
  0x28   :  { %1142 = vmatpush3.bf16.msra.mxu0 %v1234_v43 }
  0x29   :  { %1180 = vmatpush3.bf16.msra.mxu1 %v1234_v43  ;;  %1143 = vmatprep.subr.bf16.mxu0 %v1270_v34 }
  0x2a   :  { %1177 = vmatprep.subr.bf16.mxu1 %v1270_v34 }
  0x2b   :  { %590 = vmatmul.mubr.bf16.gmra.mrb[4].mxu0 %v1228_v40 }
  0x2c   :  { %679 = vmatmul.mubr.bf16.gmra.mrb[4].mxu1 %v1229_v41  ;;  %597 = vmatprep.mubr.bf16.mxu0 %v1230_v42 }
  0x2d   :  { %686 = vmatprep.mubr.bf16.mxu1 %v1232_v44  ;;  %1144 = vmatpush3.bf16.msra.mxu0 %v1243_v45 }
  0x2e   :  { %1181 = vmatpush3.bf16.msra.mxu1 %v1243_v45  ;;  %1145 = vmatprep.subr.bf16.mxu0 %v1270_v34 }
  0x2f   :  { %1178 = vmatprep.subr.bf16.mxu1 %v1270_v34 }
  0x31   :  { %1146 = vmatpush3.bf16.msra.mxu0 %v1256_v50 }
  0x32   :  { %1182 = vmatpush3.bf16.msra.mxu1 %v1256_v50 }
  0x33   :  { %598 = vmatmul.mubr.bf16.gmra.mrb[8].mxu0 %v1235_v46 }
  0x34   :  { %687 = vmatmul.mubr.bf16.gmra.mrb[8].mxu1 %v1236_v47  ;;  %605 = vmatprep.mubr.bf16.mxu0 %v1237_v48 }
  0x35   :  { %694 = vmatprep.mubr.bf16.mxu1 %v1239_v49 }
  0x3b   :  { %606 = vmatmul.mubr.bf16.gmra.mrb[12].mxu0 %v1241_v51 }
  0x3c   :  { %695 = vmatmul.mubr.bf16.gmra.mrb[12].mxu1 %v1242_v52  ;;  %613 = vmatprep.mubr.bf16.mxu0 %v1244_v53 }
  0x3d   :  { %702 = vmatprep.mubr.bf16.mxu1 %v1246_v54 }
  0x43   :  { %614 = vmatmul.mubr.bf16.gmra.mrb[16].mxu0 %v1248_v55 }
  0x44   :  { %703 = vmatmul.mubr.bf16.gmra.mrb[16].mxu1 %v1249_v56  ;;  %621 = vmatprep.mubr.bf16.mxu0 %v1250_v57 }
  0x45   :  { %710 = vmatprep.mubr.bf16.mxu1 %v1252_v58 }
  0x4b   :  { %622 = vmatmul.mubr.bf16.gmra.mrb[20].mxu0 %v1254_v59 }
  0x4c   :  { %711 = vmatmul.mubr.bf16.gmra.mrb[20].mxu1 %v1255_v60  ;;  %629 = vmatprep.mubr.bf16.mxu0 %v1257_v61 }
  0x4d   :  { %718 = vmatprep.mubr.bf16.mxu1 %v1259_v62 }
  0x53   :  { %630 = vmatmul.mubr.bf16.gmra.mrb[24].mxu0 %v1261_v63 }
  0x54   :  { %719 = vmatmul.mubr.bf16.gmra.mrb[24].mxu1 %v1262_v0  ;;  %1147 = vmatprep.mubr.msk.bf16.mxu0 %vm1271_vm0, %v1270_v34 }
  0x55   :  { %1163 = vmatprep.mubr.msk.bf16.mxu1 %vm1271_vm0, %v1270_v34 }
  0x5b   :  { %1148 = vmatmul.mubr.msk.bf16.vlgmr.msra.gmra.mrb[28].mxu0 %vm527_vm1, %v1263_v1 }
  0x5c   :  { %1164 = vmatmul.mubr.msk.bf16.vlgmr.msra.gmra.mrb[28].mxu1 %vm527_vm1, %v1264_v2  ;;  %1151 = vmatprep.mubr.msk.bf16.mxu0 %vm1271_vm0, %v1270_v34 }
  0x5d   :  { %1167 = vmatprep.mubr.msk.bf16.mxu1 %vm1271_vm0, %v1270_v34 }
  0x63   :  { %1152 = vmatmul.mubr.msk.bf16.gmra.mrb[32].mxu0 %vm527_vm1, %v1265_v3 }
  0x64   :  { %1168 = vmatmul.mubr.msk.bf16.gmra.mrb[32].mxu1 %vm527_vm1, %v1266_v4  ;;  %1155 = vmatprep.mubr.msk.bf16.mxu0 %vm1271_vm0, %v1270_v34 }
  0x65   :  { %1171 = vmatprep.mubr.msk.bf16.mxu1 %vm1271_vm0, %v1270_v34 }
  0x6b   :  { %1156 = vmatmul.mubr.msk.bf16.gmra.mrb[36].mxu0 %vm527_vm1, %v1267_v5 }
  0x6c   :  { %1172 = vmatmul.mubr.msk.bf16.gmra.mrb[36].mxu1 %vm527_vm1, %v1268_v6  ;;  %1159 = vmatprep.mubr.msk.bf16.mxu0 %vm1271_vm0, %v1270_v34 }
  0x73   :  { %1160 = vmatmul.mubr.msk.bf16.gmra.mrb[40].mxu0 %vm527_vm1, %v1269_v7 }
  0xf6   :  { %v1028_v8 = vpop.f32.mrb[0].mxu0 }
  0xf7   :  { %v1029_v10 = vpop.f32.mrb[1].mxu0  ;;  %v1086_v11 = vpop.f32.mrb[0].mxu1 }
  0xf8   :  { %v1030_v12 = vadd.f32 %v1029_v10, %v1028_v8  ;;  %v1031_v13 = vpop.f32.mrb[2].mxu0  ;;  %v1087_v14 = vpop.f32.mrb[1].mxu1 }
  0xf9   :  { %v1032_v15 = vpop.f32.mrb[3].mxu0  ;;  %v1088_v16 = vadd.f32 %v1087_v14, %v1086_v11  ;;  %v1089_v17 = vpop.f32.mrb[2].mxu1 }
  0xfa   :  { %v584_v18 = vadd.f32 %v1030_v12, %v1537_v9  ;;  %v1033_v19 = vadd.f32 %v1032_v15, %v1031_v13  ;;  %v1090_v20 = vpop.f32.mrb[3].mxu1 }
  0xfb   :  { %v1091_v21 = vadd.f32 %v1090_v20, %v1089_v17 }
  0xfc   :  { %v587_v22 = vadd.f32 %v1033_v19, %v1537_v9  ;;  %v1541_v23 = vadd.f32 %v1088_v16, %v584_v18 }
  0xfe   :  { %v1034_v24 = vpop.f32.mrb[4].mxu0  ;;  %v1543_v25 = vadd.f32 %v1091_v21, %v587_v22 }
  0xff   :  { %v1035_v26 = vpop.f32.mrb[5].mxu0  ;;  %v1092_v27 = vpop.f32.mrb[4].mxu1 }
 0x100   :  { %v1036_v28 = vadd.f32 %v1035_v26, %v1034_v24  ;;  %v1037_v29 = vpop.f32.mrb[6].mxu0  ;;  %v1093_v30 = vpop.f32.mrb[5].mxu1 }
 0x101   :  { %v1038_v31 = vpop.f32.mrb[7].mxu0  ;;  %v1094_v32 = vadd.f32 %v1093_v30, %v1092_v27  ;;  %v1095_v33 = vpop.f32.mrb[6].mxu1 }
 0x102   :  { %v592_v34 = vadd.f32 %v1036_v28, %v1537_v9  ;;  %v1039_v35 = vadd.f32 %v1038_v31, %v1037_v29  ;;  %v1096_v36 = vpop.f32.mrb[7].mxu1 }
 0x103   :  { %v1097_v37 = vadd.f32 %v1096_v36, %v1095_v33 }
 0x104   :  { %v595_v38 = vadd.f32 %v1039_v35, %v1537_v9  ;;  %v1547_v39 = vadd.f32 %v1094_v32, %v592_v34 }
 0x106   :  { %v1040_v40 = vpop.f32.mrb[8].mxu0  ;;  %v1549_v41 = vadd.f32 %v1097_v37, %v595_v38 }
 0x107   :  { %v1041_v42 = vpop.f32.mrb[9].mxu0  ;;  %v1098_v43 = vpop.f32.mrb[8].mxu1 }
 0x108   :  { %v1042_v44 = vadd.f32 %v1041_v42, %v1040_v40  ;;  %v1043_v45 = vpop.f32.mrb[10].mxu0  ;;  %v1099_v46 = vpop.f32.mrb[9].mxu1 }
 0x109   :  { %v1044_v47 = vpop.f32.mrb[11].mxu0  ;;  %v1100_v48 = vadd.f32 %v1099_v46, %v1098_v43  ;;  %v1101_v49 = vpop.f32.mrb[10].mxu1 }
 0x10a   :  { %v600_v50 = vadd.f32 %v1042_v44, %v1537_v9  ;;  %v1045_v51 = vadd.f32 %v1044_v47, %v1043_v45  ;;  %v1102_v52 = vpop.f32.mrb[11].mxu1 }
 0x10b   :  { %v1103_v53 = vadd.f32 %v1102_v52, %v1101_v49 }
 0x10c   :  { %v603_v54 = vadd.f32 %v1045_v51, %v1537_v9  ;;  %v1553_v55 = vadd.f32 %v1100_v48, %v600_v50 }
 0x10e   :  { %v1046_v56 = vpop.f32.mrb[12].mxu0  ;;  %v1555_v57 = vadd.f32 %v1103_v53, %v603_v54 }
 0x10f   :  { %v1047_v58 = vpop.f32.mrb[13].mxu0  ;;  %v1104_v59 = vpop.f32.mrb[12].mxu1 }
 0x110   :  { %v1048_v60 = vadd.f32 %v1047_v58, %v1046_v56  ;;  %v1049_v61 = vpop.f32.mrb[14].mxu0  ;;  %v1105_v62 = vpop.f32.mrb[13].mxu1 }
 0x111   :  { %v1050_v63 = vpop.f32.mrb[15].mxu0  ;;  %v1106_v0 = vadd.f32 %v1105_v62, %v1104_v59  ;;  %v1107_v1 = vpop.f32.mrb[14].mxu1 }
 0x112   :  { %v608_v2 = vadd.f32 %v1048_v60, %v1537_v9  ;;  %v1051_v3 = vadd.f32 %v1050_v63, %v1049_v61  ;;  %v1108_v4 = vpop.f32.mrb[15].mxu1 }
 0x113   :  { %v1109_v5 = vadd.f32 %v1108_v4, %v1107_v1 }
 0x114   :  { %v611_v6 = vadd.f32 %v1051_v3, %v1537_v9  ;;  %v1559_v7 = vadd.f32 %v1106_v0, %v608_v2 }
 0x116   :  { %v1052_v8 = vpop.f32.mrb[16].mxu0  ;;  %v1561_v10 = vadd.f32 %v1109_v5, %v611_v6 }
 0x117   :  { %v1053_v11 = vpop.f32.mrb[17].mxu0  ;;  %v1110_v12 = vpop.f32.mrb[16].mxu1 }
 0x118   :  { %v1054_v13 = vadd.f32 %v1053_v11, %v1052_v8  ;;  %v1055_v14 = vpop.f32.mrb[18].mxu0  ;;  %v1111_v15 = vpop.f32.mrb[17].mxu1 }
 0x119   :  { %v1056_v16 = vpop.f32.mrb[19].mxu0  ;;  %v1112_v17 = vadd.f32 %v1111_v15, %v1110_v12  ;;  %v1113_v18 = vpop.f32.mrb[18].mxu1 }
 0x11a   :  { %v616_v19 = vadd.f32 %v1054_v13, %v1537_v9  ;;  %v1057_v20 = vadd.f32 %v1056_v16, %v1055_v14  ;;  %v1114_v21 = vpop.f32.mrb[19].mxu1 }
 0x11b   :  { %v1115_v22 = vadd.f32 %v1114_v21, %v1113_v18 }
 0x11c   :  { %v619_v24 = vadd.f32 %v1057_v20, %v1537_v9  ;;  %v705_v26 = vadd.f32 %v1112_v17, %v616_v19 }
 0x11e   :  { %v1058_v27 = vpop.f32.mrb[20].mxu0  ;;  %v708_v28 = vadd.f32 %v1115_v22, %v619_v24 }
 0x11f   :  { %v1059_v29 = vpop.f32.mrb[21].mxu0  ;;  %v1116_v30 = vpop.f32.mrb[20].mxu1 }
 0x120   :  { %v1060_v31 = vadd.f32 %v1059_v29, %v1058_v27  ;;  %v1061_v32 = vpop.f32.mrb[22].mxu0  ;;  %v1117_v33 = vpop.f32.mrb[21].mxu1 }
 0x121   :  { %v1062_v34 = vpop.f32.mrb[23].mxu0  ;;  %v1118_v35 = vadd.f32 %v1117_v33, %v1116_v30  ;;  %v1119_v36 = vpop.f32.mrb[22].mxu1 }
 0x122   :  { %v624_v37 = vadd.f32 %v1060_v31, %v1537_v9  ;;  %v1063_v38 = vadd.f32 %v1062_v34, %v1061_v32  ;;  %v1120_v40 = vpop.f32.mrb[23].mxu1 }
 0x123   :  { %v1121_v42 = vadd.f32 %v1120_v40, %v1119_v36 }
 0x124   :  { %v627_v43 = vadd.f32 %v1063_v38, %v1537_v9  ;;  %v713_v44 = vadd.f32 %v1118_v35, %v624_v37 }
 0x126   :  { %v1064_v45 = vpop.f32.mrb[24].mxu0  ;;  %v716_v46 = vadd.f32 %v1121_v42, %v627_v43 }
 0x127   :  { %v1065_v47 = vpop.f32.mrb[25].mxu0  ;;  %v1122_v48 = vpop.f32.mrb[24].mxu1 }
 0x128   :  { %v1066_v49 = vadd.f32 %v1065_v47, %v1064_v45  ;;  %v1067_v50 = vpop.f32.mrb[26].mxu0  ;;  %v1123_v51 = vpop.f32.mrb[25].mxu1 }
 0x129   :  { %v1068_v52 = vpop.f32.mrb[27].mxu0  ;;  %v1124_v53 = vadd.f32 %v1123_v51, %v1122_v48  ;;  %v1125_v54 = vpop.f32.mrb[26].mxu1 }
 0x12a   :  { %v632_v56 = vadd.f32 %v1066_v49, %v1537_v9  ;;  %v1069_v58 = vadd.f32 %v1068_v52, %v1067_v50  ;;  %v1126_v59 = vpop.f32.mrb[27].mxu1 }
 0x12b   :  { %v1127_v60 = vadd.f32 %v1126_v59, %v1125_v54 }
 0x12c   :  { %v635_v61 = vadd.f32 %v1069_v58, %v1537_v9  ;;  %v721_v62 = vadd.f32 %v1124_v53, %v632_v56 }
 0x12e   :  { %v761_v63 = vpop.f32.mrb[28].mxu0  ;;  %v724_v0 = vadd.f32 %v1127_v60, %v635_v61 }
 0x12f   :  { %v762_v1 = vadd.f32 %v761_v63, %v1541_v23  ;;  %v793_v2 = vpop.f32.mrb[28].mxu1  ;;  %v1149_v3 = vpop.f32.mrb[29].mxu0 }
 0x130   :  { %v794_v4 = vadd.f32 %v793_v2, %v705_v26  ;;  %v1165_v5 = vpop.f32.mrb[29].mxu1  ;;  %v764_v6 = vpop.f32.mrb[30].mxu0 }
 0x131   :  { %v816_v8 = vmax.f32 %v762_v1, 0.0  ;;  %v765_v11 = vadd.f32 %v764_v6, %v1543_v25  ;;  %v796_v12 = vpop.f32.mrb[30].mxu1  ;;  %v1150_v13 = vpop.f32.mrb[31].mxu0 }
 0x132   :  { %v824_v14 = vmax.f32 %v794_v4, 0.0  ;;  %v797_v15 = vadd.f32 %v796_v12, %v708_v28  ;;  %v1166_v16 = vpop.f32.mrb[31].mxu1 }
 0x133   :  { %v998_v9 = vpack.c.bf16 %v816_v8, %v816_v8  ;;  %v817_v17 = vmax.f32 %v765_v11, 0.0 }
 0x134   :  { %v1006_v18 = vpack.c.bf16 %v824_v14, %v824_v14  ;;  %v825_v19 = vmax.f32 %v797_v15, 0.0 }
 0x135   :  { %887 = vst.msk [vmem:[%s1636_s3] sm:$0xf] %vm886_vm2, %v998_v9  ;;  %v999_v23 = vpack.c.bf16 %v817_v17, %v817_v17 }
 0x136   :  { %895 = vst.msk [vmem:[%s1636_s3 + $0x20] sm:$0xf] %vm886_vm2, %v1006_v18  ;;  %v1007_v25 = vpack.c.bf16 %v825_v19, %v825_v19  ;;  %v769_v20 = vpop.f32.mrb[32].mxu0 }
 0x137   :  { %888 = vst.msk [vmem:[%s1636_s3 + $0x4] sm:$0xf] %vm886_vm2, %v999_v23  ;;  %v770_v21 = vadd.f32 %v769_v20, %v1547_v39  ;;  %v801_v22 = vpop.f32.mrb[32].mxu1  ;;  %v1153_v24 = vpop.f32.mrb[33].mxu0 }
 0x138   :  { %896 = vst.msk [vmem:[%s1636_s3 + $0x24] sm:$0xf] %vm886_vm2, %v1007_v25  ;;  %v802_v26 = vadd.f32 %v801_v22, %v713_v44  ;;  %v1169_v27 = vpop.f32.mrb[33].mxu1  ;;  %v772_v28 = vpop.f32.mrb[34].mxu0 }
 0x139   :  { %v818_v29 = vmax.f32 %v770_v21, 0.0  ;;  %v773_v30 = vadd.f32 %v772_v28, %v1549_v41  ;;  %v804_v31 = vpop.f32.mrb[34].mxu1  ;;  %v1154_v32 = vpop.f32.mrb[35].mxu0 }
 0x13a   :  { %v826_v33 = vmax.f32 %v802_v26, 0.0  ;;  %v805_v34 = vadd.f32 %v804_v31, %v716_v46  ;;  %v1170_v35 = vpop.f32.mrb[35].mxu1 }
 0x13b   :  { %v1000_v36 = vpack.c.bf16 %v818_v29, %v818_v29  ;;  %v819_v39 = vmax.f32 %v773_v30, 0.0 }
 0x13c   :  { %v1008_v37 = vpack.c.bf16 %v826_v33, %v826_v33  ;;  %v827_v38 = vmax.f32 %v805_v34, 0.0 }
 0x13d   :  { %889 = vst.msk [vmem:[%s1636_s3 + $0x8] sm:$0xf] %vm886_vm2, %v1000_v36  ;;  %v1001_v40 = vpack.c.bf16 %v819_v39, %v819_v39 }
 0x13e   :  { %897 = vst.msk [vmem:[%s1636_s3 + $0x28] sm:$0xf] %vm886_vm2, %v1008_v37  ;;  %v1009_v41 = vpack.c.bf16 %v827_v38, %v827_v38  ;;  %v777_v42 = vpop.f32.mrb[36].mxu0 }
 0x13f   :  { %890 = vst.msk [vmem:[%s1636_s3 + $0xc] sm:$0xf] %vm886_vm2, %v1001_v40  ;;  %v778_v43 = vadd.f32 %v777_v42, %v1553_v55  ;;  %v809_v44 = vpop.f32.mrb[36].mxu1  ;;  %v1157_v45 = vpop.f32.mrb[37].mxu0 }
 0x140   :  { %898 = vst.msk [vmem:[%s1636_s3 + $0x2c] sm:$0xf] %vm886_vm2, %v1009_v41  ;;  %v810_v46 = vadd.f32 %v809_v44, %v721_v62  ;;  %v1173_v47 = vpop.f32.mrb[37].mxu1  ;;  %v780_v48 = vpop.f32.mrb[38].mxu0 }
 0x141   :  { %v820_v49 = vmax.f32 %v778_v43, 0.0  ;;  %v781_v50 = vadd.f32 %v780_v48, %v1555_v57  ;;  %v812_v51 = vpop.f32.mrb[38].mxu1  ;;  %v1158_v52 = vpop.f32.mrb[39].mxu0 }
 0x142   :  { %v828_v53 = vmax.f32 %v810_v46, 0.0  ;;  %v813_v54 = vadd.f32 %v812_v51, %v724_v0  ;;  %v1174_v56 = vpop.f32.mrb[39].mxu1 }
 0x143   :  { %v1002_v58 = vpack.c.bf16 %v820_v49, %v820_v49  ;;  %v821_v55 = vmax.f32 %v781_v50, 0.0 }
 0x144   :  { %v1010_v59 = vpack.c.bf16 %v828_v53, %v828_v53  ;;  %v829_v60 = vmax.f32 %v813_v54, 0.0 }
 0x145   :  { %891 = vst.msk [vmem:[%s1636_s3 + $0x10] sm:$0xf] %vm886_vm2, %v1002_v58  ;;  %v1003_v61 = vpack.c.bf16 %v821_v55, %v821_v55 }
 0x146   :  { %899 = vst.msk [vmem:[%s1636_s3 + $0x30] sm:$0xf] %vm886_vm2, %v1010_v59  ;;  %v1011_v57 = vpack.c.bf16 %v829_v60, %v829_v60  ;;  %v785_v62 = vpop.f32.mrb[40].mxu0 }
 0x147   :  { %892 = vst.msk [vmem:[%s1636_s3 + $0x14] sm:$0xf] %vm886_vm2, %v1003_v61  ;;  %v786_v63 = vadd.f32 %v785_v62, %v1559_v7  ;;  %v1161_v0 = vpop.f32.mrb[41].mxu0 }
 0x148   :  { %900 = vst.msk [vmem:[%s1636_s3 + $0x34] sm:$0xf] %vm886_vm2, %v1011_v57  ;;  %v788_v1 = vpop.f32.mrb[42].mxu0 }
 0x149   :  { %v822_v2 = vmax.f32 %v786_v63, 0.0  ;;  %v789_v3 = vadd.f32 %v788_v1, %v1561_v10  ;;  %v1162_v4 = vpop.f32.mrb[43].mxu0 }
 0x14b   :  { %v1004_v5 = vpack.c.bf16 %v822_v2, %v822_v2  ;;  %v823_v6 = vmax.f32 %v789_v3, 0.0 }
 0x14d   :  { %893 = vst.msk [vmem:[%s1636_s3 + $0x18] sm:$0xf] %vm886_vm2, %v1004_v5  ;;  %v1005_v8 = vpack.c.bf16 %v823_v6, %v823_v6 }
 0x14f   :  { %894 = vst.msk [vmem:[%s1636_s3 + $0x1c] sm:$0xf] %vm886_vm2, %v1005_v8 }

// kernel: forward.7
= control target key start
LH: loop header
LB: loop body
LE: loop exit
PB: predicated region body
PF: predicated region fallthrough
CT: control target
= control target key end

     0   :  { %vm4902_vm0 = vcmask 523264   ;;  %vm6089_vm1 = vcmask 7168   ;;  %s10732_s1 = inlined_call_operand.vmem [shape: bf16[3136,512], index: 1, kind: input, shape index: {}]   ;;  %s10733_s0 = inlined_call_operand.vmem [shape: bf16[16,3136], index: 0, kind: input, shape index: {}]   ;;  %s10734_s4 = inlined_call_operand.<no memory space> [shape: f32[1,1], index: 4, kind: input, shape index: {}]   ;;  %s10735_s2 = inlined_call_operand.vmem [shape: f32[1,512], index: 2, kind: input, shape index: {}]   ;;  %s10736_s3 = inlined_call_operand.vmem [shape: f32[1,512], index: 3, kind: input, shape index: {}]   ;;  %s10737_s5 = inlined_call_operand.vmem [shape: f32[16,512], index: 5, kind: output, shape index: {0}]   ;;  %s10738_s6 = inlined_call_operand.vmem [shape: f32[16,1], index: 6, kind: output, shape index: {1}]  }
   0x1   :  { %v7017_v0 = vld [vmem:[%s10732_s1 + $0x4] ss:$16 sps:$4 sm:$0xff]   ;;  %v7019_v1 = vld [vmem:[%s10732_s1 + $0xc] ss:$16 sps:$4 sm:$0xff]   ;;  %v7021_v2 = vld [vmem:[%s10732_s1] ss:$16 sps:$4 sm:$0xff]  }
   0x2   :  { %4906 = vmatprep.subr.bf16.mxu0 %v7017_v0  ;;  %v7022_v3 = vld [vmem:[%s10732_s1 + $0x8] ss:$16 sps:$4 sm:$0xff]   ;;  %5465 = vmatprep.subr.bf16.mxu1 %v7019_v1  ;;  %v7023_v4 = vld [vmem:[%s10732_s1 + $0x24] ss:$16 sps:$4 sm:$0xff]   ;;  %v7025_v5 = vld [vmem:[%s10732_s1 + $0x2c] ss:$16 sps:$4 sm:$0xff]  }
   0x3   :  { %4907 = vmatpush1.bf16.msra.mxu0 %v7021_v2  ;;  %5466 = vmatpush1.bf16.msra.mxu1 %v7022_v3  ;;  %v7027_v6 = vld [vmem:[%s10732_s1 + $0x20] ss:$16 sps:$4 sm:$0xff]   ;;  %v7028_v7 = vld [vmem:[%s10732_s1 + $0x28] ss:$16 sps:$4 sm:$0xff]   ;;  %v7029_v8 = vld [vmem:[%s10732_s1 + $0x44] ss:$16 sps:$4 sm:$0xff]  }
   0x4   :  { %4908 = vmatprep.subr.bf16.mxu0 %v7023_v4  ;;  %5467 = vmatprep.subr.bf16.mxu1 %v7025_v5  ;;  %v7031_v9 = vld [vmem:[%s10732_s1 + $0x4c] ss:$16 sps:$4 sm:$0xff]   ;;  %v7033_v10 = vld [vmem:[%s10732_s1 + $0x40] ss:$16 sps:$4 sm:$0xff]   ;;  %v7034_v11 = vld [vmem:[%s10732_s1 + $0x48] ss:$16 sps:$4 sm:$0xff]  }
   0x5   :  { %v7035_v12 = vld [vmem:[%s10732_s1 + $0x64] ss:$16 sps:$4 sm:$0xff]   ;;  %v7037_v13 = vld [vmem:[%s10732_s1 + $0x6c] ss:$16 sps:$4 sm:$0xff]   ;;  %v7039_v14 = vld [vmem:[%s10732_s1 + $0x60] ss:$16 sps:$4 sm:$0xff]  }
   0x6   :  { %v7040_v15 = vld [vmem:[%s10732_s1 + $0x68] ss:$16 sps:$4 sm:$0xff]   ;;  %v7041_v16 = vld [vmem:[%s10732_s1 + $0x84] ss:$16 sps:$4 sm:$0xff]   ;;  %v7043_v17 = vld [vmem:[%s10732_s1 + $0x8c] ss:$16 sps:$4 sm:$0xff]  }
   0x7   :  { %4909 = vmatpush1.bf16.msra.mxu0 %v7027_v6  ;;  %5468 = vmatpush1.bf16.msra.mxu1 %v7028_v7  ;;  %v7045_v18 = vld [vmem:[%s10732_s1 + $0x80] ss:$16 sps:$4 sm:$0xff]   ;;  %v7046_v19 = vld [vmem:[%s10732_s1 + $0x88] ss:$16 sps:$4 sm:$0xff]   ;;  %v7047_v20 = vld [vmem:[%s10732_s1 + $0xa4] ss:$16 sps:$4 sm:$0xff]  }
   0x8   :  { %4910 = vmatprep.subr.bf16.mxu0 %v7029_v8  ;;  %5469 = vmatprep.subr.bf16.mxu1 %v7031_v9  ;;  %v7049_v21 = vld [vmem:[%s10732_s1 + $0xac] ss:$16 sps:$4 sm:$0xff]   ;;  %v7051_v22 = vld [vmem:[%s10732_s1 + $0xa0] ss:$16 sps:$4 sm:$0xff]   ;;  %v7052_v23 = vld [vmem:[%s10732_s1 + $0xa8] ss:$16 sps:$4 sm:$0xff]  }
   0x9   :  { %v7053_v24 = vld [vmem:[%s10732_s1 + $0xc4] ss:$16 sps:$4 sm:$0xff]   ;;  %v7055_v25 = vld [vmem:[%s10732_s1 + $0xcc] ss:$16 sps:$4 sm:$0xff]   ;;  %v7057_v26 = vld [vmem:[%s10732_s1 + $0xc0] ss:$16 sps:$4 sm:$0xff]  }
   0xa   :  { %v7058_v27 = vld [vmem:[%s10732_s1 + $0xc8] ss:$16 sps:$4 sm:$0xff]   ;;  %v7059_v28 = vld [vmem:[%s10732_s1 + $0xe4] ss:$16 sps:$4 sm:$0xff]   ;;  %v7061_v29 = vld [vmem:[%s10732_s1 + $0xec] ss:$16 sps:$4 sm:$0xff]  }
   0xb   :  { %4911 = vmatpush1.bf16.msra.mxu0 %v7033_v10  ;;  %5470 = vmatpush1.bf16.msra.mxu1 %v7034_v11  ;;  %v7063_v30 = vld [vmem:[%s10732_s1 + $0xe0] ss:$16 sps:$4 sm:$0xff]   ;;  %v7064_v31 = vld [vmem:[%s10732_s1 + $0xe8] ss:$16 sps:$4 sm:$0xff]   ;;  %v7065_v32 = vld [vmem:[%s10732_s1 + $0x104] ss:$16 sps:$4 sm:$0xff]  }
   0xc   :  { %4912 = vmatprep.subr.bf16.mxu0 %v7035_v12  ;;  %5471 = vmatprep.subr.bf16.mxu1 %v7037_v13  ;;  %v7067_v33 = vld [vmem:[%s10732_s1 + $0x10c] ss:$16 sps:$4 sm:$0xff]   ;;  %v7069_v34 = vld [vmem:[%s10732_s1 + $0x100] ss:$16 sps:$4 sm:$0xff]   ;;  %v7070_v35 = vld [vmem:[%s10732_s1 + $0x108] ss:$16 sps:$4 sm:$0xff]  }
   0xd   :  { %v7071_v36 = vld [vmem:[%s10732_s1 + $0x124] ss:$16 sps:$4 sm:$0xff]   ;;  %v7073_v37 = vld [vmem:[%s10732_s1 + $0x12c] ss:$16 sps:$4 sm:$0xff]   ;;  %v7075_v38 = vld [vmem:[%s10732_s1 + $0x120] ss:$16 sps:$4 sm:$0xff]  }
   0xe   :  { %v7076_v39 = vld [vmem:[%s10732_s1 + $0x128] ss:$16 sps:$4 sm:$0xff]   ;;  %v7077_v40 = vld [vmem:[%s10732_s1 + $0x144] ss:$16 sps:$4 sm:$0xff]   ;;  %v7079_v41 = vld [vmem:[%s10732_s1 + $0x14c] ss:$16 sps:$4 sm:$0xff]  }
   0xf   :  { %4913 = vmatpush1.bf16.msra.mxu0 %v7039_v14  ;;  %5472 = vmatpush1.bf16.msra.mxu1 %v7040_v15  ;;  %v7081_v42 = vld [vmem:[%s10732_s1 + $0x140] ss:$16 sps:$4 sm:$0xff]   ;;  %v7082_v43 = vld [vmem:[%s10732_s1 + $0x148] ss:$16 sps:$4 sm:$0xff]   ;;  %v7083_v44 = vld [vmem:[%s10732_s1 + $0x164] ss:$16 sps:$4 sm:$0xff]  }
  0x10   :  { %4914 = vmatprep.subr.bf16.mxu0 %v7041_v16  ;;  %5473 = vmatprep.subr.bf16.mxu1 %v7043_v17  ;;  %v7085_v45 = vld [vmem:[%s10732_s1 + $0x16c] ss:$16 sps:$4 sm:$0xff]   ;;  %v7087_v46 = vld [vmem:[%s10732_s1 + $0x160] ss:$16 sps:$4 sm:$0xff]   ;;  %v7088_v47 = vld [vmem:[%s10732_s1 + $0x168] ss:$16 sps:$4 sm:$0xff]  }
  0x11   :  { %v7115_v48 = vld [vmem:[%s10733_s0 + $0x4] ss:$100 sps:$4 sm:$0xff]   ;;  %v7091_v50 = vld [vmem:[%s10732_s1 + $0x18c] ss:$16 sps:$4 sm:$0xff]   ;;  %v7093_v51 = vld [vmem:[%s10732_s1 + $0x180] ss:$16 sps:$4 sm:$0xff]  }
  0x12   :  { %v7089_v49 = vld [vmem:[%s10732_s1 + $0x184] ss:$16 sps:$4 sm:$0xff]   ;;  %4938 = vmatprep.mubr.bf16.mxu0 %v7115_v48  ;;  %5497 = vmatprep.mubr.bf16.mxu1 %v7115_v48  ;;  %v7094_v52 = vld [vmem:[%s10732_s1 + $0x188] ss:$16 sps:$4 sm:$0xff]   ;;  %v7097_v54 = vld [vmem:[%s10732_s1 + $0x1ac] ss:$16 sps:$4 sm:$0xff]  }
  0x13   :  { %4915 = vmatpush1.bf16.msra.mxu0 %v7045_v18  ;;  %5474 = vmatpush1.bf16.msra.mxu1 %v7046_v19  ;;  %v7095_v53 = vld [vmem:[%s10732_s1 + $0x1a4] ss:$16 sps:$4 sm:$0xff]   ;;  %v7099_v55 = vld [vmem:[%s10732_s1 + $0x1a0] ss:$16 sps:$4 sm:$0xff]   ;;  %v7100_v56 = vld [vmem:[%s10732_s1 + $0x1a8] ss:$16 sps:$4 sm:$0xff]  }
  0x14   :  { %4916 = vmatprep.subr.bf16.mxu0 %v7047_v20  ;;  %5475 = vmatprep.subr.bf16.mxu1 %v7049_v21  ;;  %v7101_v57 = vld [vmem:[%s10732_s1 + $0x1c4] ss:$16 sps:$4 sm:$0xff]   ;;  %v7103_v58 = vld [vmem:[%s10732_s1 + $0x1cc] ss:$16 sps:$4 sm:$0xff]   ;;  %v7105_v59 = vld [vmem:[%s10732_s1 + $0x1c0] ss:$16 sps:$4 sm:$0xff]  }
  0x15   :  { %v7106_v60 = vld [vmem:[%s10732_s1 + $0x1c8] ss:$16 sps:$4 sm:$0xff]   ;;  %v7107_v61 = vld [vmem:[%s10732_s1 + $0x1e4] ss:$16 sps:$4 sm:$0xff]   ;;  %v7109_v62 = vld [vmem:[%s10732_s1 + $0x1ec] ss:$16 sps:$4 sm:$0xff]  }
  0x16   :  { %v7111_v63 = vld [vmem:[%s10732_s1 + $0x1e0] ss:$16 sps:$4 sm:$0xff]   ;;  %v7112_v0 = vld [vmem:[%s10732_s1 + $0x1e8] ss:$16 sps:$4 sm:$0xff]   ;;  %v7118_v1 = vld [vmem:[%s10732_s1 + $0x204] ss:$16 sps:$4 sm:$0xff]  }
  0x17   :  { %4917 = vmatpush1.bf16.msra.mxu0 %v7051_v22  ;;  %5476 = vmatpush1.bf16.msra.mxu1 %v7052_v23  ;;  %v7121_v2 = vld [vmem:[%s10732_s1 + $0x20c] ss:$16 sps:$4 sm:$0xff]   ;;  %v7113_v3 = vld [vmem:[%s10733_s0] ss:$100 sps:$4 sm:$0xff]   ;;  %v7119_v5 = vld [vmem:[%s10732_s1 + $0x208] ss:$16 sps:$4 sm:$0xff]  }
  0x18   :  { %4918 = vmatprep.subr.bf16.mxu0 %v7053_v24  ;;  %5477 = vmatprep.subr.bf16.mxu1 %v7055_v25  ;;  %v7116_v4 = vld [vmem:[%s10732_s1 + $0x200] ss:$16 sps:$4 sm:$0xff]   ;;  %v7124_v6 = vld [vmem:[%s10732_s1 + $0x224] ss:$16 sps:$4 sm:$0xff]   ;;  %v7127_v7 = vld [vmem:[%s10732_s1 + $0x22c] ss:$16 sps:$4 sm:$0xff]  }
  0x19   :  { %v7122_v8 = vld [vmem:[%s10732_s1 + $0x220] ss:$16 sps:$4 sm:$0xff]   ;;  %v7125_v9 = vld [vmem:[%s10732_s1 + $0x228] ss:$16 sps:$4 sm:$0xff]   ;;  %v7130_v10 = vld [vmem:[%s10732_s1 + $0x244] ss:$16 sps:$4 sm:$0xff]  }
  0x1a   :  { %v7133_v11 = vld [vmem:[%s10732_s1 + $0x24c] ss:$16 sps:$4 sm:$0xff]   ;;  %v7128_v12 = vld [vmem:[%s10732_s1 + $0x240] ss:$16 sps:$4 sm:$0xff]   ;;  %v7131_v13 = vld [vmem:[%s10732_s1 + $0x248] ss:$16 sps:$4 sm:$0xff]  }
  0x1b   :  { %4919 = vmatpush1.bf16.msra.mxu0 %v7057_v26  ;;  %5478 = vmatpush1.bf16.msra.mxu1 %v7058_v27  ;;  %v7136_v14 = vld [vmem:[%s10732_s1 + $0x264] ss:$16 sps:$4 sm:$0xff]   ;;  %v7139_v15 = vld [vmem:[%s10732_s1 + $0x26c] ss:$16 sps:$4 sm:$0xff]   ;;  %v7134_v16 = vld [vmem:[%s10732_s1 + $0x260] ss:$16 sps:$4 sm:$0xff]  }
  0x1c   :  { %4920 = vmatprep.subr.bf16.mxu0 %v7059_v28  ;;  %5479 = vmatprep.subr.bf16.mxu1 %v7061_v29  ;;  %v7137_v17 = vld [vmem:[%s10732_s1 + $0x268] ss:$16 sps:$4 sm:$0xff]   ;;  %v7142_v18 = vld [vmem:[%s10732_s1 + $0x284] ss:$16 sps:$4 sm:$0xff]   ;;  %v7145_v19 = vld [vmem:[%s10732_s1 + $0x28c] ss:$16 sps:$4 sm:$0xff]  }
  0x1d   :  { %v7140_v20 = vld [vmem:[%s10732_s1 + $0x280] ss:$16 sps:$4 sm:$0xff]   ;;  %v7143_v21 = vld [vmem:[%s10732_s1 + $0x288] ss:$16 sps:$4 sm:$0xff]   ;;  %v7148_v22 = vld [vmem:[%s10732_s1 + $0x2a4] ss:$16 sps:$4 sm:$0xff]  }
  0x1e   :  { %v7151_v23 = vld [vmem:[%s10732_s1 + $0x2ac] ss:$16 sps:$4 sm:$0xff]   ;;  %v7146_v24 = vld [vmem:[%s10732_s1 + $0x2a0] ss:$16 sps:$4 sm:$0xff]   ;;  %v7149_v25 = vld [vmem:[%s10732_s1 + $0x2a8] ss:$16 sps:$4 sm:$0xff]  }
  0x1f   :  { %4921 = vmatpush1.bf16.msra.mxu0 %v7063_v30  ;;  %5480 = vmatpush1.bf16.msra.mxu1 %v7064_v31  ;;  %v7154_v26 = vld [vmem:[%s10732_s1 + $0x2c4] ss:$16 sps:$4 sm:$0xff]   ;;  %v7157_v27 = vld [vmem:[%s10732_s1 + $0x2cc] ss:$16 sps:$4 sm:$0xff]   ;;  %v7152_v28 = vld [vmem:[%s10732_s1 + $0x2c0] ss:$16 sps:$4 sm:$0xff]  }
  0x20   :  { %4922 = vmatprep.subr.bf16.mxu0 %v7065_v32  ;;  %5481 = vmatprep.subr.bf16.mxu1 %v7067_v33  ;;  %v7155_v29 = vld [vmem:[%s10732_s1 + $0x2c8] ss:$16 sps:$4 sm:$0xff]   ;;  %v7214_v30 = vld [vmem:[%s10733_s0 + $0xc] ss:$100 sps:$4 sm:$0xff]   ;;  %v7160_v31 = vld [vmem:[%s10732_s1 + $0x2e4] ss:$16 sps:$4 sm:$0xff]  }
  0x21   :  { %v7163_v32 = vld [vmem:[%s10732_s1 + $0x2ec] ss:$16 sps:$4 sm:$0xff]   ;;  %v7158_v33 = vld [vmem:[%s10732_s1 + $0x2e0] ss:$16 sps:$4 sm:$0xff]  }
  0x22   :  { %v7187_v48 = vld [vmem:[%s10732_s1 + $0x36c] ss:$16 sps:$4 sm:$0xff]  }
  0x23   :  { %4923 = vmatpush1.bf16.msra.mxu0 %v7069_v34  ;;  %5482 = vmatpush1.bf16.msra.mxu1 %v7070_v35  ;;  %v7161_v34 = vld [vmem:[%s10732_s1 + $0x2e8] ss:$16 sps:$4 sm:$0xff]   ;;  %v7166_v35 = vld [vmem:[%s10732_s1 + $0x304] ss:$16 sps:$4 sm:$0xff]  }
  0x24   :  { %4924 = vmatprep.subr.bf16.mxu0 %v7071_v36  ;;  %5483 = vmatprep.subr.bf16.mxu1 %v7073_v37  ;;  %v7169_v36 = vld [vmem:[%s10732_s1 + $0x30c] ss:$16 sps:$4 sm:$0xff]   ;;  %v7164_v37 = vld [vmem:[%s10732_s1 + $0x300] ss:$16 sps:$4 sm:$0xff]  }
  0x27   :  { %4925 = vmatpush1.bf16.msra.mxu0 %v7075_v38  ;;  %5484 = vmatpush1.bf16.msra.mxu1 %v7076_v39  ;;  %v7167_v38 = vld [vmem:[%s10732_s1 + $0x308] ss:$16 sps:$4 sm:$0xff]   ;;  %v7172_v39 = vld [vmem:[%s10732_s1 + $0x324] ss:$16 sps:$4 sm:$0xff]  }
  0x28   :  { %4926 = vmatprep.subr.bf16.mxu0 %v7077_v40  ;;  %5485 = vmatprep.subr.bf16.mxu1 %v7079_v41  ;;  %v7175_v40 = vld [vmem:[%s10732_s1 + $0x32c] ss:$16 sps:$4 sm:$0xff]   ;;  %v7170_v41 = vld [vmem:[%s10732_s1 + $0x320] ss:$16 sps:$4 sm:$0xff]  }
  0x2b   :  { %4927 = vmatpush1.bf16.msra.mxu0 %v7081_v42  ;;  %5486 = vmatpush1.bf16.msra.mxu1 %v7082_v43  ;;  %v7173_v42 = vld [vmem:[%s10732_s1 + $0x328] ss:$16 sps:$4 sm:$0xff]   ;;  %v7178_v43 = vld [vmem:[%s10732_s1 + $0x344] ss:$16 sps:$4 sm:$0xff]  }
  0x2c   :  { %4928 = vmatprep.subr.bf16.mxu0 %v7083_v44  ;;  %5487 = vmatprep.subr.bf16.mxu1 %v7085_v45  ;;  %v7181_v44 = vld [vmem:[%s10732_s1 + $0x34c] ss:$16 sps:$4 sm:$0xff]   ;;  %v7176_v45 = vld [vmem:[%s10732_s1 + $0x340] ss:$16 sps:$4 sm:$0xff]  }
  0x2f   :  { %4929 = vmatpush1.bf16.msra.mxu0 %v7087_v46  ;;  %5488 = vmatpush1.bf16.msra.mxu1 %v7088_v47  ;;  %v7179_v46 = vld [vmem:[%s10732_s1 + $0x348] ss:$16 sps:$4 sm:$0xff]   ;;  %v7184_v47 = vld [vmem:[%s10732_s1 + $0x364] ss:$16 sps:$4 sm:$0xff]  }
  0x30   :  { %4930 = vmatprep.subr.bf16.mxu0 %v7089_v49  ;;  %5489 = vmatprep.subr.bf16.mxu1 %v7091_v50  ;;  %v7182_v49 = vld [vmem:[%s10732_s1 + $0x360] ss:$16 sps:$4 sm:$0xff]   ;;  %v7185_v50 = vld [vmem:[%s10732_s1 + $0x368] ss:$16 sps:$4 sm:$0xff]  }
  0x33   :  { %4931 = vmatpush1.bf16.msra.mxu0 %v7093_v51  ;;  %5490 = vmatpush1.bf16.msra.mxu1 %v7094_v52  ;;  %v7190_v51 = vld [vmem:[%s10732_s1 + $0x384] ss:$16 sps:$4 sm:$0xff]   ;;  %v7193_v52 = vld [vmem:[%s10732_s1 + $0x38c] ss:$16 sps:$4 sm:$0xff]  }
  0x34   :  { %4932 = vmatprep.subr.bf16.mxu0 %v7095_v53  ;;  %5491 = vmatprep.subr.bf16.mxu1 %v7097_v54  ;;  %v7188_v53 = vld [vmem:[%s10732_s1 + $0x380] ss:$16 sps:$4 sm:$0xff]   ;;  %v7191_v54 = vld [vmem:[%s10732_s1 + $0x388] ss:$16 sps:$4 sm:$0xff]  }
  0x37   :  { %4933 = vmatpush1.bf16.msra.mxu0 %v7099_v55  ;;  %5492 = vmatpush1.bf16.msra.mxu1 %v7100_v56  ;;  %v7196_v55 = vld [vmem:[%s10732_s1 + $0x3a4] ss:$16 sps:$4 sm:$0xff]   ;;  %v7199_v56 = vld [vmem:[%s10732_s1 + $0x3ac] ss:$16 sps:$4 sm:$0xff]  }
  0x38   :  { %4934 = vmatprep.subr.bf16.mxu0 %v7101_v57  ;;  %5493 = vmatprep.subr.bf16.mxu1 %v7103_v58  ;;  %v7194_v57 = vld [vmem:[%s10732_s1 + $0x3a0] ss:$16 sps:$4 sm:$0xff]   ;;  %v7197_v58 = vld [vmem:[%s10732_s1 + $0x3a8] ss:$16 sps:$4 sm:$0xff]  }
  0x3b   :  { %4935 = vmatpush1.bf16.msra.mxu0 %v7105_v59  ;;  %5494 = vmatpush1.bf16.msra.mxu1 %v7106_v60  ;;  %v7202_v59 = vld [vmem:[%s10732_s1 + $0x3c4] ss:$16 sps:$4 sm:$0xff]   ;;  %v7205_v60 = vld [vmem:[%s10732_s1 + $0x3cc] ss:$16 sps:$4 sm:$0xff]  }
  0x3c   :  { %4936 = vmatprep.subr.bf16.mxu0 %v7107_v61  ;;  %5495 = vmatprep.subr.bf16.mxu1 %v7109_v62  ;;  %v7200_v61 = vld [vmem:[%s10732_s1 + $0x3c0] ss:$16 sps:$4 sm:$0xff]   ;;  %v7203_v62 = vld [vmem:[%s10732_s1 + $0x3c8] ss:$16 sps:$4 sm:$0xff]  }
  0x3f   :  { %4937 = vmatpush1.bf16.msra.mxu0 %v7111_v63  ;;  %5496 = vmatpush1.bf16.msra.mxu1 %v7112_v0  ;;  %v7208_v63 = vld [vmem:[%s10732_s1 + $0x3e4] ss:$16 sps:$4 sm:$0xff]   ;;  %v7211_v0 = vld [vmem:[%s10732_s1 + $0x3ec] ss:$16 sps:$4 sm:$0xff]  }
  0x40   :  { %4949 = vmatprep.subr.bf16.mxu0 %v7118_v1  ;;  %5508 = vmatprep.subr.bf16.mxu1 %v7121_v2  ;;  %v7206_v1 = vld [vmem:[%s10732_s1 + $0x3e0] ss:$16 sps:$4 sm:$0xff]   ;;  %v7209_v2 = vld [vmem:[%s10732_s1 + $0x3e8] ss:$16 sps:$4 sm:$0xff]  }
  0x42   :  { %4939 = vmatmul.mubr.bf16.vlgmr.msra.gmra.mrb[0].mxu0 %v7113_v3  ;;  %5498 = vmatmul.mubr.bf16.vlgmr.msra.gmra.mrb[0].mxu1 %v7113_v3  ;;  %v7217_v3 = vld [vmem:[%s10732_s1 + $0x404] ss:$16 sps:$4 sm:$0xff]  }
  0x43   :  { %4950 = vmatpush1.bf16.msra.mxu0 %v7116_v4  ;;  %5509 = vmatpush1.bf16.msra.mxu1 %v7119_v5  ;;  %v7220_v4 = vld [vmem:[%s10732_s1 + $0x40c] ss:$16 sps:$4 sm:$0xff]  }
  0x44   :  { %4951 = vmatprep.subr.bf16.mxu0 %v7124_v6  ;;  %5510 = vmatprep.subr.bf16.mxu1 %v7127_v7  ;;  %v7212_v5 = vld [vmem:[%s10733_s0 + $0x8] ss:$100 sps:$4 sm:$0xff]   ;;  %v7215_v6 = vld [vmem:[%s10732_s1 + $0x400] ss:$16 sps:$4 sm:$0xff]  }
  0x45   :  { %4981 = vmatprep.mubr.bf16.mxu0 %v7214_v30  ;;  %5540 = vmatprep.mubr.bf16.mxu1 %v7214_v30  ;;  %v7218_v7 = vld [vmem:[%s10732_s1 + $0x408] ss:$16 sps:$4 sm:$0xff]   ;;  %v7256_v30 = vld [vmem:[%s10732_s1 + $0x4cc] ss:$16 sps:$4 sm:$0xff]  }
  0x47   :  { %4952 = vmatpush1.bf16.msra.mxu0 %v7122_v8  ;;  %5511 = vmatpush1.bf16.msra.mxu1 %v7125_v9  ;;  %v7223_v8 = vld [vmem:[%s10732_s1 + $0x424] ss:$16 sps:$4 sm:$0xff]   ;;  %v7226_v9 = vld [vmem:[%s10732_s1 + $0x42c] ss:$16 sps:$4 sm:$0xff]  }
  0x48   :  { %4953 = vmatprep.subr.bf16.mxu0 %v7130_v10  ;;  %5512 = vmatprep.subr.bf16.mxu1 %v7133_v11  ;;  %v7221_v10 = vld [vmem:[%s10732_s1 + $0x420] ss:$16 sps:$4 sm:$0xff]   ;;  %v7224_v11 = vld [vmem:[%s10732_s1 + $0x428] ss:$16 sps:$4 sm:$0xff]  }
  0x4b   :  { %4954 = vmatpush1.bf16.msra.mxu0 %v7128_v12  ;;  %5513 = vmatpush1.bf16.msra.mxu1 %v7131_v13  ;;  %v7313_v12 = vld [vmem:[%s10733_s0 + $0x14] ss:$100 sps:$4 sm:$0xff]  }
  0x4c   :  { %4955 = vmatprep.subr.bf16.mxu0 %v7136_v14  ;;  %5514 = vmatprep.subr.bf16.mxu1 %v7139_v15  ;;  %v7229_v13 = vld [vmem:[%s10732_s1 + $0x444] ss:$16 sps:$4 sm:$0xff]   ;;  %v7232_v14 = vld [vmem:[%s10732_s1 + $0x44c] ss:$16 sps:$4 sm:$0xff]   ;;  %v7227_v15 = vld [vmem:[%s10732_s1 + $0x440] ss:$16 sps:$4 sm:$0xff]  }
  0x4f   :  { %4956 = vmatpush1.bf16.msra.mxu0 %v7134_v16  ;;  %5515 = vmatpush1.bf16.msra.mxu1 %v7137_v17  ;;  %v7230_v16 = vld [vmem:[%s10732_s1 + $0x448] ss:$16 sps:$4 sm:$0xff]   ;;  %v7235_v17 = vld [vmem:[%s10732_s1 + $0x464] ss:$16 sps:$4 sm:$0xff]  }
  0x50   :  { %4957 = vmatprep.subr.bf16.mxu0 %v7142_v18  ;;  %5516 = vmatprep.subr.bf16.mxu1 %v7145_v19  ;;  %v7238_v18 = vld [vmem:[%s10732_s1 + $0x46c] ss:$16 sps:$4 sm:$0xff]   ;;  %v7233_v19 = vld [vmem:[%s10732_s1 + $0x460] ss:$16 sps:$4 sm:$0xff]  }
  0x53   :  { %4958 = vmatpush1.bf16.msra.mxu0 %v7140_v20  ;;  %5517 = vmatpush1.bf16.msra.mxu1 %v7143_v21  ;;  %v7236_v20 = vld [vmem:[%s10732_s1 + $0x468] ss:$16 sps:$4 sm:$0xff]   ;;  %v7241_v21 = vld [vmem:[%s10732_s1 + $0x484] ss:$16 sps:$4 sm:$0xff]  }
  0x54   :  { %4959 = vmatprep.subr.bf16.mxu0 %v7148_v22  ;;  %5518 = vmatprep.subr.bf16.mxu1 %v7151_v23  ;;  %v7244_v22 = vld [vmem:[%s10732_s1 + $0x48c] ss:$16 sps:$4 sm:$0xff]   ;;  %v7239_v23 = vld [vmem:[%s10732_s1 + $0x480] ss:$16 sps:$4 sm:$0xff]  }
  0x57   :  { %4960 = vmatpush1.bf16.msra.mxu0 %v7146_v24  ;;  %5519 = vmatpush1.bf16.msra.mxu1 %v7149_v25  ;;  %v7242_v24 = vld [vmem:[%s10732_s1 + $0x488] ss:$16 sps:$4 sm:$0xff]   ;;  %v7247_v25 = vld [vmem:[%s10732_s1 + $0x4a4] ss:$16 sps:$4 sm:$0xff]  }
  0x58   :  { %4961 = vmatprep.subr.bf16.mxu0 %v7154_v26  ;;  %5520 = vmatprep.subr.bf16.mxu1 %v7157_v27  ;;  %v7250_v26 = vld [vmem:[%s10732_s1 + $0x4ac] ss:$16 sps:$4 sm:$0xff]   ;;  %v7245_v27 = vld [vmem:[%s10732_s1 + $0x4a0] ss:$16 sps:$4 sm:$0xff]  }
  0x5b   :  { %4962 = vmatpush1.bf16.msra.mxu0 %v7152_v28  ;;  %5521 = vmatpush1.bf16.msra.mxu1 %v7155_v29  ;;  %v7248_v28 = vld [vmem:[%s10732_s1 + $0x4a8] ss:$16 sps:$4 sm:$0xff]   ;;  %v7253_v29 = vld [vmem:[%s10732_s1 + $0x4c4] ss:$16 sps:$4 sm:$0xff]  }
  0x5c   :  { %4963 = vmatprep.subr.bf16.mxu0 %v7160_v31  ;;  %5522 = vmatprep.subr.bf16.mxu1 %v7163_v32  ;;  %v7251_v31 = vld [vmem:[%s10732_s1 + $0x4c0] ss:$16 sps:$4 sm:$0xff]   ;;  %v7254_v32 = vld [vmem:[%s10732_s1 + $0x4c8] ss:$16 sps:$4 sm:$0xff]  }
  0x5f   :  { %4964 = vmatpush1.bf16.msra.mxu0 %v7158_v33  ;;  %5523 = vmatpush1.bf16.msra.mxu1 %v7161_v34  ;;  %v7259_v33 = vld [vmem:[%s10732_s1 + $0x4e4] ss:$16 sps:$4 sm:$0xff]   ;;  %v7262_v34 = vld [vmem:[%s10732_s1 + $0x4ec] ss:$16 sps:$4 sm:$0xff]  }
  0x60   :  { %4965 = vmatprep.subr.bf16.mxu0 %v7166_v35  ;;  %5524 = vmatprep.subr.bf16.mxu1 %v7169_v36  ;;  %v7257_v35 = vld [vmem:[%s10732_s1 + $0x4e0] ss:$16 sps:$4 sm:$0xff]   ;;  %v7260_v36 = vld [vmem:[%s10732_s1 + $0x4e8] ss:$16 sps:$4 sm:$0xff]  }
  0x63   :  { %4966 = vmatpush1.bf16.msra.mxu0 %v7164_v37  ;;  %5525 = vmatpush1.bf16.msra.mxu1 %v7167_v38  ;;  %v7265_v37 = vld [vmem:[%s10732_s1 + $0x504] ss:$16 sps:$4 sm:$0xff]   ;;  %v7268_v38 = vld [vmem:[%s10732_s1 + $0x50c] ss:$16 sps:$4 sm:$0xff]  }
  0x64   :  { %4967 = vmatprep.subr.bf16.mxu0 %v7172_v39  ;;  %5526 = vmatprep.subr.bf16.mxu1 %v7175_v40  ;;  %v7263_v39 = vld [vmem:[%s10732_s1 + $0x500] ss:$16 sps:$4 sm:$0xff]   ;;  %v7266_v40 = vld [vmem:[%s10732_s1 + $0x508] ss:$16 sps:$4 sm:$0xff]  }
  0x67   :  { %4968 = vmatpush1.bf16.msra.mxu0 %v7170_v41  ;;  %5527 = vmatpush1.bf16.msra.mxu1 %v7173_v42  ;;  %v7271_v41 = vld [vmem:[%s10732_s1 + $0x524] ss:$16 sps:$4 sm:$0xff]   ;;  %v7274_v42 = vld [vmem:[%s10732_s1 + $0x52c] ss:$16 sps:$4 sm:$0xff]  }
  0x68   :  { %4969 = vmatprep.subr.bf16.mxu0 %v7178_v43  ;;  %5528 = vmatprep.subr.bf16.mxu1 %v7181_v44  ;;  %v7269_v43 = vld [vmem:[%s10732_s1 + $0x520] ss:$16 sps:$4 sm:$0xff]   ;;  %v7272_v44 = vld [vmem:[%s10732_s1 + $0x528] ss:$16 sps:$4 sm:$0xff]  }
  0x6b   :  { %4970 = vmatpush1.bf16.msra.mxu0 %v7176_v45  ;;  %5529 = vmatpush1.bf16.msra.mxu1 %v7179_v46  ;;  %v7277_v45 = vld [vmem:[%s10732_s1 + $0x544] ss:$16 sps:$4 sm:$0xff]   ;;  %v7280_v46 = vld [vmem:[%s10732_s1 + $0x54c] ss:$16 sps:$4 sm:$0xff]  }
  0x6c   :  { %4971 = vmatprep.subr.bf16.mxu0 %v7184_v47  ;;  %5530 = vmatprep.subr.bf16.mxu1 %v7187_v48  ;;  %v7275_v47 = vld [vmem:[%s10732_s1 + $0x540] ss:$16 sps:$4 sm:$0xff]   ;;  %v7278_v48 = vld [vmem:[%s10732_s1 + $0x548] ss:$16 sps:$4 sm:$0xff]  }
  0x6f   :  { %4972 = vmatpush1.bf16.msra.mxu0 %v7182_v49  ;;  %5531 = vmatpush1.bf16.msra.mxu1 %v7185_v50  ;;  %v7283_v49 = vld [vmem:[%s10732_s1 + $0x564] ss:$16 sps:$4 sm:$0xff]   ;;  %v7286_v50 = vld [vmem:[%s10732_s1 + $0x56c] ss:$16 sps:$4 sm:$0xff]  }
  0x70   :  { %4973 = vmatprep.subr.bf16.mxu0 %v7190_v51  ;;  %5532 = vmatprep.subr.bf16.mxu1 %v7193_v52  ;;  %v7281_v51 = vld [vmem:[%s10732_s1 + $0x560] ss:$16 sps:$4 sm:$0xff]   ;;  %v7284_v52 = vld [vmem:[%s10732_s1 + $0x568] ss:$16 sps:$4 sm:$0xff]  }
  0x73   :  { %4974 = vmatpush1.bf16.msra.mxu0 %v7188_v53  ;;  %5533 = vmatpush1.bf16.msra.mxu1 %v7191_v54  ;;  %v7289_v53 = vld [vmem:[%s10732_s1 + $0x584] ss:$16 sps:$4 sm:$0xff]   ;;  %v7292_v54 = vld [vmem:[%s10732_s1 + $0x58c] ss:$16 sps:$4 sm:$0xff]  }
  0x74   :  { %4975 = vmatprep.subr.bf16.mxu0 %v7196_v55  ;;  %5534 = vmatprep.subr.bf16.mxu1 %v7199_v56  ;;  %v7287_v55 = vld [vmem:[%s10732_s1 + $0x580] ss:$16 sps:$4 sm:$0xff]   ;;  %v7290_v56 = vld [vmem:[%s10732_s1 + $0x588] ss:$16 sps:$4 sm:$0xff]  }
  0x77   :  { %4976 = vmatpush1.bf16.msra.mxu0 %v7194_v57  ;;  %5535 = vmatpush1.bf16.msra.mxu1 %v7197_v58  ;;  %v7295_v57 = vld [vmem:[%s10732_s1 + $0x5a4] ss:$16 sps:$4 sm:$0xff]   ;;  %v7298_v58 = vld [vmem:[%s10732_s1 + $0x5ac] ss:$16 sps:$4 sm:$0xff]  }
  0x78   :  { %4977 = vmatprep.subr.bf16.mxu0 %v7202_v59  ;;  %5536 = vmatprep.subr.bf16.mxu1 %v7205_v60  ;;  %v7293_v59 = vld [vmem:[%s10732_s1 + $0x5a0] ss:$16 sps:$4 sm:$0xff]   ;;  %v7296_v60 = vld [vmem:[%s10732_s1 + $0x5a8] ss:$16 sps:$4 sm:$0xff]  }
  0x7b   :  { %4978 = vmatpush1.bf16.msra.mxu0 %v7200_v61  ;;  %5537 = vmatpush1.bf16.msra.mxu1 %v7203_v62  ;;  %v7301_v61 = vld [vmem:[%s10732_s1 + $0x5c4] ss:$16 sps:$4 sm:$0xff]   ;;  %v7304_v62 = vld [vmem:[%s10732_s1 + $0x5cc] ss:$16 sps:$4 sm:$0xff]  }
  0x7c   :  { %4979 = vmatprep.subr.bf16.mxu0 %v7208_v63  ;;  %5538 = vmatprep.subr.bf16.mxu1 %v7211_v0  ;;  %v7299_v63 = vld [vmem:[%s10732_s1 + $0x5c0] ss:$16 sps:$4 sm:$0xff]   ;;  %v7302_v0 = vld [vmem:[%s10732_s1 + $0x5c8] ss:$16 sps:$4 sm:$0xff]  }
  0x7f   :  { %4980 = vmatpush1.bf16.msra.mxu0 %v7206_v1  ;;  %5539 = vmatpush1.bf16.msra.mxu1 %v7209_v2  ;;  %v7307_v1 = vld [vmem:[%s10732_s1 + $0x5e4] ss:$16 sps:$4 sm:$0xff]   ;;  %v7310_v2 = vld [vmem:[%s10732_s1 + $0x5ec] ss:$16 sps:$4 sm:$0xff]  }
  0x80   :  { %4992 = vmatprep.subr.bf16.mxu0 %v7217_v3  ;;  %5551 = vmatprep.subr.bf16.mxu1 %v7220_v4  ;;  %v7305_v3 = vld [vmem:[%s10732_s1 + $0x5e0] ss:$16 sps:$4 sm:$0xff]   ;;  %v7308_v4 = vld [vmem:[%s10732_s1 + $0x5e8] ss:$16 sps:$4 sm:$0xff]  }
  0x82   :  { %4982 = vmatmul.mubr.bf16.vlgmr.msra.gmra.mrb[0].mxu0 %v7212_v5  ;;  %5541 = vmatmul.mubr.bf16.vlgmr.msra.gmra.mrb[0].mxu1 %v7212_v5  ;;  %v7316_v5 = vld [vmem:[%s10732_s1 + $0x604] ss:$16 sps:$4 sm:$0xff]  }
  0x83   :  { %4993 = vmatpush1.bf16.msra.mxu0 %v7215_v6  ;;  %5552 = vmatpush1.bf16.msra.mxu1 %v7218_v7  ;;  %v7319_v6 = vld [vmem:[%s10732_s1 + $0x60c] ss:$16 sps:$4 sm:$0xff]   ;;  %v7311_v7 = vld [vmem:[%s10733_s0 + $0x10] ss:$100 sps:$4 sm:$0xff]  }
  0x84   :  { %4994 = vmatprep.subr.bf16.mxu0 %v7223_v8  ;;  %5553 = vmatprep.subr.bf16.mxu1 %v7226_v9  ;;  %v7314_v8 = vld [vmem:[%s10732_s1 + $0x600] ss:$16 sps:$4 sm:$0xff]   ;;  %v7317_v9 = vld [vmem:[%s10732_s1 + $0x608] ss:$16 sps:$4 sm:$0xff]  }
  0x85   :  { %5024 = vmatprep.mubr.bf16.mxu0 %v7313_v12  ;;  %5583 = vmatprep.mubr.bf16.mxu1 %v7313_v12  ;;  %v7412_v12 = vld [vmem:[%s10733_s0 + $0x1c] ss:$100 sps:$4 sm:$0xff]  }
  0x87   :  { %4995 = vmatpush1.bf16.msra.mxu0 %v7221_v10  ;;  %5554 = vmatpush1.bf16.msra.mxu1 %v7224_v11  ;;  %v7322_v10 = vld [vmem:[%s10732_s1 + $0x624] ss:$16 sps:$4 sm:$0xff]   ;;  %v7325_v11 = vld [vmem:[%s10732_s1 + $0x62c] ss:$16 sps:$4 sm:$0xff]  }
  0x88   :  { %4996 = vmatprep.subr.bf16.mxu0 %v7229_v13  ;;  %5555 = vmatprep.subr.bf16.mxu1 %v7232_v14  ;;  %v7320_v13 = vld [vmem:[%s10732_s1 + $0x620] ss:$16 sps:$4 sm:$0xff]   ;;  %v7323_v14 = vld [vmem:[%s10732_s1 + $0x628] ss:$16 sps:$4 sm:$0xff]  }
  0x8b   :  { %4997 = vmatpush1.bf16.msra.mxu0 %v7227_v15  ;;  %5556 = vmatpush1.bf16.msra.mxu1 %v7230_v16  ;;  %v7328_v15 = vld [vmem:[%s10732_s1 + $0x644] ss:$16 sps:$4 sm:$0xff]   ;;  %v7331_v16 = vld [vmem:[%s10732_s1 + $0x64c] ss:$16 sps:$4 sm:$0xff]  }
  0x8c   :  { %4998 = vmatprep.subr.bf16.mxu0 %v7235_v17  ;;  %5557 = vmatprep.subr.bf16.mxu1 %v7238_v18  ;;  %v7326_v17 = vld [vmem:[%s10732_s1 + $0x640] ss:$16 sps:$4 sm:$0xff]   ;;  %v7329_v18 = vld [vmem:[%s10732_s1 + $0x648] ss:$16 sps:$4 sm:$0xff]  }
  0x8f   :  { %4999 = vmatpush1.bf16.msra.mxu0 %v7233_v19  ;;  %5558 = vmatpush1.bf16.msra.mxu1 %v7236_v20  ;;  %v7334_v19 = vld [vmem:[%s10732_s1 + $0x664] ss:$16 sps:$4 sm:$0xff]   ;;  %v7337_v20 = vld [vmem:[%s10732_s1 + $0x66c] ss:$16 sps:$4 sm:$0xff]  }
  0x90   :  { %5000 = vmatprep.subr.bf16.mxu0 %v7241_v21  ;;  %5559 = vmatprep.subr.bf16.mxu1 %v7244_v22  ;;  %v7332_v21 = vld [vmem:[%s10732_s1 + $0x660] ss:$16 sps:$4 sm:$0xff]   ;;  %v7335_v22 = vld [vmem:[%s10732_s1 + $0x668] ss:$16 sps:$4 sm:$0xff]  }
  0x93   :  { %5001 = vmatpush1.bf16.msra.mxu0 %v7239_v23  ;;  %5560 = vmatpush1.bf16.msra.mxu1 %v7242_v24  ;;  %v7340_v23 = vld [vmem:[%s10732_s1 + $0x684] ss:$16 sps:$4 sm:$0xff]   ;;  %v7343_v24 = vld [vmem:[%s10732_s1 + $0x68c] ss:$16 sps:$4 sm:$0xff]  }
  0x94   :  { %5002 = vmatprep.subr.bf16.mxu0 %v7247_v25  ;;  %5561 = vmatprep.subr.bf16.mxu1 %v7250_v26  ;;  %v7338_v25 = vld [vmem:[%s10732_s1 + $0x680] ss:$16 sps:$4 sm:$0xff]   ;;  %v7341_v26 = vld [vmem:[%s10732_s1 + $0x688] ss:$16 sps:$4 sm:$0xff]  }
  0x97   :  { %5003 = vmatpush1.bf16.msra.mxu0 %v7245_v27  ;;  %5562 = vmatpush1.bf16.msra.mxu1 %v7248_v28  ;;  %v7346_v27 = vld [vmem:[%s10732_s1 + $0x6a4] ss:$16 sps:$4 sm:$0xff]   ;;  %v7349_v28 = vld [vmem:[%s10732_s1 + $0x6ac] ss:$16 sps:$4 sm:$0xff]  }
  0x98   :  { %5004 = vmatprep.subr.bf16.mxu0 %v7253_v29  ;;  %5563 = vmatprep.subr.bf16.mxu1 %v7256_v30  ;;  %v7344_v29 = vld [vmem:[%s10732_s1 + $0x6a0] ss:$16 sps:$4 sm:$0xff]   ;;  %v7347_v30 = vld [vmem:[%s10732_s1 + $0x6a8] ss:$16 sps:$4 sm:$0xff]  }
  0x9b   :  { %5005 = vmatpush1.bf16.msra.mxu0 %v7251_v31  ;;  %5564 = vmatpush1.bf16.msra.mxu1 %v7254_v32  ;;  %v7352_v31 = vld [vmem:[%s10732_s1 + $0x6c4] ss:$16 sps:$4 sm:$0xff]   ;;  %v7355_v32 = vld [vmem:[%s10732_s1 + $0x6cc] ss:$16 sps:$4 sm:$0xff]  }
  0x9c   :  { %5006 = vmatprep.subr.bf16.mxu0 %v7259_v33  ;;  %5565 = vmatprep.subr.bf16.mxu1 %v7262_v34  ;;  %v7350_v33 = vld [vmem:[%s10732_s1 + $0x6c0] ss:$16 sps:$4 sm:$0xff]   ;;  %v7353_v34 = vld [vmem:[%s10732_s1 + $0x6c8] ss:$16 sps:$4 sm:$0xff]  }
  0x9f   :  { %5007 = vmatpush1.bf16.msra.mxu0 %v7257_v35  ;;  %5566 = vmatpush1.bf16.msra.mxu1 %v7260_v36  ;;  %v7358_v35 = vld [vmem:[%s10732_s1 + $0x6e4] ss:$16 sps:$4 sm:$0xff]   ;;  %v7361_v36 = vld [vmem:[%s10732_s1 + $0x6ec] ss:$16 sps:$4 sm:$0xff]  }
  0xa0   :  { %5008 = vmatprep.subr.bf16.mxu0 %v7265_v37  ;;  %5567 = vmatprep.subr.bf16.mxu1 %v7268_v38  ;;  %v7356_v37 = vld [vmem:[%s10732_s1 + $0x6e0] ss:$16 sps:$4 sm:$0xff]   ;;  %v7359_v38 = vld [vmem:[%s10732_s1 + $0x6e8] ss:$16 sps:$4 sm:$0xff]  }
  0xa3   :  { %5009 = vmatpush1.bf16.msra.mxu0 %v7263_v39  ;;  %5568 = vmatpush1.bf16.msra.mxu1 %v7266_v40  ;;  %v7364_v39 = vld [vmem:[%s10732_s1 + $0x704] ss:$16 sps:$4 sm:$0xff]   ;;  %v7367_v40 = vld [vmem:[%s10732_s1 + $0x70c] ss:$16 sps:$4 sm:$0xff]  }
  0xa4   :  { %5010 = vmatprep.subr.bf16.mxu0 %v7271_v41  ;;  %5569 = vmatprep.subr.bf16.mxu1 %v7274_v42  ;;  %v7362_v41 = vld [vmem:[%s10732_s1 + $0x700] ss:$16 sps:$4 sm:$0xff]   ;;  %v7365_v42 = vld [vmem:[%s10732_s1 + $0x708] ss:$16 sps:$4 sm:$0xff]  }
  0xa7   :  { %5011 = vmatpush1.bf16.msra.mxu0 %v7269_v43  ;;  %5570 = vmatpush1.bf16.msra.mxu1 %v7272_v44  ;;  %v7370_v43 = vld [vmem:[%s10732_s1 + $0x724] ss:$16 sps:$4 sm:$0xff]   ;;  %v7373_v44 = vld [vmem:[%s10732_s1 + $0x72c] ss:$16 sps:$4 sm:$0xff]  }
  0xa8   :  { %5012 = vmatprep.subr.bf16.mxu0 %v7277_v45  ;;  %5571 = vmatprep.subr.bf16.mxu1 %v7280_v46  ;;  %v7368_v45 = vld [vmem:[%s10732_s1 + $0x720] ss:$16 sps:$4 sm:$0xff]   ;;  %v7371_v46 = vld [vmem:[%s10732_s1 + $0x728] ss:$16 sps:$4 sm:$0xff]  }
  0xab   :  { %5013 = vmatpush1.bf16.msra.mxu0 %v7275_v47  ;;  %5572 = vmatpush1.bf16.msra.mxu1 %v7278_v48  ;;  %v7376_v47 = vld [vmem:[%s10732_s1 + $0x744] ss:$16 sps:$4 sm:$0xff]   ;;  %v7379_v48 = vld [vmem:[%s10732_s1 + $0x74c] ss:$16 sps:$4 sm:$0xff]  }
  0xac   :  { %5014 = vmatprep.subr.bf16.mxu0 %v7283_v49  ;;  %5573 = vmatprep.subr.bf16.mxu1 %v7286_v50  ;;  %v7374_v49 = vld [vmem:[%s10732_s1 + $0x740] ss:$16 sps:$4 sm:$0xff]   ;;  %v7377_v50 = vld [vmem:[%s10732_s1 + $0x748] ss:$16 sps:$4 sm:$0xff]  }
  0xaf   :  { %5015 = vmatpush1.bf16.msra.mxu0 %v7281_v51  ;;  %5574 = vmatpush1.bf16.msra.mxu1 %v7284_v52  ;;  %v7382_v51 = vld [vmem:[%s10732_s1 + $0x764] ss:$16 sps:$4 sm:$0xff]   ;;  %v7385_v52 = vld [vmem:[%s10732_s1 + $0x76c] ss:$16 sps:$4 sm:$0xff]  }
  0xb0   :  { %5016 = vmatprep.subr.bf16.mxu0 %v7289_v53  ;;  %5575 = vmatprep.subr.bf16.mxu1 %v7292_v54  ;;  %v7380_v53 = vld [vmem:[%s10732_s1 + $0x760] ss:$16 sps:$4 sm:$0xff]   ;;  %v7383_v54 = vld [vmem:[%s10732_s1 + $0x768] ss:$16 sps:$4 sm:$0xff]  }
  0xb3   :  { %5017 = vmatpush1.bf16.msra.mxu0 %v7287_v55  ;;  %5576 = vmatpush1.bf16.msra.mxu1 %v7290_v56  ;;  %v7388_v55 = vld [vmem:[%s10732_s1 + $0x784] ss:$16 sps:$4 sm:$0xff]   ;;  %v7391_v56 = vld [vmem:[%s10732_s1 + $0x78c] ss:$16 sps:$4 sm:$0xff]  }
  0xb4   :  { %5018 = vmatprep.subr.bf16.mxu0 %v7295_v57  ;;  %5577 = vmatprep.subr.bf16.mxu1 %v7298_v58  ;;  %v7386_v57 = vld [vmem:[%s10732_s1 + $0x780] ss:$16 sps:$4 sm:$0xff]   ;;  %v7389_v58 = vld [vmem:[%s10732_s1 + $0x788] ss:$16 sps:$4 sm:$0xff]  }
  0xb7   :  { %5019 = vmatpush1.bf16.msra.mxu0 %v7293_v59  ;;  %5578 = vmatpush1.bf16.msra.mxu1 %v7296_v60  ;;  %v7394_v59 = vld [vmem:[%s10732_s1 + $0x7a4] ss:$16 sps:$4 sm:$0xff]   ;;  %v7397_v60 = vld [vmem:[%s10732_s1 + $0x7ac] ss:$16 sps:$4 sm:$0xff]  }
  0xb8   :  { %5020 = vmatprep.subr.bf16.mxu0 %v7301_v61  ;;  %5579 = vmatprep.subr.bf16.mxu1 %v7304_v62  ;;  %v7392_v61 = vld [vmem:[%s10732_s1 + $0x7a0] ss:$16 sps:$4 sm:$0xff]   ;;  %v7395_v62 = vld [vmem:[%s10732_s1 + $0x7a8] ss:$16 sps:$4 sm:$0xff]  }
  0xbb   :  { %5021 = vmatpush1.bf16.msra.mxu0 %v7299_v63  ;;  %5580 = vmatpush1.bf16.msra.mxu1 %v7302_v0  ;;  %v7400_v63 = vld [vmem:[%s10732_s1 + $0x7c4] ss:$16 sps:$4 sm:$0xff]   ;;  %v7403_v0 = vld [vmem:[%s10732_s1 + $0x7cc] ss:$16 sps:$4 sm:$0xff]  }
  0xbc   :  { %5022 = vmatprep.subr.bf16.mxu0 %v7307_v1  ;;  %5581 = vmatprep.subr.bf16.mxu1 %v7310_v2  ;;  %v7398_v1 = vld [vmem:[%s10732_s1 + $0x7c0] ss:$16 sps:$4 sm:$0xff]   ;;  %v7401_v2 = vld [vmem:[%s10732_s1 + $0x7c8] ss:$16 sps:$4 sm:$0xff]  }
  0xbf   :  { %5023 = vmatpush1.bf16.msra.mxu0 %v7305_v3  ;;  %5582 = vmatpush1.bf16.msra.mxu1 %v7308_v4  ;;  %v7406_v3 = vld [vmem:[%s10732_s1 + $0x7e4] ss:$16 sps:$4 sm:$0xff]   ;;  %v7409_v4 = vld [vmem:[%s10732_s1 + $0x7ec] ss:$16 sps:$4 sm:$0xff]  }
  0xc0   :  { %5035 = vmatprep.subr.bf16.mxu0 %v7316_v5  ;;  %5594 = vmatprep.subr.bf16.mxu1 %v7319_v6  ;;  %v7404_v5 = vld [vmem:[%s10732_s1 + $0x7e0] ss:$16 sps:$4 sm:$0xff]   ;;  %v7407_v6 = vld [vmem:[%s10732_s1 + $0x7e8] ss:$16 sps:$4 sm:$0xff]  }
  0xc2   :  { %5025 = vmatmul.mubr.bf16.vlgmr.msra.gmra.mrb[0].mxu0 %v7311_v7  ;;  %5584 = vmatmul.mubr.bf16.vlgmr.msra.gmra.mrb[0].mxu1 %v7311_v7  ;;  %v7415_v7 = vld [vmem:[%s10732_s1 + $0x804] ss:$16 sps:$4 sm:$0xff]  }
  0xc3   :  { %5036 = vmatpush1.bf16.msra.mxu0 %v7314_v8  ;;  %5595 = vmatpush1.bf16.msra.mxu1 %v7317_v9  ;;  %v7418_v8 = vld [vmem:[%s10732_s1 + $0x80c] ss:$16 sps:$4 sm:$0xff]  }
  0xc4   :  { %5037 = vmatprep.subr.bf16.mxu0 %v7322_v10  ;;  %5596 = vmatprep.subr.bf16.mxu1 %v7325_v11  ;;  %v7410_v9 = vld [vmem:[%s10733_s0 + $0x18] ss:$100 sps:$4 sm:$0xff]   ;;  %v7413_v10 = vld [vmem:[%s10732_s1 + $0x800] ss:$16 sps:$4 sm:$0xff]  }
  0xc5   :  { %5067 = vmatprep.mubr.bf16.mxu0 %v7412_v12  ;;  %5626 = vmatprep.mubr.bf16.mxu1 %v7412_v12  ;;  %v7416_v11 = vld [vmem:[%s10732_s1 + $0x808] ss:$16 sps:$4 sm:$0xff]   ;;  %v7421_v12 = vld [vmem:[%s10732_s1 + $0x824] ss:$16 sps:$4 sm:$0xff]  }
  0xc7   :  { %5038 = vmatpush1.bf16.msra.mxu0 %v7320_v13  ;;  %5597 = vmatpush1.bf16.msra.mxu1 %v7323_v14  ;;  %v7424_v13 = vld [vmem:[%s10732_s1 + $0x82c] ss:$16 sps:$4 sm:$0xff]   ;;  %v7511_v14 = vld [vmem:[%s10733_s0 + $0x24] ss:$100 sps:$4 sm:$0xff]  }
  0xc8   :  { %5039 = vmatprep.subr.bf16.mxu0 %v7328_v15  ;;  %5598 = vmatprep.subr.bf16.mxu1 %v7331_v16  ;;  %v7419_v15 = vld [vmem:[%s10732_s1 + $0x820] ss:$16 sps:$4 sm:$0xff]   ;;  %v7422_v16 = vld [vmem:[%s10732_s1 + $0x828] ss:$16 sps:$4 sm:$0xff]  }
  0xcb   :  { %5040 = vmatpush1.bf16.msra.mxu0 %v7326_v17  ;;  %5599 = vmatpush1.bf16.msra.mxu1 %v7329_v18  ;;  %v7427_v17 = vld [vmem:[%s10732_s1 + $0x844] ss:$16 sps:$4 sm:$0xff]   ;;  %v7430_v18 = vld [vmem:[%s10732_s1 + $0x84c] ss:$16 sps:$4 sm:$0xff]  }
  0xcc   :  { %5041 = vmatprep.subr.bf16.mxu0 %v7334_v19  ;;  %5600 = vmatprep.subr.bf16.mxu1 %v7337_v20  ;;  %v7425_v19 = vld [vmem:[%s10732_s1 + $0x840] ss:$16 sps:$4 sm:$0xff]   ;;  %v7428_v20 = vld [vmem:[%s10732_s1 + $0x848] ss:$16 sps:$4 sm:$0xff]  }
  0xcf   :  { %5042 = vmatpush1.bf16.msra.mxu0 %v7332_v21  ;;  %5601 = vmatpush1.bf16.msra.mxu1 %v7335_v22  ;;  %v7433_v21 = vld [vmem:[%s10732_s1 + $0x864] ss:$16 sps:$4 sm:$0xff]   ;;  %v7436_v22 = vld [vmem:[%s10732_s1 + $0x86c] ss:$16 sps:$4 sm:$0xff]  }
  0xd0   :  { %5043 = vmatprep.subr.bf16.mxu0 %v7340_v23  ;;  %5602 = vmatprep.subr.bf16.mxu1 %v7343_v24  ;;  %v7431_v23 = vld [vmem:[%s10732_s1 + $0x860] ss:$16 sps:$4 sm:$0xff]   ;;  %v7434_v24 = vld [vmem:[%s10732_s1 + $0x868] ss:$16 sps:$4 sm:$0xff]  }
  0xd3   :  { %5044 = vmatpush1.bf16.msra.mxu0 %v7338_v25  ;;  %5603 = vmatpush1.bf16.msra.mxu1 %v7341_v26  ;;  %v7439_v25 = vld [vmem:[%s10732_s1 + $0x884] ss:$16 sps:$4 sm:$0xff]   ;;  %v7442_v26 = vld [vmem:[%s10732_s1 + $0x88c] ss:$16 sps:$4 sm:$0xff]  }
  0xd4   :  { %5045 = vmatprep.subr.bf16.mxu0 %v7346_v27  ;;  %5604 = vmatprep.subr.bf16.mxu1 %v7349_v28  ;;  %v7437_v27 = vld [vmem:[%s10732_s1 + $0x880] ss:$16 sps:$4 sm:$0xff]   ;;  %v7440_v28 = vld [vmem:[%s10732_s1 + $0x888] ss:$16 sps:$4 sm:$0xff]  }
  0xd7   :  { %5046 = vmatpush1.bf16.msra.mxu0 %v7344_v29  ;;  %5605 = vmatpush1.bf16.msra.mxu1 %v7347_v30  ;;  %v7445_v29 = vld [vmem:[%s10732_s1 + $0x8a4] ss:$16 sps:$4 sm:$0xff]   ;;  %v7448_v30 = vld [vmem:[%s10732_s1 + $0x8ac] ss:$16 sps:$4 sm:$0xff]  }
  0xd8   :  { %5047 = vmatprep.subr.bf16.mxu0 %v7352_v31  ;;  %5606 = vmatprep.subr.bf16.mxu1 %v7355_v32  ;;  %v7443_v31 = vld [vmem:[%s10732_s1 + $0x8a0] ss:$16 sps:$4 sm:$0xff]   ;;  %v7446_v32 = vld [vmem:[%s10732_s1 + $0x8a8] ss:$16 sps:$4 sm:$0xff]  }
  0xdb   :  { %5048 = vmatpush1.bf16.msra.mxu0 %v7350_v33  ;;  %5607 = vmatpush1.bf16.msra.mxu1 %v7353_v34  ;;  %v7451_v33 = vld [vmem:[%s10732_s1 + $0x8c4] ss:$16 sps:$4 sm:$0xff]   ;;  %v7454_v34 = vld [vmem:[%s10732_s1 + $0x8cc] ss:$16 sps:$4 sm:$0xff]  }
  0xdc   :  { %5049 = vmatprep.subr.bf16.mxu0 %v7358_v35  ;;  %5608 = vmatprep.subr.bf16.mxu1 %v7361_v36  ;;  %v7449_v35 = vld [vmem:[%s10732_s1 + $0x8c0] ss:$16 sps:$4 sm:$0xff]   ;;  %v7452_v36 = vld [vmem:[%s10732_s1 + $0x8c8] ss:$16 sps:$4 sm:$0xff]  }
  0xdf   :  { %5050 = vmatpush1.bf16.msra.mxu0 %v7356_v37  ;;  %5609 = vmatpush1.bf16.msra.mxu1 %v7359_v38  ;;  %v7457_v37 = vld [vmem:[%s10732_s1 + $0x8e4] ss:$16 sps:$4 sm:$0xff]   ;;  %v7460_v38 = vld [vmem:[%s10732_s1 + $0x8ec] ss:$16 sps:$4 sm:$0xff]  }
  0xe0   :  { %5051 = vmatprep.subr.bf16.mxu0 %v7364_v39  ;;  %5610 = vmatprep.subr.bf16.mxu1 %v7367_v40  ;;  %v7455_v39 = vld [vmem:[%s10732_s1 + $0x8e0] ss:$16 sps:$4 sm:$0xff]   ;;  %v7458_v40 = vld [vmem:[%s10732_s1 + $0x8e8] ss:$16 sps:$4 sm:$0xff]  }
  0xe3   :  { %5052 = vmatpush1.bf16.msra.mxu0 %v7362_v41  ;;  %5611 = vmatpush1.bf16.msra.mxu1 %v7365_v42  ;;  %v7463_v41 = vld [vmem:[%s10732_s1 + $0x904] ss:$16 sps:$4 sm:$0xff]   ;;  %v7466_v42 = vld [vmem:[%s10732_s1 + $0x90c] ss:$16 sps:$4 sm:$0xff]  }
  0xe4   :  { %5053 = vmatprep.subr.bf16.mxu0 %v7370_v43  ;;  %5612 = vmatprep.subr.bf16.mxu1 %v7373_v44  ;;  %v7461_v43 = vld [vmem:[%s10732_s1 + $0x900] ss:$16 sps:$4 sm:$0xff]   ;;  %v7464_v44 = vld [vmem:[%s10732_s1 + $0x908] ss:$16 sps:$4 sm:$0xff]  }
  0xe7   :  { %5054 = vmatpush1.bf16.msra.mxu0 %v7368_v45  ;;  %5613 = vmatpush1.bf16.msra.mxu1 %v7371_v46  ;;  %v7469_v45 = vld [vmem:[%s10732_s1 + $0x924] ss:$16 sps:$4 sm:$0xff]   ;;  %v7472_v46 = vld [vmem:[%s10732_s1 + $0x92c] ss:$16 sps:$4 sm:$0xff]  }
  0xe8   :  { %5055 = vmatprep.subr.bf16.mxu0 %v7376_v47  ;;  %5614 = vmatprep.subr.bf16.mxu1 %v7379_v48  ;;  %v7467_v47 = vld [vmem:[%s10732_s1 + $0x920] ss:$16 sps:$4 sm:$0xff]   ;;  %v7470_v48 = vld [vmem:[%s10732_s1 + $0x928] ss:$16 sps:$4 sm:$0xff]  }
  0xeb   :  { %5056 = vmatpush1.bf16.msra.mxu0 %v7374_v49  ;;  %5615 = vmatpush1.bf16.msra.mxu1 %v7377_v50  ;;  %v7475_v49 = vld [vmem:[%s10732_s1 + $0x944] ss:$16 sps:$4 sm:$0xff]   ;;  %v7478_v50 = vld [vmem:[%s10732_s1 + $0x94c] ss:$16 sps:$4 sm:$0xff]  }
  0xec   :  { %5057 = vmatprep.subr.bf16.mxu0 %v7382_v51  ;;  %5616 = vmatprep.subr.bf16.mxu1 %v7385_v52  ;;  %v7473_v51 = vld [vmem:[%s10732_s1 + $0x940] ss:$16 sps:$4 sm:$0xff]   ;;  %v7476_v52 = vld [vmem:[%s10732_s1 + $0x948] ss:$16 sps:$4 sm:$0xff]  }
  0xef   :  { %5058 = vmatpush1.bf16.msra.mxu0 %v7380_v53  ;;  %5617 = vmatpush1.bf16.msra.mxu1 %v7383_v54  ;;  %v7481_v53 = vld [vmem:[%s10732_s1 + $0x964] ss:$16 sps:$4 sm:$0xff]   ;;  %v7484_v54 = vld [vmem:[%s10732_s1 + $0x96c] ss:$16 sps:$4 sm:$0xff]  }
  0xf0   :  { %5059 = vmatprep.subr.bf16.mxu0 %v7388_v55  ;;  %5618 = vmatprep.subr.bf16.mxu1 %v7391_v56  ;;  %v7479_v55 = vld [vmem:[%s10732_s1 + $0x960] ss:$16 sps:$4 sm:$0xff]   ;;  %v7482_v56 = vld [vmem:[%s10732_s1 + $0x968] ss:$16 sps:$4 sm:$0xff]  }
  0xf3   :  { %5060 = vmatpush1.bf16.msra.mxu0 %v7386_v57  ;;  %5619 = vmatpush1.bf16.msra.mxu1 %v7389_v58  ;;  %v7487_v57 = vld [vmem:[%s10732_s1 + $0x984] ss:$16 sps:$4 sm:$0xff]   ;;  %v7490_v58 = vld [vmem:[%s10732_s1 + $0x98c] ss:$16 sps:$4 sm:$0xff]  }
  0xf4   :  { %5061 = vmatprep.subr.bf16.mxu0 %v7394_v59  ;;  %5620 = vmatprep.subr.bf16.mxu1 %v7397_v60  ;;  %v7485_v59 = vld [vmem:[%s10732_s1 + $0x980] ss:$16 sps:$4 sm:$0xff]   ;;  %v7488_v60 = vld [vmem:[%s10732_s1 + $0x988] ss:$16 sps:$4 sm:$0xff]  }
  0xf7   :  { %5062 = vmatpush1.bf16.msra.mxu0 %v7392_v61  ;;  %5621 = vmatpush1.bf16.msra.mxu1 %v7395_v62  ;;  %v7493_v61 = vld [vmem:[%s10732_s1 + $0x9a4] ss:$16 sps:$4 sm:$0xff]   ;;  %v7496_v62 = vld [vmem:[%s10732_s1 + $0x9ac] ss:$16 sps:$4 sm:$0xff]  }
  0xf8   :  { %5063 = vmatprep.subr.bf16.mxu0 %v7400_v63  ;;  %5622 = vmatprep.subr.bf16.mxu1 %v7403_v0  ;;  %v7491_v63 = vld [vmem:[%s10732_s1 + $0x9a0] ss:$16 sps:$4 sm:$0xff]   ;;  %v7494_v0 = vld [vmem:[%s10732_s1 + $0x9a8] ss:$16 sps:$4 sm:$0xff]  }
  0xfb   :  { %5064 = vmatpush1.bf16.msra.mxu0 %v7398_v1  ;;  %5623 = vmatpush1.bf16.msra.mxu1 %v7401_v2  ;;  %v7499_v1 = vld [vmem:[%s10732_s1 + $0x9c4] ss:$16 sps:$4 sm:$0xff]   ;;  %v7502_v2 = vld [vmem:[%s10732_s1 + $0x9cc] ss:$16 sps:$4 sm:$0xff]  }
  0xfc   :  { %5065 = vmatprep.subr.bf16.mxu0 %v7406_v3  ;;  %5624 = vmatprep.subr.bf16.mxu1 %v7409_v4  ;;  %v7497_v3 = vld [vmem:[%s10732_s1 + $0x9c0] ss:$16 sps:$4 sm:$0xff]   ;;  %v7500_v4 = vld [vmem:[%s10732_s1 + $0x9c8] ss:$16 sps:$4 sm:$0xff]  }
  0xff   :  { %5066 = vmatpush1.bf16.msra.mxu0 %v7404_v5  ;;  %5625 = vmatpush1.bf16.msra.mxu1 %v7407_v6  ;;  %v7505_v5 = vld [vmem:[%s10732_s1 + $0x9e4] ss:$16 sps:$4 sm:$0xff]   ;;  %v7508_v6 = vld [vmem:[%s10732_s1 + $0x9ec] ss:$16 sps:$4 sm:$0xff]  }
 0x100   :  { %5078 = vmatprep.subr.bf16.mxu0 %v7415_v7  ;;  %5637 = vmatprep.subr.bf16.mxu1 %v7418_v8  ;;  %v7503_v7 = vld [vmem:[%s10732_s1 + $0x9e0] ss:$16 sps:$4 sm:$0xff]   ;;  %v7506_v8 = vld [vmem:[%s10732_s1 + $0x9e8] ss:$16 sps:$4 sm:$0xff]  }
 0x102   :  { %5068 = vmatmul.mubr.bf16.vlgmr.msra.gmra.mrb[0].mxu0 %v7410_v9  ;;  %5627 = vmatmul.mubr.bf16.vlgmr.msra.gmra.mrb[0].mxu1 %v7410_v9  ;;  %v7509_v9 = vld [vmem:[%s10733_s0 + $0x20] ss:$100 sps:$4 sm:$0xff]  }
 0x103   :  { %5079 = vmatpush1.bf16.msra.mxu0 %v7413_v10  ;;  %5638 = vmatpush1.bf16.msra.mxu1 %v7416_v11  ;;  %v7514_v10 = vld [vmem:[%s10732_s1 + $0xa04] ss:$16 sps:$4 sm:$0xff]   ;;  %v7517_v11 = vld [vmem:[%s10732_s1 + $0xa0c] ss:$16 sps:$4 sm:$0xff]  }
 0x104   :  { %5080 = vmatprep.subr.bf16.mxu0 %v7421_v12  ;;  %5639 = vmatprep.subr.bf16.mxu1 %v7424_v13  ;;  %v7512_v12 = vld [vmem:[%s10732_s1 + $0xa00] ss:$16 sps:$4 sm:$0xff]   ;;  %v7515_v13 = vld [vmem:[%s10732_s1 + $0xa08] ss:$16 sps:$4 sm:$0xff]  }
 0x105   :  { %5110 = vmatprep.mubr.bf16.mxu0 %v7511_v14  ;;  %5669 = vmatprep.mubr.bf16.mxu1 %v7511_v14  ;;  %v7520_v14 = vld [vmem:[%s10732_s1 + $0xa24] ss:$16 sps:$4 sm:$0xff]  }
 0x107   :  { %5081 = vmatpush1.bf16.msra.mxu0 %v7419_v15  ;;  %5640 = vmatpush1.bf16.msra.mxu1 %v7422_v16  ;;  %v7523_v15 = vld [vmem:[%s10732_s1 + $0xa2c] ss:$16 sps:$4 sm:$0xff]  }
 0x108   :  { %5082 = vmatprep.subr.bf16.mxu0 %v7427_v17  ;;  %5641 = vmatprep.subr.bf16.mxu1 %v7430_v18  ;;  %v7610_v16 = vld [vmem:[%s10733_s0 + $0x2c] ss:$100 sps:$4 sm:$0xff]   ;;  %v7521_v18 = vld [vmem:[%s10732_s1 + $0xa28] ss:$16 sps:$4 sm:$0xff]  }
 0x109   :  { %v7518_v17 = vld [vmem:[%s10732_s1 + $0xa20] ss:$16 sps:$4 sm:$0xff]  }
 0x10b   :  { %5083 = vmatpush1.bf16.msra.mxu0 %v7425_v19  ;;  %5642 = vmatpush1.bf16.msra.mxu1 %v7428_v20  ;;  %v7526_v19 = vld [vmem:[%s10732_s1 + $0xa44] ss:$16 sps:$4 sm:$0xff]   ;;  %v7529_v20 = vld [vmem:[%s10732_s1 + $0xa4c] ss:$16 sps:$4 sm:$0xff]  }
 0x10c   :  { %5084 = vmatprep.subr.bf16.mxu0 %v7433_v21  ;;  %5643 = vmatprep.subr.bf16.mxu1 %v7436_v22  ;;  %v7524_v21 = vld [vmem:[%s10732_s1 + $0xa40] ss:$16 sps:$4 sm:$0xff]   ;;  %v7527_v22 = vld [vmem:[%s10732_s1 + $0xa48] ss:$16 sps:$4 sm:$0xff]  }
 0x10f   :  { %5085 = vmatpush1.bf16.msra.mxu0 %v7431_v23  ;;  %5644 = vmatpush1.bf16.msra.mxu1 %v7434_v24  ;;  %v7532_v23 = vld [vmem:[%s10732_s1 + $0xa64] ss:$16 sps:$4 sm:$0xff]   ;;  %v7535_v24 = vld [vmem:[%s10732_s1 + $0xa6c] ss:$16 sps:$4 sm:$0xff]  }
 0x110   :  { %5086 = vmatprep.subr.bf16.mxu0 %v7439_v25  ;;  %5645 = vmatprep.subr.bf16.mxu1 %v7442_v26  ;;  %v7530_v25 = vld [vmem:[%s10732_s1 + $0xa60] ss:$16 sps:$4 sm:$0xff]   ;;  %v7533_v26 = vld [vmem:[%s10732_s1 + $0xa68] ss:$16 sps:$4 sm:$0xff]  }
 0x113   :  { %5087 = vmatpush1.bf16.msra.mxu0 %v7437_v27  ;;  %5646 = vmatpush1.bf16.msra.mxu1 %v7440_v28  ;;  %v7538_v27 = vld [vmem:[%s10732_s1 + $0xa84] ss:$16 sps:$4 sm:$0xff]   ;;  %v7541_v28 = vld [vmem:[%s10732_s1 + $0xa8c] ss:$16 sps:$4 sm:$0xff]  }
 0x114   :  { %5088 = vmatprep.subr.bf16.mxu0 %v7445_v29  ;;  %5647 = vmatprep.subr.bf16.mxu1 %v7448_v30  ;;  %v7536_v29 = vld [vmem:[%s10732_s1 + $0xa80] ss:$16 sps:$4 sm:$0xff]   ;;  %v7539_v30 = vld [vmem:[%s10732_s1 + $0xa88] ss:$16 sps:$4 sm:$0xff]  }
 0x117   :  { %5089 = vmatpush1.bf16.msra.mxu0 %v7443_v31  ;;  %5648 = vmatpush1.bf16.msra.mxu1 %v7446_v32  ;;  %v7544_v31 = vld [vmem:[%s10732_s1 + $0xaa4] ss:$16 sps:$4 sm:$0xff]   ;;  %v7547_v32 = vld [vmem:[%s10732_s1 + $0xaac] ss:$16 sps:$4 sm:$0xff]  }
 0x118   :  { %5090 = vmatprep.subr.bf16.mxu0 %v7451_v33  ;;  %5649 = vmatprep.subr.bf16.mxu1 %v7454_v34  ;;  %v7542_v33 = vld [vmem:[%s10732_s1 + $0xaa0] ss:$16 sps:$4 sm:$0xff]   ;;  %v7545_v34 = vld [vmem:[%s10732_s1 + $0xaa8] ss:$16 sps:$4 sm:$0xff]  }
 0x11b   :  { %5091 = vmatpush1.bf16.msra.mxu0 %v7449_v35  ;;  %5650 = vmatpush1.bf16.msra.mxu1 %v7452_v36  ;;  %v7550_v35 = vld [vmem:[%s10732_s1 + $0xac4] ss:$16 sps:$4 sm:$0xff]   ;;  %v7553_v36 = vld [vmem:[%s10732_s1 + $0xacc] ss:$16 sps:$4 sm:$0xff]  }
 0x11c   :  { %5092 = vmatprep.subr.bf16.mxu0 %v7457_v37  ;;  %5651 = vmatprep.subr.bf16.mxu1 %v7460_v38  ;;  %v7548_v37 = vld [vmem:[%s10732_s1 + $0xac0] ss:$16 sps:$4 sm:$0xff]   ;;  %v7551_v38 = vld [vmem:[%s10732_s1 + $0xac8] ss:$16 sps:$4 sm:$0xff]  }
 0x11f   :  { %5093 = vmatpush1.bf16.msra.mxu0 %v7455_v39  ;;  %5652 = vmatpush1.bf16.msra.mxu1 %v7458_v40  ;;  %v7556_v39 = vld [vmem:[%s10732_s1 + $0xae4] ss:$16 sps:$4 sm:$0xff]   ;;  %v7559_v40 = vld [vmem:[%s10732_s1 + $0xaec] ss:$16 sps:$4 sm:$0xff]  }
 0x120   :  { %5094 = vmatprep.subr.bf16.mxu0 %v7463_v41  ;;  %5653 = vmatprep.subr.bf16.mxu1 %v7466_v42  ;;  %v7554_v41 = vld [vmem:[%s10732_s1 + $0xae0] ss:$16 sps:$4 sm:$0xff]   ;;  %v7557_v42 = vld [vmem:[%s10732_s1 + $0xae8] ss:$16 sps:$4 sm:$0xff]  }
 0x123   :  { %5095 = vmatpush1.bf16.msra.mxu0 %v7461_v43  ;;  %5654 = vmatpush1.bf16.msra.mxu1 %v7464_v44  ;;  %v7562_v43 = vld [vmem:[%s10732_s1 + $0xb04] ss:$16 sps:$4 sm:$0xff]   ;;  %v7565_v44 = vld [vmem:[%s10732_s1 + $0xb0c] ss:$16 sps:$4 sm:$0xff]  }
 0x124   :  { %5096 = vmatprep.subr.bf16.mxu0 %v7469_v45  ;;  %5655 = vmatprep.subr.bf16.mxu1 %v7472_v46  ;;  %v7560_v45 = vld [vmem:[%s10732_s1 + $0xb00] ss:$16 sps:$4 sm:$0xff]   ;;  %v7563_v46 = vld [vmem:[%s10732_s1 + $0xb08] ss:$16 sps:$4 sm:$0xff]  }
 0x127   :  { %5097 = vmatpush1.bf16.msra.mxu0 %v7467_v47  ;;  %5656 = vmatpush1.bf16.msra.mxu1 %v7470_v48  ;;  %v7568_v47 = vld [vmem:[%s10732_s1 + $0xb24] ss:$16 sps:$4 sm:$0xff]   ;;  %v7571_v48 = vld [vmem:[%s10732_s1 + $0xb2c] ss:$16 sps:$4 sm:$0xff]  }
 0x128   :  { %5098 = vmatprep.subr.bf16.mxu0 %v7475_v49  ;;  %5657 = vmatprep.subr.bf16.mxu1 %v7478_v50  ;;  %v7566_v49 = vld [vmem:[%s10732_s1 + $0xb20] ss:$16 sps:$4 sm:$0xff]   ;;  %v7569_v50 = vld [vmem:[%s10732_s1 + $0xb28] ss:$16 sps:$4 sm:$0xff]  }
 0x12b   :  { %5099 = vmatpush1.bf16.msra.mxu0 %v7473_v51  ;;  %5658 = vmatpush1.bf16.msra.mxu1 %v7476_v52  ;;  %v7574_v51 = vld [vmem:[%s10732_s1 + $0xb44] ss:$16 sps:$4 sm:$0xff]   ;;  %v7577_v52 = vld [vmem:[%s10732_s1 + $0xb4c] ss:$16 sps:$4 sm:$0xff]  }
 0x12c   :  { %5100 = vmatprep.subr.bf16.mxu0 %v7481_v53  ;;  %5659 = vmatprep.subr.bf16.mxu1 %v7484_v54  ;;  %v7572_v53 = vld [vmem:[%s10732_s1 + $0xb40] ss:$16 sps:$4 sm:$0xff]   ;;  %v7575_v54 = vld [vmem:[%s10732_s1 + $0xb48] ss:$16 sps:$4 sm:$0xff]  }
 0x12f   :  { %5101 = vmatpush1.bf16.msra.mxu0 %v7479_v55  ;;  %5660 = vmatpush1.bf16.msra.mxu1 %v7482_v56  ;;  %v7580_v55 = vld [vmem:[%s10732_s1 + $0xb64] ss:$16 sps:$4 sm:$0xff]   ;;  %v7583_v56 = vld [vmem:[%s10732_s1 + $0xb6c] ss:$16 sps:$4 sm:$0xff]  }
 0x130   :  { %5102 = vmatprep.subr.bf16.mxu0 %v7487_v57  ;;  %5661 = vmatprep.subr.bf16.mxu1 %v7490_v58  ;;  %v7578_v57 = vld [vmem:[%s10732_s1 + $0xb60] ss:$16 sps:$4 sm:$0xff]   ;;  %v7581_v58 = vld [vmem:[%s10732_s1 + $0xb68] ss:$16 sps:$4 sm:$0xff]  }
 0x133   :  { %5103 = vmatpush1.bf16.msra.mxu0 %v7485_v59  ;;  %5662 = vmatpush1.bf16.msra.mxu1 %v7488_v60  ;;  %v7586_v59 = vld [vmem:[%s10732_s1 + $0xb84] ss:$16 sps:$4 sm:$0xff]   ;;  %v7589_v60 = vld [vmem:[%s10732_s1 + $0xb8c] ss:$16 sps:$4 sm:$0xff]  }
 0x134   :  { %5104 = vmatprep.subr.bf16.mxu0 %v7493_v61  ;;  %5663 = vmatprep.subr.bf16.mxu1 %v7496_v62  ;;  %v7584_v61 = vld [vmem:[%s10732_s1 + $0xb80] ss:$16 sps:$4 sm:$0xff]   ;;  %v7587_v62 = vld [vmem:[%s10732_s1 + $0xb88] ss:$16 sps:$4 sm:$0xff]  }
 0x137   :  { %5105 = vmatpush1.bf16.msra.mxu0 %v7491_v63  ;;  %5664 = vmatpush1.bf16.msra.mxu1 %v7494_v0  ;;  %v7592_v63 = vld [vmem:[%s10732_s1 + $0xba4] ss:$16 sps:$4 sm:$0xff]   ;;  %v7595_v0 = vld [vmem:[%s10732_s1 + $0xbac] ss:$16 sps:$4 sm:$0xff]  }
 0x138   :  { %5106 = vmatprep.subr.bf16.mxu0 %v7499_v1  ;;  %5665 = vmatprep.subr.bf16.mxu1 %v7502_v2  ;;  %v7590_v1 = vld [vmem:[%s10732_s1 + $0xba0] ss:$16 sps:$4 sm:$0xff]   ;;  %v7593_v2 = vld [vmem:[%s10732_s1 + $0xba8] ss:$16 sps:$4 sm:$0xff]  }
 0x13b   :  { %5107 = vmatpush1.bf16.msra.mxu0 %v7497_v3  ;;  %5666 = vmatpush1.bf16.msra.mxu1 %v7500_v4  ;;  %v7598_v3 = vld [vmem:[%s10732_s1 + $0xbc4] ss:$16 sps:$4 sm:$0xff]   ;;  %v7601_v4 = vld [vmem:[%s10732_s1 + $0xbcc] ss:$16 sps:$4 sm:$0xff]  }
 0x13c   :  { %5108 = vmatprep.subr.bf16.mxu0 %v7505_v5  ;;  %5667 = vmatprep.subr.bf16.mxu1 %v7508_v6  ;;  %v7596_v5 = vld [vmem:[%s10732_s1 + $0xbc0] ss:$16 sps:$4 sm:$0xff]   ;;  %v7599_v6 = vld [vmem:[%s10732_s1 + $0xbc8] ss:$16 sps:$4 sm:$0xff]  }
 0x13f   :  { %5109 = vmatpush1.bf16.msra.mxu0 %v7503_v7  ;;  %5668 = vmatpush1.bf16.msra.mxu1 %v7506_v8  ;;  %v7604_v7 = vld [vmem:[%s10732_s1 + $0xbe4] ss:$16 sps:$4 sm:$0xff]   ;;  %v7607_v8 = vld [vmem:[%s10732_s1 + $0xbec] ss:$16 sps:$4 sm:$0xff]  }
 0x140   :  { %5121 = vmatprep.subr.bf16.mxu0 %v7514_v10  ;;  %5680 = vmatprep.subr.bf16.mxu1 %v7517_v11  ;;  %v7605_v10 = vld [vmem:[%s10732_s1 + $0xbe8] ss:$16 sps:$4 sm:$0xff]  }
 0x141   :  { %v7608_v11 = vld [vmem:[%s10733_s0 + $0x28] ss:$100 sps:$4 sm:$0xff]  }
 0x142   :  { %5111 = vmatmul.mubr.bf16.vlgmr.msra.gmra.mrb[0].mxu0 %v7509_v9  ;;  %5670 = vmatmul.mubr.bf16.vlgmr.msra.gmra.mrb[0].mxu1 %v7509_v9  ;;  %v7602_v9 = vld [vmem:[%s10732_s1 + $0xbe0] ss:$16 sps:$4 sm:$0xff]  }
 0x143   :  { %5122 = vmatpush1.bf16.msra.mxu0 %v7512_v12  ;;  %5681 = vmatpush1.bf16.msra.mxu1 %v7515_v13  ;;  %v7613_v12 = vld [vmem:[%s10732_s1 + $0xc04] ss:$16 sps:$4 sm:$0xff]   ;;  %v7616_v13 = vld [vmem:[%s10732_s1 + $0xc0c] ss:$16 sps:$4 sm:$0xff]  }
 0x144   :  { %5123 = vmatprep.subr.bf16.mxu0 %v7520_v14  ;;  %5682 = vmatprep.subr.bf16.mxu1 %v7523_v15  ;;  %v7611_v14 = vld [vmem:[%s10732_s1 + $0xc00] ss:$16 sps:$4 sm:$0xff]   ;;  %v7614_v15 = vld [vmem:[%s10732_s1 + $0xc08] ss:$16 sps:$4 sm:$0xff]  }
 0x145   :  { %5153 = vmatprep.mubr.bf16.mxu0 %v7610_v16  ;;  %5712 = vmatprep.mubr.bf16.mxu1 %v7610_v16  ;;  %v7619_v16 = vld [vmem:[%s10732_s1 + $0xc24] ss:$16 sps:$4 sm:$0xff]  }
 0x147   :  { %5124 = vmatpush1.bf16.msra.mxu0 %v7518_v17  ;;  %5683 = vmatpush1.bf16.msra.mxu1 %v7521_v18  ;;  %v7622_v17 = vld [vmem:[%s10732_s1 + $0xc2c] ss:$16 sps:$4 sm:$0xff]   ;;  %v7709_v18 = vld [vmem:[%s10733_s0 + $0x34] ss:$100 sps:$4 sm:$0xff]  }
 0x148   :  { %5125 = vmatprep.subr.bf16.mxu0 %v7526_v19  ;;  %5684 = vmatprep.subr.bf16.mxu1 %v7529_v20  ;;  %v7617_v19 = vld [vmem:[%s10732_s1 + $0xc20] ss:$16 sps:$4 sm:$0xff]   ;;  %v7620_v20 = vld [vmem:[%s10732_s1 + $0xc28] ss:$16 sps:$4 sm:$0xff]  }
 0x14b   :  { %5126 = vmatpush1.bf16.msra.mxu0 %v7524_v21  ;;  %5685 = vmatpush1.bf16.msra.mxu1 %v7527_v22  ;;  %v7625_v21 = vld [vmem:[%s10732_s1 + $0xc44] ss:$16 sps:$4 sm:$0xff]   ;;  %v7628_v22 = vld [vmem:[%s10732_s1 + $0xc4c] ss:$16 sps:$4 sm:$0xff]  }
 0x14c   :  { %5127 = vmatprep.subr.bf16.mxu0 %v7532_v23  ;;  %5686 = vmatprep.subr.bf16.mxu1 %v7535_v24  ;;  %v7623_v23 = vld [vmem:[%s10732_s1 + $0xc40] ss:$16 sps:$4 sm:$0xff]   ;;  %v7626_v24 = vld [vmem:[%s10732_s1 + $0xc48] ss:$16 sps:$4 sm:$0xff]  }
 0x14f   :  { %5128 = vmatpush1.bf16.msra.mxu0 %v7530_v25  ;;  %5687 = vmatpush1.bf16.msra.mxu1 %v7533_v26  ;;  %v7631_v25 = vld [vmem:[%s10732_s1 + $0xc64] ss:$16 sps:$4 sm:$0xff]   ;;  %v7634_v26 = vld [vmem:[%s10732_s1 + $0xc6c] ss:$16 sps:$4 sm:$0xff]  }
 0x150   :  { %5129 = vmatprep.subr.bf16.mxu0 %v7538_v27  ;;  %5688 = vmatprep.subr.bf16.mxu1 %v7541_v28  ;;  %v7629_v27 = vld [vmem:[%s10732_s1 + $0xc60] ss:$16 sps:$4 sm:$0xff]   ;;  %v7632_v28 = vld [vmem:[%s10732_s1 + $0xc68] ss:$16 sps:$4 sm:$0xff]  }
 0x153   :  { %5130 = vmatpush1.bf16.msra.mxu0 %v7536_v29  ;;  %5689 = vmatpush1.bf16.msra.mxu1 %v7539_v30  ;;  %v7637_v29 = vld [vmem:[%s10732_s1 + $0xc84] ss:$16 sps:$4 sm:$0xff]   ;;  %v7640_v30 = vld [vmem:[%s10732_s1 + $0xc8c] ss:$16 sps:$4 sm:$0xff]  }
 0x154   :  { %5131 = vmatprep.subr.bf16.mxu0 %v7544_v31  ;;  %5690 = vmatprep.subr.bf16.mxu1 %v7547_v32  ;;  %v7635_v31 = vld [vmem:[%s10732_s1 + $0xc80] ss:$16 sps:$4 sm:$0xff]   ;;  %v7638_v32 = vld [vmem:[%s10732_s1 + $0xc88] ss:$16 sps:$4 sm:$0xff]  }
 0x157   :  { %5132 = vmatpush1.bf16.msra.mxu0 %v7542_v33  ;;  %5691 = vmatpush1.bf16.msra.mxu1 %v7545_v34  ;;  %v7643_v33 = vld [vmem:[%s10732_s1 + $0xca4] ss:$16 sps:$4 sm:$0xff]   ;;  %v7646_v34 = vld [vmem:[%s10732_s1 + $0xcac] ss:$16 sps:$4 sm:$0xff]  }
 0x158   :  { %5133 = vmatprep.subr.bf16.mxu0 %v7550_v35  ;;  %5692 = vmatprep.subr.bf16.mxu1 %v7553_v36  ;;  %v7641_v35 = vld [vmem:[%s10732_s1 + $0xca0] ss:$16 sps:$4 sm:$0xff]   ;;  %v7644_v36 = vld [vmem:[%s10732_s1 + $0xca8] ss:$16 sps:$4 sm:$0xff]  }
 0x15b   :  { %5134 = vmatpush1.bf16.msra.mxu0 %v7548_v37  ;;  %5693 = vmatpush1.bf16.msra.mxu1 %v7551_v38  ;;  %v7649_v37 = vld [vmem:[%s10732_s1 + $0xcc4] ss:$16 sps:$4 sm:$0xff]   ;;  %v7652_v38 = vld [vmem:[%s10732_s1 + $0xccc] ss:$16 sps:$4 sm:$0xff]  }
 0x15c   :  { %5135 = vmatprep.subr.bf16.mxu0 %v7556_v39  ;;  %5694 = vmatprep.subr.bf16.mxu1 %v7559_v40  ;;  %v7647_v39 = vld [vmem:[%s10732_s1 + $0xcc0] ss:$16 sps:$4 sm:$0xff]   ;;  %v7650_v40 = vld [vmem:[%s10732_s1 + $0xcc8] ss:$16 sps:$4 sm:$0xff]  }
 0x15f   :  { %5136 = vmatpush1.bf16.msra.mxu0 %v7554_v41  ;;  %5695 = vmatpush1.bf16.msra.mxu1 %v7557_v42  ;;  %v7655_v41 = vld [vmem:[%s10732_s1 + $0xce4] ss:$16 sps:$4 sm:$0xff]   ;;  %v7658_v42 = vld [vmem:[%s10732_s1 + $0xcec] ss:$16 sps:$4 sm:$0xff]  }
 0x160   :  { %5137 = vmatprep.subr.bf16.mxu0 %v7562_v43  ;;  %5696 = vmatprep.subr.bf16.mxu1 %v7565_v44  ;;  %v7653_v43 = vld [vmem:[%s10732_s1 + $0xce0] ss:$16 sps:$4 sm:$0xff]   ;;  %v7656_v44 = vld [vmem:[%s10732_s1 + $0xce8] ss:$16 sps:$4 sm:$0xff]  }
 0x163   :  { %5138 = vmatpush1.bf16.msra.mxu0 %v7560_v45  ;;  %5697 = vmatpush1.bf16.msra.mxu1 %v7563_v46  ;;  %v7661_v45 = vld [vmem:[%s10732_s1 + $0xd04] ss:$16 sps:$4 sm:$0xff]   ;;  %v7664_v46 = vld [vmem:[%s10732_s1 + $0xd0c] ss:$16 sps:$4 sm:$0xff]  }
 0x164   :  { %5139 = vmatprep.subr.bf16.mxu0 %v7568_v47  ;;  %5698 = vmatprep.subr.bf16.mxu1 %v7571_v48  ;;  %v7659_v47 = vld [vmem:[%s10732_s1 + $0xd00] ss:$16 sps:$4 sm:$0xff]   ;;  %v7662_v48 = vld [vmem:[%s10732_s1 + $0xd08] ss:$16 sps:$4 sm:$0xff]  }
 0x167   :  { %5140 = vmatpush1.bf16.msra.mxu0 %v7566_v49  ;;  %5699 = vmatpush1.bf16.msra.mxu1 %v7569_v50  ;;  %v7667_v49 = vld [vmem:[%s10732_s1 + $0xd24] ss:$16 sps:$4 sm:$0xff]   ;;  %v7670_v50 = vld [vmem:[%s10732_s1 + $0xd2c] ss:$16 sps:$4 sm:$0xff]  }
 0x168   :  { %5141 = vmatprep.subr.bf16.mxu0 %v7574_v51  ;;  %5700 = vmatprep.subr.bf16.mxu1 %v7577_v52  ;;  %v7665_v51 = vld [vmem:[%s10732_s1 + $0xd20] ss:$16 sps:$4 sm:$0xff]   ;;  %v7668_v52 = vld [vmem:[%s10732_s1 + $0xd28] ss:$16 sps:$4 sm:$0xff]  }
 0x16b   :  { %5142 = vmatpush1.bf16.msra.mxu0 %v7572_v53  ;;  %5701 = vmatpush1.bf16.msra.mxu1 %v7575_v54  ;;  %v7673_v53 = vld [vmem:[%s10732_s1 + $0xd44] ss:$16 sps:$4 sm:$0xff]   ;;  %v7676_v54 = vld [vmem:[%s10732_s1 + $0xd4c] ss:$16 sps:$4 sm:$0xff]  }
 0x16c   :  { %5143 = vmatprep.subr.bf16.mxu0 %v7580_v55  ;;  %5702 = vmatprep.subr.bf16.mxu1 %v7583_v56  ;;  %v7671_v55 = vld [vmem:[%s10732_s1 + $0xd40] ss:$16 sps:$4 sm:$0xff]   ;;  %v7674_v56 = vld [vmem:[%s10732_s1 + $0xd48] ss:$16 sps:$4 sm:$0xff]  }
 0x16f   :  { %5144 = vmatpush1.bf16.msra.mxu0 %v7578_v57  ;;  %5703 = vmatpush1.bf16.msra.mxu1 %v7581_v58  ;;  %v7679_v57 = vld [vmem:[%s10732_s1 + $0xd64] ss:$16 sps:$4 sm:$0xff]   ;;  %v7682_v58 = vld [vmem:[%s10732_s1 + $0xd6c] ss:$16 sps:$4 sm:$0xff]  }
 0x170   :  { %5145 = vmatprep.subr.bf16.mxu0 %v7586_v59  ;;  %5704 = vmatprep.subr.bf16.mxu1 %v7589_v60  ;;  %v7677_v59 = vld [vmem:[%s10732_s1 + $0xd60] ss:$16 sps:$4 sm:$0xff]   ;;  %v7680_v60 = vld [vmem:[%s10732_s1 + $0xd68] ss:$16 sps:$4 sm:$0xff]  }
 0x173   :  { %5146 = vmatpush1.bf16.msra.mxu0 %v7584_v61  ;;  %5705 = vmatpush1.bf16.msra.mxu1 %v7587_v62  ;;  %v7685_v61 = vld [vmem:[%s10732_s1 + $0xd84] ss:$16 sps:$4 sm:$0xff]   ;;  %v7688_v62 = vld [vmem:[%s10732_s1 + $0xd8c] ss:$16 sps:$4 sm:$0xff]  }
 0x174   :  { %5147 = vmatprep.subr.bf16.mxu0 %v7592_v63  ;;  %5706 = vmatprep.subr.bf16.mxu1 %v7595_v0  ;;  %v7683_v63 = vld [vmem:[%s10732_s1 + $0xd80] ss:$16 sps:$4 sm:$0xff]   ;;  %v7686_v0 = vld [vmem:[%s10732_s1 + $0xd88] ss:$16 sps:$4 sm:$0xff]  }
 0x177   :  { %5148 = vmatpush1.bf16.msra.mxu0 %v7590_v1  ;;  %5707 = vmatpush1.bf16.msra.mxu1 %v7593_v2  ;;  %v7691_v1 = vld [vmem:[%s10732_s1 + $0xda4] ss:$16 sps:$4 sm:$0xff]   ;;  %v7694_v2 = vld [vmem:[%s10732_s1 + $0xdac] ss:$16 sps:$4 sm:$0xff]  }
 0x178   :  { %5149 = vmatprep.subr.bf16.mxu0 %v7598_v3  ;;  %5708 = vmatprep.subr.bf16.mxu1 %v7601_v4  ;;  %v7689_v3 = vld [vmem:[%s10732_s1 + $0xda0] ss:$16 sps:$4 sm:$0xff]   ;;  %v7692_v4 = vld [vmem:[%s10732_s1 + $0xda8] ss:$16 sps:$4 sm:$0xff]  }
 0x17b   :  { %5150 = vmatpush1.bf16.msra.mxu0 %v7596_v5  ;;  %5709 = vmatpush1.bf16.msra.mxu1 %v7599_v6  ;;  %v7697_v5 = vld [vmem:[%s10732_s1 + $0xdc4] ss:$16 sps:$4 sm:$0xff]   ;;  %v7700_v6 = vld [vmem:[%s10732_s1 + $0xdcc] ss:$16 sps:$4 sm:$0xff]  }
 0x17c   :  { %5151 = vmatprep.subr.bf16.mxu0 %v7604_v7  ;;  %5710 = vmatprep.subr.bf16.mxu1 %v7607_v8  ;;  %v7695_v7 = vld [vmem:[%s10732_s1 + $0xdc0] ss:$16 sps:$4 sm:$0xff]   ;;  %v7698_v8 = vld [vmem:[%s10732_s1 + $0xdc8] ss:$16 sps:$4 sm:$0xff]  }
 0x17f   :  { %5152 = vmatpush1.bf16.msra.mxu0 %v7602_v9  ;;  %5711 = vmatpush1.bf16.msra.mxu1 %v7605_v10  ;;  %v7703_v9 = vld [vmem:[%s10732_s1 + $0xde4] ss:$16 sps:$4 sm:$0xff]   ;;  %v7706_v10 = vld [vmem:[%s10732_s1 + $0xdec] ss:$16 sps:$4 sm:$0xff]  }
 0x180   :  { %5164 = vmatprep.subr.bf16.mxu0 %v7613_v12  ;;  %5723 = vmatprep.subr.bf16.mxu1 %v7616_v13  ;;  %v7704_v12 = vld [vmem:[%s10732_s1 + $0xde8] ss:$16 sps:$4 sm:$0xff]   ;;  %v7707_v13 = vld [vmem:[%s10733_s0 + $0x30] ss:$100 sps:$4 sm:$0xff]  }
 0x182   :  { %5154 = vmatmul.mubr.bf16.vlgmr.msra.gmra.mrb[0].mxu0 %v7608_v11  ;;  %5713 = vmatmul.mubr.bf16.vlgmr.msra.gmra.mrb[0].mxu1 %v7608_v11  ;;  %v7701_v11 = vld [vmem:[%s10732_s1 + $0xde0] ss:$16 sps:$4 sm:$0xff]  }
 0x183   :  { %5165 = vmatpush1.bf16.msra.mxu0 %v7611_v14  ;;  %5724 = vmatpush1.bf16.msra.mxu1 %v7614_v15  ;;  %v7712_v14 = vld [vmem:[%s10732_s1 + $0xe04] ss:$16 sps:$4 sm:$0xff]   ;;  %v7715_v15 = vld [vmem:[%s10732_s1 + $0xe0c] ss:$16 sps:$4 sm:$0xff]  }
 0x184   :  { %5166 = vmatprep.subr.bf16.mxu0 %v7619_v16  ;;  %5725 = vmatprep.subr.bf16.mxu1 %v7622_v17  ;;  %v7710_v16 = vld [vmem:[%s10732_s1 + $0xe00] ss:$16 sps:$4 sm:$0xff]   ;;  %v7713_v17 = vld [vmem:[%s10732_s1 + $0xe08] ss:$16 sps:$4 sm:$0xff]  }
 0x185   :  { %5196 = vmatprep.mubr.bf16.mxu0 %v7709_v18  ;;  %5755 = vmatprep.mubr.bf16.mxu1 %v7709_v18  ;;  %v7718_v18 = vld [vmem:[%s10732_s1 + $0xe24] ss:$16 sps:$4 sm:$0xff]  }
 0x187   :  { %5167 = vmatpush1.bf16.msra.mxu0 %v7617_v19  ;;  %5726 = vmatpush1.bf16.msra.mxu1 %v7620_v20  ;;  %v7721_v19 = vld [vmem:[%s10732_s1 + $0xe2c] ss:$16 sps:$4 sm:$0xff]  }
 0x188   :  { %5168 = vmatprep.subr.bf16.mxu0 %v7625_v21  ;;  %5727 = vmatprep.subr.bf16.mxu1 %v7628_v22  ;;  %v7808_v20 = vld [vmem:[%s10733_s0 + $0x3c] ss:$100 sps:$4 sm:$0xff]   ;;  %v7719_v22 = vld [vmem:[%s10732_s1 + $0xe28] ss:$16 sps:$4 sm:$0xff]  }
 0x189   :  { %v7716_v21 = vld [vmem:[%s10732_s1 + $0xe20] ss:$16 sps:$4 sm:$0xff]  }
 0x18b   :  { %5169 = vmatpush1.bf16.msra.mxu0 %v7623_v23  ;;  %5728 = vmatpush1.bf16.msra.mxu1 %v7626_v24  ;;  %v7724_v23 = vld [vmem:[%s10732_s1 + $0xe44] ss:$16 sps:$4 sm:$0xff]   ;;  %v7727_v24 = vld [vmem:[%s10732_s1 + $0xe4c] ss:$16 sps:$4 sm:$0xff]  }
 0x18c   :  { %5170 = vmatprep.subr.bf16.mxu0 %v7631_v25  ;;  %5729 = vmatprep.subr.bf16.mxu1 %v7634_v26  ;;  %v7722_v25 = vld [vmem:[%s10732_s1 + $0xe40] ss:$16 sps:$4 sm:$0xff]   ;;  %v7725_v26 = vld [vmem:[%s10732_s1 + $0xe48] ss:$16 sps:$4 sm:$0xff]  }
 0x18f   :  { %5171 = vmatpush1.bf16.msra.mxu0 %v7629_v27  ;;  %5730 = vmatpush1.bf16.msra.mxu1 %v7632_v28  ;;  %v7730_v27 = vld [vmem:[%s10732_s1 + $0xe64] ss:$16 sps:$4 sm:$0xff]   ;;  %v7733_v28 = vld [vmem:[%s10732_s1 + $0xe6c] ss:$16 sps:$4 sm:$0xff]  }
 0x190   :  { %5172 = vmatprep.subr.bf16.mxu0 %v7637_v29  ;;  %5731 = vmatprep.subr.bf16.mxu1 %v7640_v30  ;;  %v7728_v29 = vld [vmem:[%s10732_s1 + $0xe60] ss:$16 sps:$4 sm:$0xff]   ;;  %v7731_v30 = vld [vmem:[%s10732_s1 + $0xe68] ss:$16 sps:$4 sm:$0xff]  }
 0x193   :  { %5173 = vmatpush1.bf16.msra.mxu0 %v7635_v31  ;;  %5732 = vmatpush1.bf16.msra.mxu1 %v7638_v32  ;;  %v7736_v31 = vld [vmem:[%s10732_s1 + $0xe84] ss:$16 sps:$4 sm:$0xff]   ;;  %v7739_v32 = vld [vmem:[%s10732_s1 + $0xe8c] ss:$16 sps:$4 sm:$0xff]  }
 0x194   :  { %5174 = vmatprep.subr.bf16.mxu0 %v7643_v33  ;;  %5733 = vmatprep.subr.bf16.mxu1 %v7646_v34  ;;  %v7734_v33 = vld [vmem:[%s10732_s1 + $0xe80] ss:$16 sps:$4 sm:$0xff]   ;;  %v7737_v34 = vld [vmem:[%s10732_s1 + $0xe88] ss:$16 sps:$4 sm:$0xff]  }
 0x197   :  { %5175 = vmatpush1.bf16.msra.mxu0 %v7641_v35  ;;  %5734 = vmatpush1.bf16.msra.mxu1 %v7644_v36  ;;  %v7742_v35 = vld [vmem:[%s10732_s1 + $0xea4] ss:$16 sps:$4 sm:$0xff]   ;;  %v7745_v36 = vld [vmem:[%s10732_s1 + $0xeac] ss:$16 sps:$4 sm:$0xff]  }
 0x198   :  { %5176 = vmatprep.subr.bf16.mxu0 %v7649_v37  ;;  %5735 = vmatprep.subr.bf16.mxu1 %v7652_v38  ;;  %v7740_v37 = vld [vmem:[%s10732_s1 + $0xea0] ss:$16 sps:$4 sm:$0xff]   ;;  %v7743_v38 = vld [vmem:[%s10732_s1 + $0xea8] ss:$16 sps:$4 sm:$0xff]  }
 0x19b   :  { %5177 = vmatpush1.bf16.msra.mxu0 %v7647_v39  ;;  %5736 = vmatpush1.bf16.msra.mxu1 %v7650_v40  ;;  %v7748_v39 = vld [vmem:[%s10732_s1 + $0xec4] ss:$16 sps:$4 sm:$0xff]   ;;  %v7751_v40 = vld [vmem:[%s10732_s1 + $0xecc] ss:$16 sps:$4 sm:$0xff]  }
 0x19c   :  { %5178 = vmatprep.subr.bf16.mxu0 %v7655_v41  ;;  %5737 = vmatprep.subr.bf16.mxu1 %v7658_v42  ;;  %v7746_v41 = vld [vmem:[%s10732_s1 + $0xec0] ss:$16 sps:$4 sm:$0xff]   ;;  %v7749_v42 = vld [vmem:[%s10732_s1 + $0xec8] ss:$16 sps:$4 sm:$0xff]  }
 0x19f   :  { %5179 = vmatpush1.bf16.msra.mxu0 %v7653_v43  ;;  %5738 = vmatpush1.bf16.msra.mxu1 %v7656_v44  ;;  %v7754_v43 = vld [vmem:[%s10732_s1 + $0xee4] ss:$16 sps:$4 sm:$0xff]   ;;  %v7757_v44 = vld [vmem:[%s10732_s1 + $0xeec] ss:$16 sps:$4 sm:$0xff]  }
 0x1a0   :  { %5180 = vmatprep.subr.bf16.mxu0 %v7661_v45  ;;  %5739 = vmatprep.subr.bf16.mxu1 %v7664_v46  ;;  %v7752_v45 = vld [vmem:[%s10732_s1 + $0xee0] ss:$16 sps:$4 sm:$0xff]   ;;  %v7755_v46 = vld [vmem:[%s10732_s1 + $0xee8] ss:$16 sps:$4 sm:$0xff]  }
 0x1a3   :  { %5181 = vmatpush1.bf16.msra.mxu0 %v7659_v47  ;;  %5740 = vmatpush1.bf16.msra.mxu1 %v7662_v48  ;;  %v7760_v47 = vld [vmem:[%s10732_s1 + $0xf04] ss:$16 sps:$4 sm:$0xff]   ;;  %v7763_v48 = vld [vmem:[%s10732_s1 + $0xf0c] ss:$16 sps:$4 sm:$0xff]  }
 0x1a4   :  { %5182 = vmatprep.subr.bf16.mxu0 %v7667_v49  ;;  %5741 = vmatprep.subr.bf16.mxu1 %v7670_v50  ;;  %v7758_v49 = vld [vmem:[%s10732_s1 + $0xf00] ss:$16 sps:$4 sm:$0xff]   ;;  %v7761_v50 = vld [vmem:[%s10732_s1 + $0xf08] ss:$16 sps:$4 sm:$0xff]  }
 0x1a7   :  { %5183 = vmatpush1.bf16.msra.mxu0 %v7665_v51  ;;  %5742 = vmatpush1.bf16.msra.mxu1 %v7668_v52  ;;  %v7766_v51 = vld [vmem:[%s10732_s1 + $0xf24] ss:$16 sps:$4 sm:$0xff]   ;;  %v7769_v52 = vld [vmem:[%s10732_s1 + $0xf2c] ss:$16 sps:$4 sm:$0xff]  }
 0x1a8   :  { %5184 = vmatprep.subr.bf16.mxu0 %v7673_v53  ;;  %5743 = vmatprep.subr.bf16.mxu1 %v7676_v54  ;;  %v7764_v53 = vld [vmem:[%s10732_s1 + $0xf20] ss:$16 sps:$4 sm:$0xff]   ;;  %v7767_v54 = vld [vmem:[%s10732_s1 + $0xf28] ss:$16 sps:$4 sm:$0xff]  }
 0x1ab   :  { %5185 = vmatpush1.bf16.msra.mxu0 %v7671_v55  ;;  %5744 = vmatpush1.bf16.msra.mxu1 %v7674_v56  ;;  %v7772_v55 = vld [vmem:[%s10732_s1 + $0xf44] ss:$16 sps:$4 sm:$0xff]   ;;  %v7775_v56 = vld [vmem:[%s10732_s1 + $0xf4c] ss:$16 sps:$4 sm:$0xff]  }
 0x1ac   :  { %5186 = vmatprep.subr.bf16.mxu0 %v7679_v57  ;;  %5745 = vmatprep.subr.bf16.mxu1 %v7682_v58  ;;  %v7770_v57 = vld [vmem:[%s10732_s1 + $0xf40] ss:$16 sps:$4 sm:$0xff]   ;;  %v7773_v58 = vld [vmem:[%s10732_s1 + $0xf48] ss:$16 sps:$4 sm:$0xff]  }
 0x1af   :  { %5187 = vmatpush1.bf16.msra.mxu0 %v7677_v59  ;;  %5746 = vmatpush1.bf16.msra.mxu1 %v7680_v60  ;;  %v7778_v59 = vld [vmem:[%s10732_s1 + $0xf64] ss:$16 sps:$4 sm:$0xff]   ;;  %v7781_v60 = vld [vmem:[%s10732_s1 + $0xf6c] ss:$16 sps:$4 sm:$0xff]  }
 0x1b0   :  { %5188 = vmatprep.subr.bf16.mxu0 %v7685_v61  ;;  %5747 = vmatprep.subr.bf16.mxu1 %v7688_v62  ;;  %v7776_v61 = vld [vmem:[%s10732_s1 + $0xf60] ss:$16 sps:$4 sm:$0xff]   ;;  %v7779_v62 = vld [vmem:[%s10732_s1 + $0xf68] ss:$16 sps:$4 sm:$0xff]  }
 0x1b3   :  { %5189 = vmatpush1.bf16.msra.mxu0 %v7683_v63  ;;  %5748 = vmatpush1.bf16.msra.mxu1 %v7686_v0  ;;  %v7784_v63 = vld [vmem:[%s10732_s1 + $0xf84] ss:$16 sps:$4 sm:$0xff]   ;;  %v7787_v0 = vld [vmem:[%s10732_s1 + $0xf8c] ss:$16 sps:$4 sm:$0xff]  }
 0x1b4   :  { %5190 = vmatprep.subr.bf16.mxu0 %v7691_v1  ;;  %5749 = vmatprep.subr.bf16.mxu1 %v7694_v2  ;;  %v7782_v1 = vld [vmem:[%s10732_s1 + $0xf80] ss:$16 sps:$4 sm:$0xff]   ;;  %v7785_v2 = vld [vmem:[%s10732_s1 + $0xf88] ss:$16 sps:$4 sm:$0xff]  }
 0x1b7   :  { %5191 = vmatpush1.bf16.msra.mxu0 %v7689_v3  ;;  %5750 = vmatpush1.bf16.msra.mxu1 %v7692_v4  ;;  %v7790_v3 = vld [vmem:[%s10732_s1 + $0xfa4] ss:$16 sps:$4 sm:$0xff]   ;;  %v7793_v4 = vld [vmem:[%s10732_s1 + $0xfac] ss:$16 sps:$4 sm:$0xff]  }
 0x1b8   :  { %5192 = vmatprep.subr.bf16.mxu0 %v7697_v5  ;;  %5751 = vmatprep.subr.bf16.mxu1 %v7700_v6  ;;  %v7788_v5 = vld [vmem:[%s10732_s1 + $0xfa0] ss:$16 sps:$4 sm:$0xff]   ;;  %v7791_v6 = vld [vmem:[%s10732_s1 + $0xfa8] ss:$16 sps:$4 sm:$0xff]  }
 0x1bb   :  { %5193 = vmatpush1.bf16.msra.mxu0 %v7695_v7  ;;  %5752 = vmatpush1.bf16.msra.mxu1 %v7698_v8  ;;  %v7796_v7 = vld [vmem:[%s10732_s1 + $0xfc4] ss:$16 sps:$4 sm:$0xff]   ;;  %v7799_v8 = vld [vmem:[%s10732_s1 + $0xfcc] ss:$16 sps:$4 sm:$0xff]  }
 0x1bc   :  { %5194 = vmatprep.subr.bf16.mxu0 %v7703_v9  ;;  %5753 = vmatprep.subr.bf16.mxu1 %v7706_v10  ;;  %v7794_v9 = vld [vmem:[%s10732_s1 + $0xfc0] ss:$16 sps:$4 sm:$0xff]   ;;  %v7797_v10 = vld [vmem:[%s10732_s1 + $0xfc8] ss:$16 sps:$4 sm:$0xff]  }
 0x1bf   :  { %5195 = vmatpush1.bf16.msra.mxu0 %v7701_v11  ;;  %5754 = vmatpush1.bf16.msra.mxu1 %v7704_v12  ;;  %v7802_v11 = vld [vmem:[%s10732_s1 + $0xfe4] ss:$16 sps:$4 sm:$0xff]   ;;  %v7805_v12 = vld [vmem:[%s10732_s1 + $0xfec] ss:$16 sps:$4 sm:$0xff]  }
 0x1c0   :  { %5207 = vmatprep.subr.bf16.mxu0 %v7712_v14  ;;  %5766 = vmatprep.subr.bf16.mxu1 %v7715_v15  ;;  %v7803_v14 = vld [vmem:[%s10732_s1 + $0xfe8] ss:$16 sps:$4 sm:$0xff]   ;;  %v7811_v15 = vld [vmem:[%s10732_s1 + $0x1004] ss:$16 sps:$4 sm:$0xff]  }
 0x1c2   :  { %5197 = vmatmul.mubr.bf16.vlgmr.msra.gmra.mrb[0].mxu0 %v7707_v13  ;;  %5756 = vmatmul.mubr.bf16.vlgmr.msra.gmra.mrb[0].mxu1 %v7707_v13  ;;  %v7800_v13 = vld [vmem:[%s10732_s1 + $0xfe0] ss:$16 sps:$4 sm:$0xff]  }
 0x1c3   :  { %5208 = vmatpush1.bf16.msra.mxu0 %v7710_v16  ;;  %5767 = vmatpush1.bf16.msra.mxu1 %v7713_v17  ;;  %v7814_v16 = vld [vmem:[%s10732_s1 + $0x100c] ss:$16 sps:$4 sm:$0xff]  }
 0x1c4   :  { %5209 = vmatprep.subr.bf16.mxu0 %v7718_v18  ;;  %5768 = vmatprep.subr.bf16.mxu1 %v7721_v19  ;;  %v7806_v17 = vld [vmem:[%s10733_s0 + $0x38] ss:$100 sps:$4 sm:$0xff]   ;;  %v7809_v18 = vld [vmem:[%s10732_s1 + $0x1000] ss:$16 sps:$4 sm:$0xff]  }
 0x1c5   :  { %5239 = vmatprep.mubr.bf16.mxu0 %v7808_v20  ;;  %5798 = vmatprep.mubr.bf16.mxu1 %v7808_v20  ;;  %v7812_v19 = vld [vmem:[%s10732_s1 + $0x1008] ss:$16 sps:$4 sm:$0xff]   ;;  %v7817_v20 = vld [vmem:[%s10732_s1 + $0x1024] ss:$16 sps:$4 sm:$0xff]  }
 0x1c7   :  { %5210 = vmatpush1.bf16.msra.mxu0 %v7716_v21  ;;  %5769 = vmatpush1.bf16.msra.mxu1 %v7719_v22  ;;  %v7820_v21 = vld [vmem:[%s10732_s1 + $0x102c] ss:$16 sps:$4 sm:$0xff]   ;;  %v7907_v22 = vld [vmem:[%s10733_s0 + $0x44] ss:$100 sps:$4 sm:$0xff]  }
 0x1c8   :  { %5211 = vmatprep.subr.bf16.mxu0 %v7724_v23  ;;  %5770 = vmatprep.subr.bf16.mxu1 %v7727_v24  ;;  %v7815_v23 = vld [vmem:[%s10732_s1 + $0x1020] ss:$16 sps:$4 sm:$0xff]   ;;  %v7818_v24 = vld [vmem:[%s10732_s1 + $0x1028] ss:$16 sps:$4 sm:$0xff]  }
 0x1cb   :  { %5212 = vmatpush1.bf16.msra.mxu0 %v7722_v25  ;;  %5771 = vmatpush1.bf16.msra.mxu1 %v7725_v26  ;;  %v7823_v25 = vld [vmem:[%s10732_s1 + $0x1044] ss:$16 sps:$4 sm:$0xff]   ;;  %v7826_v26 = vld [vmem:[%s10732_s1 + $0x104c] ss:$16 sps:$4 sm:$0xff]  }
 0x1cc   :  { %5213 = vmatprep.subr.bf16.mxu0 %v7730_v27  ;;  %5772 = vmatprep.subr.bf16.mxu1 %v7733_v28  ;;  %v7821_v27 = vld [vmem:[%s10732_s1 + $0x1040] ss:$16 sps:$4 sm:$0xff]   ;;  %v7824_v28 = vld [vmem:[%s10732_s1 + $0x1048] ss:$16 sps:$4 sm:$0xff]  }
 0x1cf   :  { %5214 = vmatpush1.bf16.msra.mxu0 %v7728_v29  ;;  %5773 = vmatpush1.bf16.msra.mxu1 %v7731_v30  ;;  %v7829_v29 = vld [vmem:[%s10732_s1 + $0x1064] ss:$16 sps:$4 sm:$0xff]   ;;  %v7832_v30 = vld [vmem:[%s10732_s1 + $0x106c] ss:$16 sps:$4 sm:$0xff]  }
 0x1d0   :  { %5215 = vmatprep.subr.bf16.mxu0 %v7736_v31  ;;  %5774 = vmatprep.subr.bf16.mxu1 %v7739_v32  ;;  %v7827_v31 = vld [vmem:[%s10732_s1 + $0x1060] ss:$16 sps:$4 sm:$0xff]   ;;  %v7830_v32 = vld [vmem:[%s10732_s1 + $0x1068] ss:$16 sps:$4 sm:$0xff]  }
 0x1d3   :  { %5216 = vmatpush1.bf16.msra.mxu0 %v7734_v33  ;;  %5775 = vmatpush1.bf16.msra.mxu1 %v7737_v34  ;;  %v7835_v33 = vld [vmem:[%s10732_s1 + $0x1084] ss:$16 sps:$4 sm:$0xff]   ;;  %v7838_v34 = vld [vmem:[%s10732_s1 + $0x108c] ss:$16 sps:$4 sm:$0xff]  }
 0x1d4   :  { %5217 = vmatprep.subr.bf16.mxu0 %v7742_v35  ;;  %5776 = vmatprep.subr.bf16.mxu1 %v7745_v36  ;;  %v7833_v35 = vld [vmem:[%s10732_s1 + $0x1080] ss:$16 sps:$4 sm:$0xff]   ;;  %v7836_v36 = vld [vmem:[%s10732_s1 + $0x1088] ss:$16 sps:$4 sm:$0xff]  }
 0x1d7   :  { %5218 = vmatpush1.bf16.msra.mxu0 %v7740_v37  ;;  %5777 = vmatpush1.bf16.msra.mxu1 %v7743_v38  ;;  %v7841_v37 = vld [vmem:[%s10732_s1 + $0x10a4] ss:$16 sps:$4 sm:$0xff]   ;;  %v7844_v38 = vld [vmem:[%s10732_s1 + $0x10ac] ss:$16 sps:$4 sm:$0xff]  }
 0x1d8   :  { %5219 = vmatprep.subr.bf16.mxu0 %v7748_v39  ;;  %5778 = vmatprep.subr.bf16.mxu1 %v7751_v40  ;;  %v7839_v39 = vld [vmem:[%s10732_s1 + $0x10a0] ss:$16 sps:$4 sm:$0xff]   ;;  %v7842_v40 = vld [vmem:[%s10732_s1 + $0x10a8] ss:$16 sps:$4 sm:$0xff]  }
 0x1db   :  { %5220 = vmatpush1.bf16.msra.mxu0 %v7746_v41  ;;  %5779 = vmatpush1.bf16.msra.mxu1 %v7749_v42  ;;  %v7847_v41 = vld [vmem:[%s10732_s1 + $0x10c4] ss:$16 sps:$4 sm:$0xff]   ;;  %v7850_v42 = vld [vmem:[%s10732_s1 + $0x10cc] ss:$16 sps:$4 sm:$0xff]  }
 0x1dc   :  { %5221 = vmatprep.subr.bf16.mxu0 %v7754_v43  ;;  %5780 = vmatprep.subr.bf16.mxu1 %v7757_v44  ;;  %v7845_v43 = vld [vmem:[%s10732_s1 + $0x10c0] ss:$16 sps:$4 sm:$0xff]   ;;  %v7848_v44 = vld [vmem:[%s10732_s1 + $0x10c8] ss:$16 sps:$4 sm:$0xff]  }
 0x1df   :  { %5222 = vmatpush1.bf16.msra.mxu0 %v7752_v45  ;;  %5781 = vmatpush1.bf16.msra.mxu1 %v7755_v46  ;;  %v7853_v45 = vld [vmem:[%s10732_s1 + $0x10e4] ss:$16 sps:$4 sm:$0xff]   ;;  %v7856_v46 = vld [vmem:[%s10732_s1 + $0x10ec] ss:$16 sps:$4 sm:$0xff]  }
 0x1e0   :  { %5223 = vmatprep.subr.bf16.mxu0 %v7760_v47  ;;  %5782 = vmatprep.subr.bf16.mxu1 %v7763_v48  ;;  %v7851_v47 = vld [vmem:[%s10732_s1 + $0x10e0] ss:$16 sps:$4 sm:$0xff]   ;;  %v7854_v48 = vld [vmem:[%s10732_s1 + $0x10e8] ss:$16 sps:$4 sm:$0xff]  }
 0x1e3   :  { %5224 = vmatpush1.bf16.msra.mxu0 %v7758_v49  ;;  %5783 = vmatpush1.bf16.msra.mxu1 %v7761_v50  ;;  %v7859_v49 = vld [vmem:[%s10732_s1 + $0x1104] ss:$16 sps:$4 sm:$0xff]   ;;  %v7862_v50 = vld [vmem:[%s10732_s1 + $0x110c] ss:$16 sps:$4 sm:$0xff]  }
 0x1e4   :  { %5225 = vmatprep.subr.bf16.mxu0 %v7766_v51  ;;  %5784 = vmatprep.subr.bf16.mxu1 %v7769_v52  ;;  %v7857_v51 = vld [vmem:[%s10732_s1 + $0x1100] ss:$16 sps:$4 sm:$0xff]   ;;  %v7860_v52 = vld [vmem:[%s10732_s1 + $0x1108] ss:$16 sps:$4 sm:$0xff]  }
 0x1e7   :  { %5226 = vmatpush1.bf16.msra.mxu0 %v7764_v53  ;;  %5785 = vmatpush1.bf16.msra.mxu1 %v7767_v54  ;;  %v7865_v53 = vld [vmem:[%s10732_s1 + $0x1124] ss:$16 sps:$4 sm:$0xff]   ;;  %v7868_v54 = vld [vmem:[%s10732_s1 + $0x112c] ss:$16 sps:$4 sm:$0xff]  }
 0x1e8   :  { %5227 = vmatprep.subr.bf16.mxu0 %v7772_v55  ;;  %5786 = vmatprep.subr.bf16.mxu1 %v7775_v56  ;;  %v7863_v55 = vld [vmem:[%s10732_s1 + $0x1120] ss:$16 sps:$4 sm:$0xff]   ;;  %v7866_v56 = vld [vmem:[%s10732_s1 + $0x1128] ss:$16 sps:$4 sm:$0xff]  }
 0x1eb   :  { %5228 = vmatpush1.bf16.msra.mxu0 %v7770_v57  ;;  %5787 = vmatpush1.bf16.msra.mxu1 %v7773_v58  ;;  %v7871_v57 = vld [vmem:[%s10732_s1 + $0x1144] ss:$16 sps:$4 sm:$0xff]   ;;  %v7874_v58 = vld [vmem:[%s10732_s1 + $0x114c] ss:$16 sps:$4 sm:$0xff]  }
 0x1ec   :  { %5229 = vmatprep.subr.bf16.mxu0 %v7778_v59  ;;  %5788 = vmatprep.subr.bf16.mxu1 %v7781_v60  ;;  %v7869_v59 = vld [vmem:[%s10732_s1 + $0x1140] ss:$16 sps:$4 sm:$0xff]   ;;  %v7872_v60 = vld [vmem:[%s10732_s1 + $0x1148] ss:$16 sps:$4 sm:$0xff]  }
 0x1ef   :  { %5230 = vmatpush1.bf16.msra.mxu0 %v7776_v61  ;;  %5789 = vmatpush1.bf16.msra.mxu1 %v7779_v62  ;;  %v7877_v61 = vld [vmem:[%s10732_s1 + $0x1164] ss:$16 sps:$4 sm:$0xff]   ;;  %v7880_v62 = vld [vmem:[%s10732_s1 + $0x116c] ss:$16 sps:$4 sm:$0xff]  }
 0x1f0   :  { %5231 = vmatprep.subr.bf16.mxu0 %v7784_v63  ;;  %5790 = vmatprep.subr.bf16.mxu1 %v7787_v0  ;;  %v7875_v63 = vld [vmem:[%s10732_s1 + $0x1160] ss:$16 sps:$4 sm:$0xff]   ;;  %v7878_v0 = vld [vmem:[%s10732_s1 + $0x1168] ss:$16 sps:$4 sm:$0xff]  }
 0x1f3   :  { %5232 = vmatpush1.bf16.msra.mxu0 %v7782_v1  ;;  %5791 = vmatpush1.bf16.msra.mxu1 %v7785_v2  ;;  %v7883_v1 = vld [vmem:[%s10732_s1 + $0x1184] ss:$16 sps:$4 sm:$0xff]   ;;  %v7886_v2 = vld [vmem:[%s10732_s1 + $0x118c] ss:$16 sps:$4 sm:$0xff]  }
 0x1f4   :  { %5233 = vmatprep.subr.bf16.mxu0 %v7790_v3  ;;  %5792 = vmatprep.subr.bf16.mxu1 %v7793_v4  ;;  %v7881_v3 = vld [vmem:[%s10732_s1 + $0x1180] ss:$16 sps:$4 sm:$0xff]   ;;  %v7884_v4 = vld [vmem:[%s10732_s1 + $0x1188] ss:$16 sps:$4 sm:$0xff]  }
 0x1f7   :  { %5234 = vmatpush1.bf16.msra.mxu0 %v7788_v5  ;;  %5793 = vmatpush1.bf16.msra.mxu1 %v7791_v6  ;;  %v7889_v5 = vld [vmem:[%s10732_s1 + $0x11a4] ss:$16 sps:$4 sm:$0xff]   ;;  %v7892_v6 = vld [vmem:[%s10732_s1 + $0x11ac] ss:$16 sps:$4 sm:$0xff]  }
 0x1f8   :  { %5235 = vmatprep.subr.bf16.mxu0 %v7796_v7  ;;  %5794 = vmatprep.subr.bf16.mxu1 %v7799_v8  ;;  %v7887_v7 = vld [vmem:[%s10732_s1 + $0x11a0] ss:$16 sps:$4 sm:$0xff]   ;;  %v7890_v8 = vld [vmem:[%s10732_s1 + $0x11a8] ss:$16 sps:$4 sm:$0xff]  }
 0x1fb   :  { %5236 = vmatpush1.bf16.msra.mxu0 %v7794_v9  ;;  %5795 = vmatpush1.bf16.msra.mxu1 %v7797_v10  ;;  %v7895_v9 = vld [vmem:[%s10732_s1 + $0x11c4] ss:$16 sps:$4 sm:$0xff]   ;;  %v7898_v10 = vld [vmem:[%s10732_s1 + $0x11cc] ss:$16 sps:$4 sm:$0xff]  }
 0x1fc   :  { %5237 = vmatprep.subr.bf16.mxu0 %v7802_v11  ;;  %5796 = vmatprep.subr.bf16.mxu1 %v7805_v12  ;;  %v7893_v11 = vld [vmem:[%s10732_s1 + $0x11c0] ss:$16 sps:$4 sm:$0xff]   ;;  %v7896_v12 = vld [vmem:[%s10732_s1 + $0x11c8] ss:$16 sps:$4 sm:$0xff]  }
 0x1ff   :  { %5238 = vmatpush1.bf16.msra.mxu0 %v7800_v13  ;;  %5797 = vmatpush1.bf16.msra.mxu1 %v7803_v14  ;;  %v7901_v13 = vld [vmem:[%s10732_s1 + $0x11e4] ss:$16 sps:$4 sm:$0xff]   ;;  %v7904_v14 = vld [vmem:[%s10732_s1 + $0x11ec] ss:$16 sps:$4 sm:$0xff]  }
 0x200   :  { %5250 = vmatprep.subr.bf16.mxu0 %v7811_v15  ;;  %5809 = vmatprep.subr.bf16.mxu1 %v7814_v16  ;;  %v7899_v15 = vld [vmem:[%s10732_s1 + $0x11e0] ss:$16 sps:$4 sm:$0xff]   ;;  %v7902_v16 = vld [vmem:[%s10732_s1 + $0x11e8] ss:$16 sps:$4 sm:$0xff]  }
 0x202   :  { %5240 = vmatmul.mubr.bf16.vlgmr.msra.gmra.mrb[0].mxu0 %v7806_v17  ;;  %5799 = vmatmul.mubr.bf16.vlgmr.msra.gmra.mrb[0].mxu1 %v7806_v17  ;;  %v7910_v17 = vld [vmem:[%s10732_s1 + $0x1204] ss:$16 sps:$4 sm:$0xff]  }
 0x203   :  { %5251 = vmatpush1.bf16.msra.mxu0 %v7809_v18  ;;  %5810 = vmatpush1.bf16.msra.mxu1 %v7812_v19  ;;  %v7913_v18 = vld [vmem:[%s10732_s1 + $0x120c] ss:$16 sps:$4 sm:$0xff]   ;;  %v7905_v19 = vld [vmem:[%s10733_s0 + $0x40] ss:$100 sps:$4 sm:$0xff]  }
 0x204   :  { %5252 = vmatprep.subr.bf16.mxu0 %v7817_v20  ;;  %5811 = vmatprep.subr.bf16.mxu1 %v7820_v21  ;;  %v7908_v20 = vld [vmem:[%s10732_s1 + $0x1200] ss:$16 sps:$4 sm:$0xff]   ;;  %v7911_v21 = vld [vmem:[%s10732_s1 + $0x1208] ss:$16 sps:$4 sm:$0xff]  }
 0x205   :  { %5282 = vmatprep.mubr.bf16.mxu0 %v7907_v22  ;;  %5841 = vmatprep.mubr.bf16.mxu1 %v7907_v22  ;;  %v7916_v22 = vld [vmem:[%s10732_s1 + $0x1224] ss:$16 sps:$4 sm:$0xff]  }
 0x207   :  { %5253 = vmatpush1.bf16.msra.mxu0 %v7815_v23  ;;  %5812 = vmatpush1.bf16.msra.mxu1 %v7818_v24  ;;  %v7919_v23 = vld [vmem:[%s10732_s1 + $0x122c] ss:$16 sps:$4 sm:$0xff]  }
 0x208   :  { %5254 = vmatprep.subr.bf16.mxu0 %v7823_v25  ;;  %5813 = vmatprep.subr.bf16.mxu1 %v7826_v26  ;;  %v8006_v24 = vld [vmem:[%s10733_s0 + $0x4c] ss:$100 sps:$4 sm:$0xff]   ;;  %v7917_v26 = vld [vmem:[%s10732_s1 + $0x1228] ss:$16 sps:$4 sm:$0xff]  }
 0x209   :  { %v7914_v25 = vld [vmem:[%s10732_s1 + $0x1220] ss:$16 sps:$4 sm:$0xff]  }
 0x20b   :  { %5255 = vmatpush1.bf16.msra.mxu0 %v7821_v27  ;;  %5814 = vmatpush1.bf16.msra.mxu1 %v7824_v28  ;;  %v7922_v27 = vld [vmem:[%s10732_s1 + $0x1244] ss:$16 sps:$4 sm:$0xff]   ;;  %v7925_v28 = vld [vmem:[%s10732_s1 + $0x124c] ss:$16 sps:$4 sm:$0xff]  }
 0x20c   :  { %5256 = vmatprep.subr.bf16.mxu0 %v7829_v29  ;;  %5815 = vmatprep.subr.bf16.mxu1 %v7832_v30  ;;  %v7920_v29 = vld [vmem:[%s10732_s1 + $0x1240] ss:$16 sps:$4 sm:$0xff]   ;;  %v7923_v30 = vld [vmem:[%s10732_s1 + $0x1248] ss:$16 sps:$4 sm:$0xff]  }
 0x20f   :  { %5257 = vmatpush1.bf16.msra.mxu0 %v7827_v31  ;;  %5816 = vmatpush1.bf16.msra.mxu1 %v7830_v32  ;;  %v7928_v31 = vld [vmem:[%s10732_s1 + $0x1264] ss:$16 sps:$4 sm:$0xff]   ;;  %v7931_v32 = vld [vmem:[%s10732_s1 + $0x126c] ss:$16 sps:$4 sm:$0xff]  }
 0x210   :  { %5258 = vmatprep.subr.bf16.mxu0 %v7835_v33  ;;  %5817 = vmatprep.subr.bf16.mxu1 %v7838_v34  ;;  %v7926_v33 = vld [vmem:[%s10732_s1 + $0x1260] ss:$16 sps:$4 sm:$0xff]   ;;  %v7929_v34 = vld [vmem:[%s10732_s1 + $0x1268] ss:$16 sps:$4 sm:$0xff]  }
 0x213   :  { %5259 = vmatpush1.bf16.msra.mxu0 %v7833_v35  ;;  %5818 = vmatpush1.bf16.msra.mxu1 %v7836_v36  ;;  %v7934_v35 = vld [vmem:[%s10732_s1 + $0x1284] ss:$16 sps:$4 sm:$0xff]   ;;  %v7937_v36 = vld [vmem:[%s10732_s1 + $0x128c] ss:$16 sps:$4 sm:$0xff]  }
 0x214   :  { %5260 = vmatprep.subr.bf16.mxu0 %v7841_v37  ;;  %5819 = vmatprep.subr.bf16.mxu1 %v7844_v38  ;;  %v7932_v37 = vld [vmem:[%s10732_s1 + $0x1280] ss:$16 sps:$4 sm:$0xff]   ;;  %v7935_v38 = vld [vmem:[%s10732_s1 + $0x1288] ss:$16 sps:$4 sm:$0xff]  }
 0x217   :  { %5261 = vmatpush1.bf16.msra.mxu0 %v7839_v39  ;;  %5820 = vmatpush1.bf16.msra.mxu1 %v7842_v40  ;;  %v7940_v39 = vld [vmem:[%s10732_s1 + $0x12a4] ss:$16 sps:$4 sm:$0xff]   ;;  %v7943_v40 = vld [vmem:[%s10732_s1 + $0x12ac] ss:$16 sps:$4 sm:$0xff]  }
 0x218   :  { %5262 = vmatprep.subr.bf16.mxu0 %v7847_v41  ;;  %5821 = vmatprep.subr.bf16.mxu1 %v7850_v42  ;;  %v7938_v41 = vld [vmem:[%s10732_s1 + $0x12a0] ss:$16 sps:$4 sm:$0xff]   ;;  %v7941_v42 = vld [vmem:[%s10732_s1 + $0x12a8] ss:$16 sps:$4 sm:$0xff]  }
 0x21b   :  { %5263 = vmatpush1.bf16.msra.mxu0 %v7845_v43  ;;  %5822 = vmatpush1.bf16.msra.mxu1 %v7848_v44  ;;  %v7946_v43 = vld [vmem:[%s10732_s1 + $0x12c4] ss:$16 sps:$4 sm:$0xff]   ;;  %v7949_v44 = vld [vmem:[%s10732_s1 + $0x12cc] ss:$16 sps:$4 sm:$0xff]  }
 0x21c   :  { %5264 = vmatprep.subr.bf16.mxu0 %v7853_v45  ;;  %5823 = vmatprep.subr.bf16.mxu1 %v7856_v46  ;;  %v7944_v45 = vld [vmem:[%s10732_s1 + $0x12c0] ss:$16 sps:$4 sm:$0xff]   ;;  %v7947_v46 = vld [vmem:[%s10732_s1 + $0x12c8] ss:$16 sps:$4 sm:$0xff]  }
 0x21f   :  { %5265 = vmatpush1.bf16.msra.mxu0 %v7851_v47  ;;  %5824 = vmatpush1.bf16.msra.mxu1 %v7854_v48  ;;  %v7952_v47 = vld [vmem:[%s10732_s1 + $0x12e4] ss:$16 sps:$4 sm:$0xff]   ;;  %v7955_v48 = vld [vmem:[%s10732_s1 + $0x12ec] ss:$16 sps:$4 sm:$0xff]  }
 0x220   :  { %5266 = vmatprep.subr.bf16.mxu0 %v7859_v49  ;;  %5825 = vmatprep.subr.bf16.mxu1 %v7862_v50  ;;  %v7950_v49 = vld [vmem:[%s10732_s1 + $0x12e0] ss:$16 sps:$4 sm:$0xff]   ;;  %v7953_v50 = vld [vmem:[%s10732_s1 + $0x12e8] ss:$16 sps:$4 sm:$0xff]  }
 0x223   :  { %5267 = vmatpush1.bf16.msra.mxu0 %v7857_v51  ;;  %5826 = vmatpush1.bf16.msra.mxu1 %v7860_v52  ;;  %v7958_v51 = vld [vmem:[%s10732_s1 + $0x1304] ss:$16 sps:$4 sm:$0xff]   ;;  %v7961_v52 = vld [vmem:[%s10732_s1 + $0x130c] ss:$16 sps:$4 sm:$0xff]  }
 0x224   :  { %5268 = vmatprep.subr.bf16.mxu0 %v7865_v53  ;;  %5827 = vmatprep.subr.bf16.mxu1 %v7868_v54  ;;  %v7956_v53 = vld [vmem:[%s10732_s1 + $0x1300] ss:$16 sps:$4 sm:$0xff]   ;;  %v7959_v54 = vld [vmem:[%s10732_s1 + $0x1308] ss:$16 sps:$4 sm:$0xff]  }
 0x227   :  { %5269 = vmatpush1.bf16.msra.mxu0 %v7863_v55  ;;  %5828 = vmatpush1.bf16.msra.mxu1 %v7866_v56  ;;  %v7964_v55 = vld [vmem:[%s10732_s1 + $0x1324] ss:$16 sps:$4 sm:$0xff]   ;;  %v7967_v56 = vld [vmem:[%s10732_s1 + $0x132c] ss:$16 sps:$4 sm:$0xff]  }
 0x228   :  { %5270 = vmatprep.subr.bf16.mxu0 %v7871_v57  ;;  %5829 = vmatprep.subr.bf16.mxu1 %v7874_v58  ;;  %v7962_v57 = vld [vmem:[%s10732_s1 + $0x1320] ss:$16 sps:$4 sm:$0xff]   ;;  %v7965_v58 = vld [vmem:[%s10732_s1 + $0x1328] ss:$16 sps:$4 sm:$0xff]  }
 0x22b   :  { %5271 = vmatpush1.bf16.msra.mxu0 %v7869_v59  ;;  %5830 = vmatpush1.bf16.msra.mxu1 %v7872_v60  ;;  %v7970_v59 = vld [vmem:[%s10732_s1 + $0x1344] ss:$16 sps:$4 sm:$0xff]   ;;  %v7973_v60 = vld [vmem:[%s10732_s1 + $0x134c] ss:$16 sps:$4 sm:$0xff]  }
 0x22c   :  { %5272 = vmatprep.subr.bf16.mxu0 %v7877_v61  ;;  %5831 = vmatprep.subr.bf16.mxu1 %v7880_v62  ;;  %v7968_v61 = vld [vmem:[%s10732_s1 + $0x1340] ss:$16 sps:$4 sm:$0xff]   ;;  %v7971_v62 = vld [vmem:[%s10732_s1 + $0x1348] ss:$16 sps:$4 sm:$0xff]  }
 0x22f   :  { %5273 = vmatpush1.bf16.msra.mxu0 %v7875_v63  ;;  %5832 = vmatpush1.bf16.msra.mxu1 %v7878_v0  ;;  %v7976_v63 = vld [vmem:[%s10732_s1 + $0x1364] ss:$16 sps:$4 sm:$0xff]   ;;  %v7979_v0 = vld [vmem:[%s10732_s1 + $0x136c] ss:$16 sps:$4 sm:$0xff]  }
 0x230   :  { %5274 = vmatprep.subr.bf16.mxu0 %v7883_v1  ;;  %5833 = vmatprep.subr.bf16.mxu1 %v7886_v2  ;;  %v7974_v1 = vld [vmem:[%s10732_s1 + $0x1360] ss:$16 sps:$4 sm:$0xff]   ;;  %v7977_v2 = vld [vmem:[%s10732_s1 + $0x1368] ss:$16 sps:$4 sm:$0xff]  }
 0x233   :  { %5275 = vmatpush1.bf16.msra.mxu0 %v7881_v3  ;;  %5834 = vmatpush1.bf16.msra.mxu1 %v7884_v4  ;;  %v7982_v3 = vld [vmem:[%s10732_s1 + $0x1384] ss:$16 sps:$4 sm:$0xff]   ;;  %v7985_v4 = vld [vmem:[%s10732_s1 + $0x138c] ss:$16 sps:$4 sm:$0xff]  }
 0x234   :  { %5276 = vmatprep.subr.bf16.mxu0 %v7889_v5  ;;  %5835 = vmatprep.subr.bf16.mxu1 %v7892_v6  ;;  %v7980_v5 = vld [vmem:[%s10732_s1 + $0x1380] ss:$16 sps:$4 sm:$0xff]   ;;  %v7983_v6 = vld [vmem:[%s10732_s1 + $0x1388] ss:$16 sps:$4 sm:$0xff]  }
 0x237   :  { %5277 = vmatpush1.bf16.msra.mxu0 %v7887_v7  ;;  %5836 = vmatpush1.bf16.msra.mxu1 %v7890_v8  ;;  %v7988_v7 = vld [vmem:[%s10732_s1 + $0x13a4] ss:$16 sps:$4 sm:$0xff]   ;;  %v7991_v8 = vld [vmem:[%s10732_s1 + $0x13ac] ss:$16 sps:$4 sm:$0xff]  }
 0x238   :  { %5278 = vmatprep.subr.bf16.mxu0 %v7895_v9  ;;  %5837 = vmatprep.subr.bf16.mxu1 %v7898_v10  ;;  %v7986_v9 = vld [vmem:[%s10732_s1 + $0x13a0] ss:$16 sps:$4 sm:$0xff]   ;;  %v7989_v10 = vld [vmem:[%s10732_s1 + $0x13a8] ss:$16 sps:$4 sm:$0xff]  }
 0x23b   :  { %5279 = vmatpush1.bf16.msra.mxu0 %v7893_v11  ;;  %5838 = vmatpush1.bf16.msra.mxu1 %v7896_v12  ;;  %v7994_v11 = vld [vmem:[%s10732_s1 + $0x13c4] ss:$16 sps:$4 sm:$0xff]   ;;  %v7997_v12 = vld [vmem:[%s10732_s1 + $0x13cc] ss:$16 sps:$4 sm:$0xff]  }
 0x23c   :  { %5280 = vmatprep.subr.bf16.mxu0 %v7901_v13  ;;  %5839 = vmatprep.subr.bf16.mxu1 %v7904_v14  ;;  %v7992_v13 = vld [vmem:[%s10732_s1 + $0x13c0] ss:$16 sps:$4 sm:$0xff]   ;;  %v7995_v14 = vld [vmem:[%s10732_s1 + $0x13c8] ss:$16 sps:$4 sm:$0xff]  }
 0x23f   :  { %5281 = vmatpush1.bf16.msra.mxu0 %v7899_v15  ;;  %5840 = vmatpush1.bf16.msra.mxu1 %v7902_v16  ;;  %v8000_v15 = vld [vmem:[%s10732_s1 + $0x13e4] ss:$16 sps:$4 sm:$0xff]   ;;  %v8003_v16 = vld [vmem:[%s10732_s1 + $0x13ec] ss:$16 sps:$4 sm:$0xff]  }
 0x240   :  { %5293 = vmatprep.subr.bf16.mxu0 %v7910_v17  ;;  %5852 = vmatprep.subr.bf16.mxu1 %v7913_v18  ;;  %v7998_v17 = vld [vmem:[%s10732_s1 + $0x13e0] ss:$16 sps:$4 sm:$0xff]   ;;  %v8001_v18 = vld [vmem:[%s10732_s1 + $0x13e8] ss:$16 sps:$4 sm:$0xff]  }
 0x242   :  { %5283 = vmatmul.mubr.bf16.vlgmr.msra.gmra.mrb[0].mxu0 %v7905_v19  ;;  %5842 = vmatmul.mubr.bf16.vlgmr.msra.gmra.mrb[0].mxu1 %v7905_v19  ;;  %v8009_v19 = vld [vmem:[%s10732_s1 + $0x1404] ss:$16 sps:$4 sm:$0xff]  }
 0x243   :  { %5294 = vmatpush1.bf16.msra.mxu0 %v7908_v20  ;;  %5853 = vmatpush1.bf16.msra.mxu1 %v7911_v21  ;;  %v8012_v20 = vld [vmem:[%s10732_s1 + $0x140c] ss:$16 sps:$4 sm:$0xff]  }
 0x244   :  { %5295 = vmatprep.subr.bf16.mxu0 %v7916_v22  ;;  %5854 = vmatprep.subr.bf16.mxu1 %v7919_v23  ;;  %v8004_v21 = vld [vmem:[%s10733_s0 + $0x48] ss:$100 sps:$4 sm:$0xff]   ;;  %v8007_v22 = vld [vmem:[%s10732_s1 + $0x1400] ss:$16 sps:$4 sm:$0xff]  }
 0x245   :  { %5325 = vmatprep.mubr.bf16.mxu0 %v8006_v24  ;;  %5884 = vmatprep.mubr.bf16.mxu1 %v8006_v24  ;;  %v8010_v23 = vld [vmem:[%s10732_s1 + $0x1408] ss:$16 sps:$4 sm:$0xff]   ;;  %v8015_v24 = vld [vmem:[%s10732_s1 + $0x1424] ss:$16 sps:$4 sm:$0xff]  }
 0x247   :  { %5296 = vmatpush1.bf16.msra.mxu0 %v7914_v25  ;;  %5855 = vmatpush1.bf16.msra.mxu1 %v7917_v26  ;;  %v8018_v25 = vld [vmem:[%s10732_s1 + $0x142c] ss:$16 sps:$4 sm:$0xff]   ;;  %v8105_v26 = vld [vmem:[%s10733_s0 + $0x54] ss:$100 sps:$4 sm:$0xff]  }
 0x248   :  { %5297 = vmatprep.subr.bf16.mxu0 %v7922_v27  ;;  %5856 = vmatprep.subr.bf16.mxu1 %v7925_v28  ;;  %v8013_v27 = vld [vmem:[%s10732_s1 + $0x1420] ss:$16 sps:$4 sm:$0xff]   ;;  %v8016_v28 = vld [vmem:[%s10732_s1 + $0x1428] ss:$16 sps:$4 sm:$0xff]  }
 0x24b   :  { %5298 = vmatpush1.bf16.msra.mxu0 %v7920_v29  ;;  %5857 = vmatpush1.bf16.msra.mxu1 %v7923_v30  ;;  %v8021_v29 = vld [vmem:[%s10732_s1 + $0x1444] ss:$16 sps:$4 sm:$0xff]   ;;  %v8024_v30 = vld [vmem:[%s10732_s1 + $0x144c] ss:$16 sps:$4 sm:$0xff]  }
 0x24c   :  { %5299 = vmatprep.subr.bf16.mxu0 %v7928_v31  ;;  %5858 = vmatprep.subr.bf16.mxu1 %v7931_v32  ;;  %v8019_v31 = vld [vmem:[%s10732_s1 + $0x1440] ss:$16 sps:$4 sm:$0xff]   ;;  %v8022_v32 = vld [vmem:[%s10732_s1 + $0x1448] ss:$16 sps:$4 sm:$0xff]  }
 0x24f   :  { %5300 = vmatpush1.bf16.msra.mxu0 %v7926_v33  ;;  %5859 = vmatpush1.bf16.msra.mxu1 %v7929_v34  ;;  %v8027_v33 = vld [vmem:[%s10732_s1 + $0x1464] ss:$16 sps:$4 sm:$0xff]   ;;  %v8030_v34 = vld [vmem:[%s10732_s1 + $0x146c] ss:$16 sps:$4 sm:$0xff]  }
 0x250   :  { %5301 = vmatprep.subr.bf16.mxu0 %v7934_v35  ;;  %5860 = vmatprep.subr.bf16.mxu1 %v7937_v36  ;;  %v8025_v35 = vld [vmem:[%s10732_s1 + $0x1460] ss:$16 sps:$4 sm:$0xff]   ;;  %v8028_v36 = vld [vmem:[%s10732_s1 + $0x1468] ss:$16 sps:$4 sm:$0xff]  }
 0x253   :  { %5302 = vmatpush1.bf16.msra.mxu0 %v7932_v37  ;;  %5861 = vmatpush1.bf16.msra.mxu1 %v7935_v38  ;;  %v8033_v37 = vld [vmem:[%s10732_s1 + $0x1484] ss:$16 sps:$4 sm:$0xff]   ;;  %v8036_v38 = vld [vmem:[%s10732_s1 + $0x148c] ss:$16 sps:$4 sm:$0xff]  }
 0x254   :  { %5303 = vmatprep.subr.bf16.mxu0 %v7940_v39  ;;  %5862 = vmatprep.subr.bf16.mxu1 %v7943_v40  ;;  %v8031_v39 = vld [vmem:[%s10732_s1 + $0x1480] ss:$16 sps:$4 sm:$0xff]   ;;  %v8034_v40 = vld [vmem:[%s10732_s1 + $0x1488] ss:$16 sps:$4 sm:$0xff]  }
 0x257   :  { %5304 = vmatpush1.bf16.msra.mxu0 %v7938_v41  ;;  %5863 = vmatpush1.bf16.msra.mxu1 %v7941_v42  ;;  %v8039_v41 = vld [vmem:[%s10732_s1 + $0x14a4] ss:$16 sps:$4 sm:$0xff]   ;;  %v8042_v42 = vld [vmem:[%s10732_s1 + $0x14ac] ss:$16 sps:$4 sm:$0xff]  }
 0x258   :  { %5305 = vmatprep.subr.bf16.mxu0 %v7946_v43  ;;  %5864 = vmatprep.subr.bf16.mxu1 %v7949_v44  ;;  %v8037_v43 = vld [vmem:[%s10732_s1 + $0x14a0] ss:$16 sps:$4 sm:$0xff]   ;;  %v8040_v44 = vld [vmem:[%s10732_s1 + $0x14a8] ss:$16 sps:$4 sm:$0xff]  }
 0x25b   :  { %5306 = vmatpush1.bf16.msra.mxu0 %v7944_v45  ;;  %5865 = vmatpush1.bf16.msra.mxu1 %v7947_v46  ;;  %v8045_v45 = vld [vmem:[%s10732_s1 + $0x14c4] ss:$16 sps:$4 sm:$0xff]   ;;  %v8048_v46 = vld [vmem:[%s10732_s1 + $0x14cc] ss:$16 sps:$4 sm:$0xff]  }
 0x25c   :  { %5307 = vmatprep.subr.bf16.mxu0 %v7952_v47  ;;  %5866 = vmatprep.subr.bf16.mxu1 %v7955_v48  ;;  %v8043_v47 = vld [vmem:[%s10732_s1 + $0x14c0] ss:$16 sps:$4 sm:$0xff]   ;;  %v8046_v48 = vld [vmem:[%s10732_s1 + $0x14c8] ss:$16 sps:$4 sm:$0xff]  }
 0x25f   :  { %5308 = vmatpush1.bf16.msra.mxu0 %v7950_v49  ;;  %5867 = vmatpush1.bf16.msra.mxu1 %v7953_v50  ;;  %v8051_v49 = vld [vmem:[%s10732_s1 + $0x14e4] ss:$16 sps:$4 sm:$0xff]   ;;  %v8054_v50 = vld [vmem:[%s10732_s1 + $0x14ec] ss:$16 sps:$4 sm:$0xff]  }
 0x260   :  { %5309 = vmatprep.subr.bf16.mxu0 %v7958_v51  ;;  %5868 = vmatprep.subr.bf16.mxu1 %v7961_v52  ;;  %v8049_v51 = vld [vmem:[%s10732_s1 + $0x14e0] ss:$16 sps:$4 sm:$0xff]   ;;  %v8052_v52 = vld [vmem:[%s10732_s1 + $0x14e8] ss:$16 sps:$4 sm:$0xff]  }
 0x263   :  { %5310 = vmatpush1.bf16.msra.mxu0 %v7956_v53  ;;  %5869 = vmatpush1.bf16.msra.mxu1 %v7959_v54  ;;  %v8057_v53 = vld [vmem:[%s10732_s1 + $0x1504] ss:$16 sps:$4 sm:$0xff]   ;;  %v8060_v54 = vld [vmem:[%s10732_s1 + $0x150c] ss:$16 sps:$4 sm:$0xff]  }
 0x264   :  { %5311 = vmatprep.subr.bf16.mxu0 %v7964_v55  ;;  %5870 = vmatprep.subr.bf16.mxu1 %v7967_v56  ;;  %v8055_v55 = vld [vmem:[%s10732_s1 + $0x1500] ss:$16 sps:$4 sm:$0xff]   ;;  %v8058_v56 = vld [vmem:[%s10732_s1 + $0x1508] ss:$16 sps:$4 sm:$0xff]  }
 0x267   :  { %5312 = vmatpush1.bf16.msra.mxu0 %v7962_v57  ;;  %5871 = vmatpush1.bf16.msra.mxu1 %v7965_v58  ;;  %v8063_v57 = vld [vmem:[%s10732_s1 + $0x1524] ss:$16 sps:$4 sm:$0xff]   ;;  %v8066_v58 = vld [vmem:[%s10732_s1 + $0x152c] ss:$16 sps:$4 sm:$0xff]  }
 0x268   :  { %5313 = vmatprep.subr.bf16.mxu0 %v7970_v59  ;;  %5872 = vmatprep.subr.bf16.mxu1 %v7973_v60  ;;  %v8061_v59 = vld [vmem:[%s10732_s1 + $0x1520] ss:$16 sps:$4 sm:$0xff]   ;;  %v8064_v60 = vld [vmem:[%s10732_s1 + $0x1528] ss:$16 sps:$4 sm:$0xff]  }
 0x26b   :  { %5314 = vmatpush1.bf16.msra.mxu0 %v7968_v61  ;;  %5873 = vmatpush1.bf16.msra.mxu1 %v7971_v62  ;;  %v8069_v61 = vld [vmem:[%s10732_s1 + $0x1544] ss:$16 sps:$4 sm:$0xff]   ;;  %v8072_v62 = vld [vmem:[%s10732_s1 + $0x154c] ss:$16 sps:$4 sm:$0xff]  }
 0x26c   :  { %5315 = vmatprep.subr.bf16.mxu0 %v7976_v63  ;;  %5874 = vmatprep.subr.bf16.mxu1 %v7979_v0  ;;  %v8067_v63 = vld [vmem:[%s10732_s1 + $0x1540] ss:$16 sps:$4 sm:$0xff]   ;;  %v8070_v0 = vld [vmem:[%s10732_s1 + $0x1548] ss:$16 sps:$4 sm:$0xff]  }
 0x26f   :  { %5316 = vmatpush1.bf16.msra.mxu0 %v7974_v1  ;;  %5875 = vmatpush1.bf16.msra.mxu1 %v7977_v2  ;;  %v8075_v1 = vld [vmem:[%s10732_s1 + $0x1564] ss:$16 sps:$4 sm:$0xff]   ;;  %v8078_v2 = vld [vmem:[%s10732_s1 + $0x156c] ss:$16 sps:$4 sm:$0xff]  }
 0x270   :  { %5317 = vmatprep.subr.bf16.mxu0 %v7982_v3  ;;  %5876 = vmatprep.subr.bf16.mxu1 %v7985_v4  ;;  %v8073_v3 = vld [vmem:[%s10732_s1 + $0x1560] ss:$16 sps:$4 sm:$0xff]   ;;  %v8076_v4 = vld [vmem:[%s10732_s1 + $0x1568] ss:$16 sps:$4 sm:$0xff]  }
 0x273   :  { %5318 = vmatpush1.bf16.msra.mxu0 %v7980_v5  ;;  %5877 = vmatpush1.bf16.msra.mxu1 %v7983_v6  ;;  %v8081_v5 = vld [vmem:[%s10732_s1 + $0x1584] ss:$16 sps:$4 sm:$0xff]   ;;  %v8084_v6 = vld [vmem:[%s10732_s1 + $0x158c] ss:$16 sps:$4 sm:$0xff]  }
 0x274   :  { %5319 = vmatprep.subr.bf16.mxu0 %v7988_v7  ;;  %5878 = vmatprep.subr.bf16.mxu1 %v7991_v8  ;;  %v8079_v7 = vld [vmem:[%s10732_s1 + $0x1580] ss:$16 sps:$4 sm:$0xff]   ;;  %v8082_v8 = vld [vmem:[%s10732_s1 + $0x1588] ss:$16 sps:$4 sm:$0xff]  }
 0x277   :  { %5320 = vmatpush1.bf16.msra.mxu0 %v7986_v9  ;;  %5879 = vmatpush1.bf16.msra.mxu1 %v7989_v10  ;;  %v8087_v9 = vld [vmem:[%s10732_s1 + $0x15a4] ss:$16 sps:$4 sm:$0xff]   ;;  %v8090_v10 = vld [vmem:[%s10732_s1 + $0x15ac] ss:$16 sps:$4 sm:$0xff]  }
 0x278   :  { %5321 = vmatprep.subr.bf16.mxu0 %v7994_v11  ;;  %5880 = vmatprep.subr.bf16.mxu1 %v7997_v12  ;;  %v8085_v11 = vld [vmem:[%s10732_s1 + $0x15a0] ss:$16 sps:$4 sm:$0xff]   ;;  %v8088_v12 = vld [vmem:[%s10732_s1 + $0x15a8] ss:$16 sps:$4 sm:$0xff]  }
 0x27b   :  { %5322 = vmatpush1.bf16.msra.mxu0 %v7992_v13  ;;  %5881 = vmatpush1.bf16.msra.mxu1 %v7995_v14  ;;  %v8093_v13 = vld [vmem:[%s10732_s1 + $0x15c4] ss:$16 sps:$4 sm:$0xff]   ;;  %v8096_v14 = vld [vmem:[%s10732_s1 + $0x15cc] ss:$16 sps:$4 sm:$0xff]  }
 0x27c   :  { %5323 = vmatprep.subr.bf16.mxu0 %v8000_v15  ;;  %5882 = vmatprep.subr.bf16.mxu1 %v8003_v16  ;;  %v8091_v15 = vld [vmem:[%s10732_s1 + $0x15c0] ss:$16 sps:$4 sm:$0xff]   ;;  %v8094_v16 = vld [vmem:[%s10732_s1 + $0x15c8] ss:$16 sps:$4 sm:$0xff]  }
 0x27f   :  { %5324 = vmatpush1.bf16.msra.mxu0 %v7998_v17  ;;  %5883 = vmatpush1.bf16.msra.mxu1 %v8001_v18  ;;  %v8099_v17 = vld [vmem:[%s10732_s1 + $0x15e4] ss:$16 sps:$4 sm:$0xff]   ;;  %v8102_v18 = vld [vmem:[%s10732_s1 + $0x15ec] ss:$16 sps:$4 sm:$0xff]  }
 0x280   :  { %5336 = vmatprep.subr.bf16.mxu0 %v8009_v19  ;;  %5895 = vmatprep.subr.bf16.mxu1 %v8012_v20  ;;  %v8097_v19 = vld [vmem:[%s10732_s1 + $0x15e0] ss:$16 sps:$4 sm:$0xff]   ;;  %v8100_v20 = vld [vmem:[%s10732_s1 + $0x15e8] ss:$16 sps:$4 sm:$0xff]  }
 0x282   :  { %5326 = vmatmul.mubr.bf16.vlgmr.msra.gmra.mrb[0].mxu0 %v8004_v21  ;;  %5885 = vmatmul.mubr.bf16.vlgmr.msra.gmra.mrb[0].mxu1 %v8004_v21  ;;  %v8108_v21 = vld [vmem:[%s10732_s1 + $0x1604] ss:$16 sps:$4 sm:$0xff]  }
 0x283   :  { %5337 = vmatpush1.bf16.msra.mxu0 %v8007_v22  ;;  %5896 = vmatpush1.bf16.msra.mxu1 %v8010_v23  ;;  %v8111_v22 = vld [vmem:[%s10732_s1 + $0x160c] ss:$16 sps:$4 sm:$0xff]   ;;  %v8103_v23 = vld [vmem:[%s10733_s0 + $0x50] ss:$100 sps:$4 sm:$0xff]  }
 0x284   :  { %5338 = vmatprep.subr.bf16.mxu0 %v8015_v24  ;;  %5897 = vmatprep.subr.bf16.mxu1 %v8018_v25  ;;  %v8106_v24 = vld [vmem:[%s10732_s1 + $0x1600] ss:$16 sps:$4 sm:$0xff]   ;;  %v8109_v25 = vld [vmem:[%s10732_s1 + $0x1608] ss:$16 sps:$4 sm:$0xff]  }
 0x285   :  { %5368 = vmatprep.mubr.bf16.mxu0 %v8105_v26  ;;  %5927 = vmatprep.mubr.bf16.mxu1 %v8105_v26  ;;  %v8114_v26 = vld [vmem:[%s10732_s1 + $0x1624] ss:$16 sps:$4 sm:$0xff]  }
 0x287   :  { %5339 = vmatpush1.bf16.msra.mxu0 %v8013_v27  ;;  %5898 = vmatpush1.bf16.msra.mxu1 %v8016_v28  ;;  %v8117_v27 = vld [vmem:[%s10732_s1 + $0x162c] ss:$16 sps:$4 sm:$0xff]  }
 0x288   :  { %5340 = vmatprep.subr.bf16.mxu0 %v8021_v29  ;;  %5899 = vmatprep.subr.bf16.mxu1 %v8024_v30  ;;  %v8204_v28 = vld [vmem:[%s10733_s0 + $0x5c] ss:$100 sps:$4 sm:$0xff]   ;;  %v8115_v30 = vld [vmem:[%s10732_s1 + $0x1628] ss:$16 sps:$4 sm:$0xff]  }
 0x289   :  { %v8112_v29 = vld [vmem:[%s10732_s1 + $0x1620] ss:$16 sps:$4 sm:$0xff]  }
 0x28b   :  { %5341 = vmatpush1.bf16.msra.mxu0 %v8019_v31  ;;  %5900 = vmatpush1.bf16.msra.mxu1 %v8022_v32  ;;  %v8120_v31 = vld [vmem:[%s10732_s1 + $0x1644] ss:$16 sps:$4 sm:$0xff]   ;;  %v8123_v32 = vld [vmem:[%s10732_s1 + $0x164c] ss:$16 sps:$4 sm:$0xff]  }
 0x28c   :  { %5342 = vmatprep.subr.bf16.mxu0 %v8027_v33  ;;  %5901 = vmatprep.subr.bf16.mxu1 %v8030_v34  ;;  %v8118_v33 = vld [vmem:[%s10732_s1 + $0x1640] ss:$16 sps:$4 sm:$0xff]   ;;  %v8121_v34 = vld [vmem:[%s10732_s1 + $0x1648] ss:$16 sps:$4 sm:$0xff]  }
 0x28f   :  { %5343 = vmatpush1.bf16.msra.mxu0 %v8025_v35  ;;  %5902 = vmatpush1.bf16.msra.mxu1 %v8028_v36  ;;  %v8126_v35 = vld [vmem:[%s10732_s1 + $0x1664] ss:$16 sps:$4 sm:$0xff]   ;;  %v8129_v36 = vld [vmem:[%s10732_s1 + $0x166c] ss:$16 sps:$4 sm:$0xff]  }
 0x290   :  { %5344 = vmatprep.subr.bf16.mxu0 %v8033_v37  ;;  %5903 = vmatprep.subr.bf16.mxu1 %v8036_v38  ;;  %v8124_v37 = vld [vmem:[%s10732_s1 + $0x1660] ss:$16 sps:$4 sm:$0xff]   ;;  %v8127_v38 = vld [vmem:[%s10732_s1 + $0x1668] ss:$16 sps:$4 sm:$0xff]  }
 0x293   :  { %5345 = vmatpush1.bf16.msra.mxu0 %v8031_v39  ;;  %5904 = vmatpush1.bf16.msra.mxu1 %v8034_v40  ;;  %v8132_v39 = vld [vmem:[%s10732_s1 + $0x1684] ss:$16 sps:$4 sm:$0xff]   ;;  %v8135_v40 = vld [vmem:[%s10732_s1 + $0x168c] ss:$16 sps:$4 sm:$0xff]  }
 0x294   :  { %5346 = vmatprep.subr.bf16.mxu0 %v8039_v41  ;;  %5905 = vmatprep.subr.bf16.mxu1 %v8042_v42  ;;  %v8130_v41 = vld [vmem:[%s10732_s1 + $0x1680] ss:$16 sps:$4 sm:$0xff]   ;;  %v8133_v42 = vld [vmem:[%s10732_s1 + $0x1688] ss:$16 sps:$4 sm:$0xff]  }
 0x297   :  { %5347 = vmatpush1.bf16.msra.mxu0 %v8037_v43  ;;  %5906 = vmatpush1.bf16.msra.mxu1 %v8040_v44  ;;  %v8138_v43 = vld [vmem:[%s10732_s1 + $0x16a4] ss:$16 sps:$4 sm:$0xff]   ;;  %v8141_v44 = vld [vmem:[%s10732_s1 + $0x16ac] ss:$16 sps:$4 sm:$0xff]  }
 0x298   :  { %5348 = vmatprep.subr.bf16.mxu0 %v8045_v45  ;;  %5907 = vmatprep.subr.bf16.mxu1 %v8048_v46  ;;  %v8136_v45 = vld [vmem:[%s10732_s1 + $0x16a0] ss:$16 sps:$4 sm:$0xff]   ;;  %v8139_v46 = vld [vmem:[%s10732_s1 + $0x16a8] ss:$16 sps:$4 sm:$0xff]  }
 0x29b   :  { %5349 = vmatpush1.bf16.msra.mxu0 %v8043_v47  ;;  %5908 = vmatpush1.bf16.msra.mxu1 %v8046_v48  ;;  %v8144_v47 = vld [vmem:[%s10732_s1 + $0x16c4] ss:$16 sps:$4 sm:$0xff]   ;;  %v8147_v48 = vld [vmem:[%s10732_s1 + $0x16cc] ss:$16 sps:$4 sm:$0xff]  }
 0x29c   :  { %5350 = vmatprep.subr.bf16.mxu0 %v8051_v49  ;;  %5909 = vmatprep.subr.bf16.mxu1 %v8054_v50  ;;  %v8142_v49 = vld [vmem:[%s10732_s1 + $0x16c0] ss:$16 sps:$4 sm:$0xff]   ;;  %v8145_v50 = vld [vmem:[%s10732_s1 + $0x16c8] ss:$16 sps:$4 sm:$0xff]  }
 0x29f   :  { %5351 = vmatpush1.bf16.msra.mxu0 %v8049_v51  ;;  %5910 = vmatpush1.bf16.msra.mxu1 %v8052_v52  ;;  %v8150_v51 = vld [vmem:[%s10732_s1 + $0x16e4] ss:$16 sps:$4 sm:$0xff]   ;;  %v8153_v52 = vld [vmem:[%s10732_s1 + $0x16ec] ss:$16 sps:$4 sm:$0xff]  }
 0x2a0   :  { %5352 = vmatprep.subr.bf16.mxu0 %v8057_v53  ;;  %5911 = vmatprep.subr.bf16.mxu1 %v8060_v54  ;;  %v8148_v53 = vld [vmem:[%s10732_s1 + $0x16e0] ss:$16 sps:$4 sm:$0xff]   ;;  %v8151_v54 = vld [vmem:[%s10732_s1 + $0x16e8] ss:$16 sps:$4 sm:$0xff]  }
 0x2a3   :  { %5353 = vmatpush1.bf16.msra.mxu0 %v8055_v55  ;;  %5912 = vmatpush1.bf16.msra.mxu1 %v8058_v56  ;;  %v8156_v55 = vld [vmem:[%s10732_s1 + $0x1704] ss:$16 sps:$4 sm:$0xff]   ;;  %v8159_v56 = vld [vmem:[%s10732_s1 + $0x170c] ss:$16 sps:$4 sm:$0xff]  }
 0x2a4   :  { %5354 = vmatprep.subr.bf16.mxu0 %v8063_v57  ;;  %5913 = vmatprep.subr.bf16.mxu1 %v8066_v58  ;;  %v8154_v57 = vld [vmem:[%s10732_s1 + $0x1700] ss:$16 sps:$4 sm:$0xff]   ;;  %v8157_v58 = vld [vmem:[%s10732_s1 + $0x1708] ss:$16 sps:$4 sm:$0xff]  }
 0x2a7   :  { %5355 = vmatpush1.bf16.msra.mxu0 %v8061_v59  ;;  %5914 = vmatpush1.bf16.msra.mxu1 %v8064_v60  ;;  %v8162_v59 = vld [vmem:[%s10732_s1 + $0x1724] ss:$16 sps:$4 sm:$0xff]   ;;  %v8165_v60 = vld [vmem:[%s10732_s1 + $0x172c] ss:$16 sps:$4 sm:$0xff]  }
 0x2a8   :  { %5356 = vmatprep.subr.bf16.mxu0 %v8069_v61  ;;  %5915 = vmatprep.subr.bf16.mxu1 %v8072_v62  ;;  %v8160_v61 = vld [vmem:[%s10732_s1 + $0x1720] ss:$16 sps:$4 sm:$0xff]   ;;  %v8163_v62 = vld [vmem:[%s10732_s1 + $0x1728] ss:$16 sps:$4 sm:$0xff]  }
 0x2ab   :  { %5357 = vmatpush1.bf16.msra.mxu0 %v8067_v63  ;;  %5916 = vmatpush1.bf16.msra.mxu1 %v8070_v0  ;;  %v8168_v63 = vld [vmem:[%s10732_s1 + $0x1744] ss:$16 sps:$4 sm:$0xff]   ;;  %v8171_v0 = vld [vmem:[%s10732_s1 + $0x174c] ss:$16 sps:$4 sm:$0xff]  }
 0x2ac   :  { %5358 = vmatprep.subr.bf16.mxu0 %v8075_v1  ;;  %5917 = vmatprep.subr.bf16.mxu1 %v8078_v2  ;;  %v8166_v1 = vld [vmem:[%s10732_s1 + $0x1740] ss:$16 sps:$4 sm:$0xff]   ;;  %v8169_v2 = vld [vmem:[%s10732_s1 + $0x1748] ss:$16 sps:$4 sm:$0xff]  }
 0x2af   :  { %5359 = vmatpush1.bf16.msra.mxu0 %v8073_v3  ;;  %5918 = vmatpush1.bf16.msra.mxu1 %v8076_v4  ;;  %v8174_v3 = vld [vmem:[%s10732_s1 + $0x1764] ss:$16 sps:$4 sm:$0xff]   ;;  %v8177_v4 = vld [vmem:[%s10732_s1 + $0x176c] ss:$16 sps:$4 sm:$0xff]  }
 0x2b0   :  { %5360 = vmatprep.subr.bf16.mxu0 %v8081_v5  ;;  %5919 = vmatprep.subr.bf16.mxu1 %v8084_v6  ;;  %v8172_v5 = vld [vmem:[%s10732_s1 + $0x1760] ss:$16 sps:$4 sm:$0xff]   ;;  %v8175_v6 = vld [vmem:[%s10732_s1 + $0x1768] ss:$16 sps:$4 sm:$0xff]  }
 0x2b3   :  { %5361 = vmatpush1.bf16.msra.mxu0 %v8079_v7  ;;  %5920 = vmatpush1.bf16.msra.mxu1 %v8082_v8  ;;  %v8180_v7 = vld [vmem:[%s10732_s1 + $0x1784] ss:$16 sps:$4 sm:$0xff]   ;;  %v8183_v8 = vld [vmem:[%s10732_s1 + $0x178c] ss:$16 sps:$4 sm:$0xff]  }
 0x2b4   :  { %5362 = vmatprep.subr.bf16.mxu0 %v8087_v9  ;;  %5921 = vmatprep.subr.bf16.mxu1 %v8090_v10  ;;  %v8178_v9 = vld [vmem:[%s10732_s1 + $0x1780] ss:$16 sps:$4 sm:$0xff]   ;;  %v8181_v10 = vld [vmem:[%s10732_s1 + $0x1788] ss:$16 sps:$4 sm:$0xff]  }
 0x2b7   :  { %5363 = vmatpush1.bf16.msra.mxu0 %v8085_v11  ;;  %5922 = vmatpush1.bf16.msra.mxu1 %v8088_v12  ;;  %v8186_v11 = vld [vmem:[%s10732_s1 + $0x17a4] ss:$16 sps:$4 sm:$0xff]   ;;  %v8189_v12 = vld [vmem:[%s10732_s1 + $0x17ac] ss:$16 sps:$4 sm:$0xff]  }
 0x2b8   :  { %5364 = vmatprep.subr.bf16.mxu0 %v8093_v13  ;;  %5923 = vmatprep.subr.bf16.mxu1 %v8096_v14  ;;  %v8184_v13 = vld [vmem:[%s10732_s1 + $0x17a0] ss:$16 sps:$4 sm:$0xff]   ;;  %v8187_v14 = vld [vmem:[%s10732_s1 + $0x17a8] ss:$16 sps:$4 sm:$0xff]  }
 0x2bb   :  { %5365 = vmatpush1.bf16.msra.mxu0 %v8091_v15  ;;  %5924 = vmatpush1.bf16.msra.mxu1 %v8094_v16  ;;  %v8192_v15 = vld [vmem:[%s10732_s1 + $0x17c4] ss:$16 sps:$4 sm:$0xff]   ;;  %v8195_v16 = vld [vmem:[%s10732_s1 + $0x17cc] ss:$16 sps:$4 sm:$0xff]  }
 0x2bc   :  { %5366 = vmatprep.subr.bf16.mxu0 %v8099_v17  ;;  %5925 = vmatprep.subr.bf16.mxu1 %v8102_v18  ;;  %v8190_v17 = vld [vmem:[%s10732_s1 + $0x17c0] ss:$16 sps:$4 sm:$0xff]   ;;  %v8193_v18 = vld [vmem:[%s10732_s1 + $0x17c8] ss:$16 sps:$4 sm:$0xff]  }
 0x2bf   :  { %5367 = vmatpush1.bf16.msra.mxu0 %v8097_v19  ;;  %5926 = vmatpush1.bf16.msra.mxu1 %v8100_v20  ;;  %v8198_v19 = vld [vmem:[%s10732_s1 + $0x17e4] ss:$16 sps:$4 sm:$0xff]   ;;  %v8201_v20 = vld [vmem:[%s10732_s1 + $0x17ec] ss:$16 sps:$4 sm:$0xff]  }
 0x2c0   :  { %5379 = vmatprep.subr.bf16.mxu0 %v8108_v21  ;;  %5938 = vmatprep.subr.bf16.mxu1 %v8111_v22  ;;  %v8196_v21 = vld [vmem:[%s10732_s1 + $0x17e0] ss:$16 sps:$4 sm:$0xff]   ;;  %v8199_v22 = vld [vmem:[%s10732_s1 + $0x17e8] ss:$16 sps:$4 sm:$0xff]  }
 0x2c2   :  { %5369 = vmatmul.mubr.bf16.vlgmr.msra.gmra.mrb[0].mxu0 %v8103_v23  ;;  %5928 = vmatmul.mubr.bf16.vlgmr.msra.gmra.mrb[0].mxu1 %v8103_v23  ;;  %v8207_v23 = vld [vmem:[%s10732_s1 + $0x1804] ss:$16 sps:$4 sm:$0xff]  }
 0x2c3   :  { %5380 = vmatpush1.bf16.msra.mxu0 %v8106_v24  ;;  %5939 = vmatpush1.bf16.msra.mxu1 %v8109_v25  ;;  %v8210_v24 = vld [vmem:[%s10732_s1 + $0x180c] ss:$16 sps:$4 sm:$0xff]  }
 0x2c4   :  { %5381 = vmatprep.subr.bf16.mxu0 %v8114_v26  ;;  %5940 = vmatprep.subr.bf16.mxu1 %v8117_v27  ;;  %v8202_v25 = vld [vmem:[%s10733_s0 + $0x58] ss:$100 sps:$4 sm:$0xff]   ;;  %v8205_v26 = vld [vmem:[%s10732_s1 + $0x1800] ss:$16 sps:$4 sm:$0xff]  }
 0x2c5   :  { %5411 = vmatprep.mubr.bf16.mxu0 %v8204_v28  ;;  %5970 = vmatprep.mubr.bf16.mxu1 %v8204_v28  ;;  %v8208_v27 = vld [vmem:[%s10732_s1 + $0x1808] ss:$16 sps:$4 sm:$0xff]   ;;  %v8213_v28 = vld [vmem:[%s10732_s1 + $0x1824] ss:$16 sps:$4 sm:$0xff]  }
 0x2c7   :  { %5382 = vmatpush1.bf16.msra.mxu0 %v8112_v29  ;;  %5941 = vmatpush1.bf16.msra.mxu1 %v8115_v30  ;;  %v8216_v29 = vld [vmem:[%s10732_s1 + $0x182c] ss:$16 sps:$4 sm:$0xff]   ;;  %v8211_v30 = vld [vmem:[%s10732_s1 + $0x1820] ss:$16 sps:$4 sm:$0xff]  }
 0x2c8   :  { %5383 = vmatprep.subr.bf16.mxu0 %v8120_v31  ;;  %5942 = vmatprep.subr.bf16.mxu1 %v8123_v32  ;;  %v8214_v31 = vld [vmem:[%s10732_s1 + $0x1828] ss:$16 sps:$4 sm:$0xff]   ;;  %v8219_v32 = vld [vmem:[%s10732_s1 + $0x1844] ss:$16 sps:$4 sm:$0xff]  }
 0x2cb   :  { %5384 = vmatpush1.bf16.msra.mxu0 %v8118_v33  ;;  %5943 = vmatpush1.bf16.msra.mxu1 %v8121_v34  ;;  %v8222_v33 = vld [vmem:[%s10732_s1 + $0x184c] ss:$16 sps:$4 sm:$0xff]   ;;  %v8230_v34 = vmov 0  }
 0x2cc   :  { %5385 = vmatprep.subr.bf16.mxu0 %v8126_v35  ;;  %5944 = vmatprep.subr.bf16.mxu1 %v8129_v36  ;;  %v8217_v35 = vld [vmem:[%s10732_s1 + $0x1840] ss:$16 sps:$4 sm:$0xff]   ;;  %v8220_v36 = vld [vmem:[%s10732_s1 + $0x1848] ss:$16 sps:$4 sm:$0xff]  }
 0x2cf   :  { %5386 = vmatpush1.bf16.msra.mxu0 %v8124_v37  ;;  %5945 = vmatpush1.bf16.msra.mxu1 %v8127_v38  ;;  %v8225_v37 = vld [vmem:[%s10732_s1 + $0x1864] ss:$16 sps:$4 sm:$0xff]   ;;  %v8228_v38 = vld [vmem:[%s10732_s1 + $0x186c] ss:$16 sps:$4 sm:$0xff]  }
 0x2d0   :  { %5387 = vmatprep.subr.bf16.mxu0 %v8132_v39  ;;  %5946 = vmatprep.subr.bf16.mxu1 %v8135_v40  ;;  %v8223_v39 = vld [vmem:[%s10732_s1 + $0x1860] ss:$16 sps:$4 sm:$0xff]   ;;  %v8226_v40 = vld [vmem:[%s10732_s1 + $0x1868] ss:$16 sps:$4 sm:$0xff]  }
 0x2d3   :  { %5388 = vmatpush1.bf16.msra.mxu0 %v8130_v41  ;;  %5947 = vmatpush1.bf16.msra.mxu1 %v8133_v42  ;;  %v8229_v41 = vld [vmem:[%s10733_s0 + $0x60] ss:$100 sps:$4 sm:$0xff]   ;;  %v12_v42 = vstv %s10734_s4 }
 0x2d4   :  { %5389 = vmatprep.subr.bf16.mxu0 %v8138_v43  ;;  %5948 = vmatprep.subr.bf16.mxu1 %v8141_v44  ;;  %13 = vst [vmem:[#allocation2] sm:$0x1] %v12_v42  ;;  %v837_v43 = vlaneseq }
 0x2d6   :  { %v838_v44 = vshrl.u32 %v837_v43, 7 }
 0x2d7   :  { %5390 = vmatpush1.bf16.msra.mxu0 %v8136_v45  ;;  %5949 = vmatpush1.bf16.msra.mxu1 %v8139_v46 }
 0x2d8   :  { %5391 = vmatprep.subr.bf16.mxu0 %v8144_v47  ;;  %5950 = vmatprep.subr.bf16.mxu1 %v8147_v48  ;;  %v839_v45 = vsub.s32 0, %v838_v44  ;;  %v847_v46 = vsub.s32 2, %v838_v44  ;;  %v835_v47 = vld [vmem:[%s10735_s2] sm:$0xf]  ;;  %v843_v48 = vsub.s32 1, %v838_v44 }
 0x2db   :  { %5392 = vmatpush1.bf16.msra.mxu0 %v8142_v49  ;;  %5951 = vmatpush1.bf16.msra.mxu1 %v8145_v50  ;;  %v851_v49 = vsub.s32 3, %v838_v44  ;;  %v840_v50 = vrot.slane %v835_v47, %v839_v45 }
 0x2dc   :  { %5393 = vmatprep.subr.bf16.mxu0 %v8150_v51  ;;  %5952 = vmatprep.subr.bf16.mxu1 %v8153_v52  ;;  %v848_v51 = vrot.slane %v835_v47, %v847_v46  ;;  %v6040_v52 = vld [vmem:[%s10736_s3] sm:$0xf] }
 0x2df   :  { %5394 = vmatpush1.bf16.msra.mxu0 %v8148_v53  ;;  %5953 = vmatpush1.bf16.msra.mxu1 %v8151_v54  ;;  %v844_v53 = vrot.slane %v835_v47, %v843_v48  ;;  %v852_v54 = vrot.slane %v835_v47, %v851_v49 }
 0x2e0   :  { %5395 = vmatprep.subr.bf16.mxu0 %v8156_v55  ;;  %5954 = vmatprep.subr.bf16.mxu1 %v8159_v56 }
 0x2e3   :  { %5396 = vmatpush1.bf16.msra.mxu0 %v8154_v57  ;;  %5955 = vmatpush1.bf16.msra.mxu1 %v8157_v58  ;;  %v6045_v58 = vrot.slane %v6040_v52, %v839_v45 }
 0x2e4   :  { %5397 = vmatprep.subr.bf16.mxu0 %v8162_v59  ;;  %5956 = vmatprep.subr.bf16.mxu1 %v8165_v60 }
 0x2e7   :  { %5398 = vmatpush1.bf16.msra.mxu0 %v8160_v61  ;;  %5957 = vmatpush1.bf16.msra.mxu1 %v8163_v62  ;;  %v6053_v62 = vrot.slane %v6040_v52, %v847_v46 }
 0x2e8   :  { %5399 = vmatprep.subr.bf16.mxu0 %v8168_v63  ;;  %5958 = vmatprep.subr.bf16.mxu1 %v8171_v0  ;;  %v6049_v0 = vrot.slane %v6040_v52, %v843_v48 }
 0x2eb   :  { %5400 = vmatpush1.bf16.msra.mxu0 %v8166_v1  ;;  %5959 = vmatpush1.bf16.msra.mxu1 %v8169_v2 }
 0x2ec   :  { %5401 = vmatprep.subr.bf16.mxu0 %v8174_v3  ;;  %5960 = vmatprep.subr.bf16.mxu1 %v8177_v4 }
 0x2ef   :  { %5402 = vmatpush1.bf16.msra.mxu0 %v8172_v5  ;;  %5961 = vmatpush1.bf16.msra.mxu1 %v8175_v6 }
 0x2f0   :  { %5403 = vmatprep.subr.bf16.mxu0 %v8180_v7  ;;  %5962 = vmatprep.subr.bf16.mxu1 %v8183_v8 }
 0x2f3   :  { %5404 = vmatpush1.bf16.msra.mxu0 %v8178_v9  ;;  %5963 = vmatpush1.bf16.msra.mxu1 %v8181_v10 }
 0x2f4   :  { %5405 = vmatprep.subr.bf16.mxu0 %v8186_v11  ;;  %5964 = vmatprep.subr.bf16.mxu1 %v8189_v12 }
 0x2f7   :  { %5406 = vmatpush1.bf16.msra.mxu0 %v8184_v13  ;;  %5965 = vmatpush1.bf16.msra.mxu1 %v8187_v14 }
 0x2f8   :  { %5407 = vmatprep.subr.bf16.mxu0 %v8192_v15  ;;  %5966 = vmatprep.subr.bf16.mxu1 %v8195_v16 }
 0x2fb   :  { %5408 = vmatpush1.bf16.msra.mxu0 %v8190_v17  ;;  %5967 = vmatpush1.bf16.msra.mxu1 %v8193_v18 }
 0x2fc   :  { %5409 = vmatprep.subr.bf16.mxu0 %v8198_v19  ;;  %5968 = vmatprep.subr.bf16.mxu1 %v8201_v20  ;;  %v6057_v20 = vrot.slane %v6040_v52, %v851_v49 }
 0x2ff   :  { %5410 = vmatpush1.bf16.msra.mxu0 %v8196_v21  ;;  %5969 = vmatpush1.bf16.msra.mxu1 %v8199_v22 }
 0x300   :  { %5422 = vmatprep.subr.bf16.mxu0 %v8207_v23  ;;  %5981 = vmatprep.subr.bf16.mxu1 %v8210_v24 }
 0x302   :  { %5412 = vmatmul.mubr.bf16.vlgmr.msra.gmra.mrb[0].mxu0 %v8202_v25  ;;  %5971 = vmatmul.mubr.bf16.vlgmr.msra.gmra.mrb[0].mxu1 %v8202_v25 }
 0x303   :  { %5423 = vmatpush1.bf16.msra.mxu0 %v8205_v26  ;;  %5982 = vmatpush1.bf16.msra.mxu1 %v8208_v27 }
 0x304   :  { %5424 = vmatprep.subr.bf16.mxu0 %v8213_v28  ;;  %5983 = vmatprep.subr.bf16.mxu1 %v8216_v29 }
 0x305   :  { %5454 = vmatprep.mubr.bf16.mxu0 %v8230_v34  ;;  %6013 = vmatprep.mubr.bf16.mxu1 %v8230_v34 }
 0x307   :  { %5425 = vmatpush1.bf16.msra.mxu0 %v8211_v30  ;;  %5984 = vmatpush1.bf16.msra.mxu1 %v8214_v31 }
 0x308   :  { %5426 = vmatprep.subr.bf16.mxu0 %v8219_v32  ;;  %5985 = vmatprep.subr.bf16.mxu1 %v8222_v33  ;;  %v6911_v33 = vld [vmem:[#allocation2] ss:$0 sm:$0xff] }
 0x30b   :  { %5427 = vmatpush1.bf16.msra.mxu0 %v8217_v35  ;;  %5986 = vmatpush1.bf16.msra.mxu1 %v8220_v36 }
 0x30c   :  { %5428 = vmatprep.subr.bf16.mxu0 %v8225_v37  ;;  %5987 = vmatprep.subr.bf16.mxu1 %v8228_v38 }
 0x30f   :  { %5429 = vmatpush1.bf16.msra.mxu0 %v8223_v39  ;;  %5988 = vmatpush1.bf16.msra.mxu1 %v8226_v40 }
 0x312   :  { %6909 = vmatmul.mubr.msk.bf16.vlgmr.msra.gmra.mrb[0].mxu0 %vm4902_vm0, %v8229_v41  ;;  %6910 = vmatmul.mubr.msk.bf16.vlgmr.msra.gmra.mrb[0].mxu1 %vm4902_vm0, %v8229_v41 }
 0x3e5   :  { %v5456_v55 = vpop.f32.mrb[0].mxu0  ;;  %v6015_v56 = vpop.f32.mrb[0].mxu1 }
 0x3e6   :  { %v6912_v57 = vadd.f32 %v5456_v55, %v840_v50  ;;  %v6916_v59 = vadd.f32 %v6015_v56, %v848_v51  ;;  %v5458_v60 = vpop.f32.mrb[1].mxu0  ;;  %v6017_v61 = vpop.f32.mrb[1].mxu1 }
 0x3e7   :  { %v6913_v63 = vadd.f32 %v5458_v60, %v844_v53  ;;  %v6917_v1 = vadd.f32 %v6017_v61, %v852_v54  ;;  %v5460_v2 = vpop.f32.mrb[2].mxu0  ;;  %v6019_v3 = vpop.f32.mrb[2].mxu1 }
 0x3e8   :  { %v6024_v4 = vmax.f32 %v6912_v57, 0.0  ;;  %v6026_v5 = vmax.f32 %v6916_v59, 0.0  ;;  %v6914_v6 = vadd.f32 %v5460_v2, %v840_v50  ;;  %v6918_v7 = vadd.f32 %v6019_v3, %v848_v51  ;;  %v5462_v8 = vpop.f32.mrb[3].mxu0  ;;  %v6021_v9 = vpop.f32.mrb[3].mxu1 }
 0x3e9   :  { %v6025_v10 = vmax.f32 %v6913_v63, 0.0  ;;  %v6027_v11 = vmax.f32 %v6917_v1, 0.0  ;;  %v6915_v12 = vadd.f32 %v5462_v8, %v844_v53  ;;  %v6919_v13 = vadd.f32 %v6021_v9, %v852_v54 }
 0x3ea   :  { %6032 = vst [vmem:[%s10737_s5] sm:$0xff] %v6024_v4  ;;  %v6062_v14 = vmul.f32 %v6045_v58, %v6024_v4  ;;  %6034 = vst [vmem:[%s10737_s5 + $0x10] sm:$0xff] %v6026_v5  ;;  %v6028_v15 = vmax.f32 %v6914_v6, 0.0  ;;  %v6030_v16 = vmax.f32 %v6918_v7, 0.0  ;;  %v6064_v22 = vmul.f32 %v6053_v62, %v6026_v5 }
 0x3eb   :  { %6033 = vst [vmem:[%s10737_s5 + $0x8] sm:$0xff] %v6025_v10  ;;  %v6063_v17 = vmul.f32 %v6049_v0, %v6025_v10  ;;  %6035 = vst [vmem:[%s10737_s5 + $0x18] sm:$0xff] %v6027_v11  ;;  %v6029_v18 = vmax.f32 %v6915_v12, 0.0  ;;  %v6031_v19 = vmax.f32 %v6919_v13, 0.0  ;;  %v6065_v27 = vmul.f32 %v6057_v20, %v6027_v11 }
 0x3ec   :  { %6036 = vst [vmem:[%s10737_s5 + $0x20] sm:$0xff] %v6028_v15  ;;  %v6066_v21 = vmul.f32 %v6045_v58, %v6028_v15  ;;  %6038 = vst [vmem:[%s10737_s5 + $0x30] sm:$0xff] %v6030_v16  ;;  %v6068_v25 = vmul.f32 %v6053_v62, %v6030_v16 }
 0x3ed   :  { %6037 = vst [vmem:[%s10737_s5 + $0x28] sm:$0xff] %v6029_v18  ;;  %v6067_v23 = vmul.f32 %v6049_v0, %v6029_v18  ;;  %6039 = vst [vmem:[%s10737_s5 + $0x38] sm:$0xff] %v6031_v19  ;;  %v6070_v24 = vadd.f32 %v6063_v17, %v6062_v14  ;;  %v6069_v29 = vmul.f32 %v6057_v20, %v6031_v19 }
 0x3ef   :  { %v6075_v26 = vadd.f32 %v6067_v23, %v6066_v21  ;;  %v6071_v28 = vadd.f32 %v6070_v24, %v6064_v22 }
 0x3f1   :  { %v6072_v30 = vadd.f32 %v6071_v28, %v6065_v27  ;;  %v6076_v31 = vadd.f32 %v6075_v26, %v6068_v25 }
 0x3f3   :  { %6073 = vadd.xlane.f32.xlu0 %v6072_v30  ;;  %v6077_v32 = vadd.f32 %v6076_v31, %v6069_v29 }
 0x3f7   :  { %6078 = vadd.xlane.f32.xlu0 %v6077_v32 }
 0x480   :  { %v6074_v34 = vpop.xlane.xlu0 %6073 }
 0x481   :  { %v6087_v35 = vadd.f32 %v6911_v33, %v6074_v34 }
 0x483   :  { %6090 = vst.msk [vmem:[%s10738_s6] sm:$0xff] %vm6089_vm1, %v6087_v35 }
 0x484   :  { %v6079_v36 = vpop.xlane.xlu0 %6078 }
 0x485   :  { %v6088_v37 = vadd.f32 %v6911_v33, %v6079_v36 }
 0x487   :  { %6091 = vst.msk [vmem:[%s10738_s6 + $0x8] sm:$0xff] %vm6089_vm1, %v6088_v37 }

</bundles_post_ra>
